<compile_context>
chip_gen: v7x
topology: tpu7x:2x2x1
jax: 0.10.0
libtpu: 0.0.40
codegen_flags: <defaults>
</compile_context>

<pallas_src>
import jax
import jax.numpy as jnp
from jax.experimental import pallas as pl
from jax.experimental.pallas import tpu as pltpu


INPUT_SIZE = 28 * 28        # 784
HIDDEN_SIZE = 1024
NUM_CLASSES = 10
PAD_CLASSES = 128           # lane-dense fc2 output width
NEG_BIG = -1e30             # acts as -inf for the padded logit lanes (f32 logits)
TILE_B = 512                # per-step batch tile (amortizes per-step overhead)
SUBLANE = 8                 # f32 x / out tile sublane granule (16 if x ever arrives bf16)


def _round_up(n, m):
    return ((n + m - 1) // m) * m


def _neuralnet_kernel(x_ref, w1_ref, b1_ref, w2_ref, b2_ref, out_ref):
    # fc1: bf16 operands, f32 accumulation on the MXU.
    x_bf16 = x_ref[...].astype(jnp.bfloat16)
    h = jnp.dot(x_bf16, w1_ref[...], preferred_element_type=jnp.float32)
    # Bias add + ReLU in f32; cast to bf16 fused here so fc2 consumes bf16 directly.
    h = jnp.maximum(h + b1_ref[...], jnp.float32(0.0)).astype(jnp.bfloat16)

    # fc2 (padded to 128 output lanes; pad lanes carry bias = -1e30 -> exp()==0).
    logits = jnp.dot(h, w2_ref[...], preferred_element_type=jnp.float32)
    logits = logits + b2_ref[...]

    # LogSoftmax along dim=1 (last dim), numerically stable, in f32.
    m = jnp.max(logits, axis=-1, keepdims=True)
    shifted = logits - m
    lse = jnp.log(jnp.sum(jnp.exp(shifted), axis=-1, keepdims=True))
    out_ref[...] = shifted - lse


def prepare_params(w1, b1, w2, b2):
    """One-time packing of PyTorch-layout params into kernel layout.

    w1: (hidden, input), b1: (hidden,), w2: (num_classes, hidden), b2: (num_classes,)
    Returns (w1_t, b1_2d, w2_t_pad, b2_pad): weights pre-transposed to (in, out)
    and cast to bf16, fc2 output dim zero/neg-big padded to 128 lanes, biases f32.
    """
    w1_t = jnp.transpose(w1).astype(jnp.bfloat16)                       # (784, 1024) bf16
    b1_2d = b1.reshape(1, HIDDEN_SIZE).astype(jnp.float32)              # (1, 1024) f32
    w2_t = jnp.transpose(w2).astype(jnp.float32)                        # (1024, 10)
    w2_t_pad = jnp.zeros((HIDDEN_SIZE, PAD_CLASSES), jnp.float32)
    w2_t_pad = w2_t_pad.at[:, :NUM_CLASSES].set(w2_t).astype(jnp.bfloat16)  # (1024, 128) bf16
    b2_pad = jnp.full((1, PAD_CLASSES), NEG_BIG, jnp.float32)
    b2_pad = b2_pad.at[0, :NUM_CLASSES].set(b2.astype(jnp.float32))     # (1, 128) f32
    return w1_t, b1_2d, w2_t_pad, b2_pad


def _make_call(B, tb, grid, shapes, param_pipeline_mode):
    w1_shape, b1_shape, w2_shape, b2_shape = shapes

    def const_spec(shape):
        # Weights/biases: constant index -> VMEM-resident across grid steps.
        if param_pipeline_mode is None:
            return pl.BlockSpec(shape, lambda i: (0, 0))
        return pl.BlockSpec(shape, lambda i: (0, 0), pipeline_mode=param_pipeline_mode)

    return pl.pallas_call(
        _neuralnet_kernel,
        out_shape=jax.ShapeDtypeStruct((B, PAD_CLASSES), jnp.float32),
        grid=grid,
        in_specs=[
            pl.BlockSpec((tb, INPUT_SIZE), lambda i: (i, 0)),   # x: tiled along batch
            const_spec(w1_shape),
            const_spec(b1_shape),
            const_spec(w2_shape),
            const_spec(b2_shape),
        ],
        out_specs=pl.BlockSpec((tb, PAD_CLASSES), lambda i: (i, 0)),
        compiler_params=pltpu.CompilerParams(
            dimension_semantics=("parallel",),   # batch steps shard across TCs on v7x
            vmem_limit_bytes=32 << 20,
        ),
    )


def neuralnet_forward(x, params):
    """x: (B, input_size) f32; params: output of prepare_params.
       Returns (B, num_classes) log-probabilities."""
    w1_t, b1_2d, w2_t_pad, b2_pad = params
    B = x.shape[0]

    # Batch tile: capped at TILE_B, >= 2 grid steps when B allows (v7x megacore),
    # second-to-last block dim kept sublane-aligned (8 for f32 x tiles).
    half = _round_up(max(pl.cdiv(B, 2), 1), SUBLANE)
    tb = min(TILE_B, half)
    grid = (pl.cdiv(B, tb),)
    shapes = (w1_t.shape, b1_2d.shape, w2_t_pad.shape, b2_pad.shape)

    try:
        # Single-buffer the never-changing params (saves ~1.85 MB VMEM).
        call = _make_call(B, tb, grid, shapes, pl.Buffered(1))
        out_pad = call(x, w1_t, b1_2d, w2_t_pad, b2_pad)
    except Exception:
        # Fallback for Pallas versions that reject single-buffered pipeline_mode.
        call = _make_call(B, tb, grid, shapes, None)
        out_pad = call(x, w1_t, b1_2d, w2_t_pad, b2_pad)

    # Drop the padded logit lanes. (If latency-critical, a consumer could take
    # the padded (B, 128) buffer directly and index lanes [:10] itself.)
    return out_pad[:, :NUM_CLASSES]


def init_params(key):
    """Deterministic init mimicking PyTorch nn.Linear default (uniform +-1/sqrt(fan_in))."""
    k1, k2, k3, k4 = jax.random.split(key, 4)
    bound1 = 1.0 / jnp.sqrt(jnp.float32(INPUT_SIZE))
    bound2 = 1.0 / jnp.sqrt(jnp.float32(HIDDEN_SIZE))
    w1 = jax.random.uniform(k1, (HIDDEN_SIZE, INPUT_SIZE), jnp.float32, -bound1, bound1)
    b1 = jax.random.uniform(k2, (HIDDEN_SIZE,), jnp.float32, -bound1, bound1)
    w2 = jax.random.uniform(k3, (NUM_CLASSES, HIDDEN_SIZE), jnp.float32, -bound2, bound2)
    b2 = jax.random.uniform(k4, (NUM_CLASSES,), jnp.float32, -bound2, bound2)
    return w1, b1, w2, b2


def _reference_forward(x, w1, b1, w2, b2):
    h = jnp.maximum(x @ w1.T + b1, 0.0)
    logits = h @ w2.T + b2
    return jax.nn.log_softmax(logits, axis=-1)


if __name__ == "__main__":
    key = jax.random.PRNGKey(0)
    kx, kp = jax.random.split(key)

    B = 8
    x = jax.random.normal(kx, (B, INPUT_SIZE), jnp.float32)
    w1, b1, w2, b2 = init_params(kp)

    params = prepare_params(w1, b1, w2, b2)   # one-time packing (transpose + pad + bf16)
    out = neuralnet_forward(x, params)
    out = jax.block_until_ready(out)

    assert out.shape == (B, NUM_CLASSES)

    # Sanity 1: rows of LogSoftmax output exponentiate-and-sum to 1.
    row_sums = jnp.sum(jnp.exp(out), axis=1)
    assert bool(jnp.all(jnp.abs(row_sums - 1.0) < 1e-4))

    # Sanity 2: matches the pure-f32 JAX reference forward (bf16 matmul tolerance).
    ref = _reference_forward(x, w1, b1, w2, b2)
    assert bool(jnp.all(jnp.abs(out - ref) < 2e-2))

    print("KERNEL_OK")
</pallas_src>

<mosaic_0001>
module attributes {stable_mosaic.version = 11 : i64} {
  func.func @_neuralnet_kernel(%arg0: i32, %arg1: memref<8x784xf32, #tpu.memory_space<vmem>>, %arg2: memref<784x1024xbf16, #tpu.memory_space<vmem>>, %arg3: memref<1x1024xf32, #tpu.memory_space<vmem>>, %arg4: memref<1024x128xbf16, #tpu.memory_space<vmem>>, %arg5: memref<1x128xf32, #tpu.memory_space<vmem>>, %arg6: memref<8x128xf32, #tpu.memory_space<vmem>>) attributes {dimension_semantics = [#tpu.dimension_semantics<parallel>], iteration_bounds = array<i64: 1>, scalar_prefetch = 0 : i64, scratch_operands = 0 : i64, tpu.core_type = #tpu.core_type<tc>, window_params = [{transform_indices = @transform_0, window_bounds = array<i64: 8, 784>}, {pipeline_mode = #tpu.pipeline_mode<synchronous>, transform_indices = @transform_1, window_bounds = array<i64: 784, 1024>}, {pipeline_mode = #tpu.pipeline_mode<synchronous>, transform_indices = @transform_2, window_bounds = array<i64: 1, 1024>}, {pipeline_mode = #tpu.pipeline_mode<synchronous>, transform_indices = @transform_3, window_bounds = array<i64: 1024, 128>}, {pipeline_mode = #tpu.pipeline_mode<synchronous>, transform_indices = @transform_4, window_bounds = array<i64: 1, 128>}, {transform_indices = @transform_5, window_bounds = array<i64: 8, 128>}]} {
    %c0 = arith.constant 0 : index
    %c0_0 = arith.constant 0 : index
    %0 = vector.load %arg1[%c0, %c0_0] : memref<8x784xf32, #tpu.memory_space<vmem>>, vector<8x784xf32>
    %1 = arith.truncf %0 : vector<8x784xf32> to vector<8x784xbf16>
    %c0_1 = arith.constant 0 : index
    %c0_2 = arith.constant 0 : index
    %2 = vector.load %arg2[%c0_1, %c0_2] : memref<784x1024xbf16, #tpu.memory_space<vmem>>, vector<784x1024xbf16>
    %cst = arith.constant dense<0.000000e+00> : vector<8x1024xf32>
    %3 = tpu.matmul %1, %2, %cst {dimension_numbers = #tpu.dot_dimension_numbers<[1], [0], [0], [1], [0, 0, 1, 1], [], []>} : vector<8x784xbf16>, vector<784x1024xbf16>, vector<8x1024xf32> -> vector<8x1024xf32>
    %c0_3 = arith.constant 0 : index
    %c0_4 = arith.constant 0 : index
    %4 = vector.load %arg3[%c0_3, %c0_4] : memref<1x1024xf32, #tpu.memory_space<vmem>>, vector<1x1024xf32>
    %5 = vector.broadcast %4 : vector<1x1024xf32> to vector<8x1024xf32>
    %6 = arith.addf %3, %5 : vector<8x1024xf32>
    %cst_5 = arith.constant 0.000000e+00 : f32
    %7 = vector.broadcast %cst_5 : f32 to vector<8x1024xf32>
    %8 = arith.maximumf %6, %7 : vector<8x1024xf32>
    %9 = arith.truncf %8 : vector<8x1024xf32> to vector<8x1024xbf16>
    %c0_6 = arith.constant 0 : index
    %c0_7 = arith.constant 0 : index
    %10 = vector.load %arg4[%c0_6, %c0_7] : memref<1024x128xbf16, #tpu.memory_space<vmem>>, vector<1024x128xbf16>
    %cst_8 = arith.constant dense<0.000000e+00> : vector<8x128xf32>
    %11 = tpu.matmul %9, %10, %cst_8 {dimension_numbers = #tpu.dot_dimension_numbers<[1], [0], [0], [1], [0, 0, 1, 1], [], []>} : vector<8x1024xbf16>, vector<1024x128xbf16>, vector<8x128xf32> -> vector<8x128xf32>
    %c0_9 = arith.constant 0 : index
    %c0_10 = arith.constant 0 : index
    %12 = vector.load %arg5[%c0_9, %c0_10] : memref<1x128xf32, #tpu.memory_space<vmem>>, vector<1x128xf32>
    %13 = vector.broadcast %12 : vector<1x128xf32> to vector<8x128xf32>
    %14 = arith.addf %11, %13 : vector<8x128xf32>
    %cst_11 = arith.constant dense<0xFF800000> : vector<8xf32>
    %15 = vector.multi_reduction <maximumf>, %14, %cst_11 [1] : vector<8x128xf32> to vector<8xf32>
    %16 = vector.shape_cast %15 : vector<8xf32> to vector<8x1xf32>
    %17 = vector.broadcast %16 : vector<8x1xf32> to vector<8x128xf32>
    %18 = arith.subf %14, %17 : vector<8x128xf32>
    %19 = math.exp %18 : vector<8x128xf32>
    %cst_12 = arith.constant dense<0.000000e+00> : vector<8xf32>
    %20 = vector.multi_reduction <add>, %19, %cst_12 [1] : vector<8x128xf32> to vector<8xf32>
    %21 = vector.shape_cast %20 : vector<8xf32> to vector<8x1xf32>
    %22 = math.log %21 : vector<8x1xf32>
    %23 = vector.broadcast %22 : vector<8x1xf32> to vector<8x128xf32>
    %24 = arith.subf %18, %23 : vector<8x128xf32>
    %c0_13 = arith.constant 0 : index
    %c0_14 = arith.constant 0 : index
    %25 = vector.load %arg6[%c0_13, %c0_14] : memref<8x128xf32, #tpu.memory_space<vmem>>, vector<8x128xf32>
    tpu.vector_store %arg6[%c0_13, %c0_14], %24 {strides = array<i32>} : memref<8x128xf32, #tpu.memory_space<vmem>>, vector<8x128xf32>,
    return
  }
  func.func @transform_0(%arg0: i32) -> (i32, i32) {
    %c0_i32 = arith.constant 0 : i32
    %c0_i32_0 = arith.constant 0 : i32
    return %arg0, %c0_i32 : i32, i32
  }
  func.func @transform_1(%arg0: i32) -> (i32, i32) {
    %c0_i32 = arith.constant 0 : i32
    %c0_i32_0 = arith.constant 0 : i32
    %c0_i32_1 = arith.constant 0 : i32
    return %c0_i32, %c0_i32_0 : i32, i32
  }
  func.func @transform_2(%arg0: i32) -> (i32, i32) {
    %c0_i32 = arith.constant 0 : i32
    %c0_i32_0 = arith.constant 0 : i32
    %c0_i32_1 = arith.constant 0 : i32
    return %c0_i32, %c0_i32_0 : i32, i32
  }
  func.func @transform_3(%arg0: i32) -> (i32, i32) {
    %c0_i32 = arith.constant 0 : i32
    %c0_i32_0 = arith.constant 0 : i32
    %c0_i32_1 = arith.constant 0 : i32
    return %c0_i32, %c0_i32_0 : i32, i32
  }
  func.func @transform_4(%arg0: i32) -> (i32, i32) {
    %c0_i32 = arith.constant 0 : i32
    %c0_i32_0 = arith.constant 0 : i32
    %c0_i32_1 = arith.constant 0 : i32
    return %c0_i32, %c0_i32_0 : i32, i32
  }
  func.func @transform_5(%arg0: i32) -> (i32, i32) {
    %c0_i32 = arith.constant 0 : i32
    %c0_i32_0 = arith.constant 0 : i32
    return %arg0, %c0_i32 : i32, i32
  }
}

module attributes {stable_mosaic.version = 11 : i64} {
  func.func @_neuralnet_kernel(%arg0: i32, %arg1: memref<8x784xf32, #tpu.memory_space<vmem>>, %arg2: memref<784x1024xbf16, #tpu.memory_space<vmem>>, %arg3: memref<1x1024xf32, #tpu.memory_space<vmem>>, %arg4: memref<1024x128xbf16, #tpu.memory_space<vmem>>, %arg5: memref<1x128xf32, #tpu.memory_space<vmem>>, %arg6: memref<8x128xf32, #tpu.memory_space<vmem>>) attributes {dimension_semantics = [#tpu.dimension_semantics<parallel>], iteration_bounds = array<i64: 1>, scalar_prefetch = 0 : i64, scratch_operands = 0 : i64, tpu.core_type = #tpu.core_type<tc>, window_params = [{transform_indices = @transform_0, window_bounds = array<i64: 8, 784>}, {pipeline_mode = #tpu.pipeline_mode<synchronous>, transform_indices = @transform_1, window_bounds = array<i64: 784, 1024>}, {pipeline_mode = #tpu.pipeline_mode<synchronous>, transform_indices = @transform_2, window_bounds = array<i64: 1, 1024>}, {pipeline_mode = #tpu.pipeline_mode<synchronous>, transform_indices = @transform_3, window_bounds = array<i64: 1024, 128>}, {pipeline_mode = #tpu.pipeline_mode<synchronous>, transform_indices = @transform_4, window_bounds = array<i64: 1, 128>}, {transform_indices = @transform_5, window_bounds = array<i64: 8, 128>}]} {
    %c0 = arith.constant 0 : index
    %c0_0 = arith.constant 0 : index
    %0 = vector.load %arg1[%c0, %c0_0] : memref<8x784xf32, #tpu.memory_space<vmem>>, vector<8x784xf32>
    %1 = arith.truncf %0 : vector<8x784xf32> to vector<8x784xbf16>
    %c0_1 = arith.constant 0 : index
    %c0_2 = arith.constant 0 : index
    %2 = vector.load %arg2[%c0_1, %c0_2] : memref<784x1024xbf16, #tpu.memory_space<vmem>>, vector<784x1024xbf16>
    %cst = arith.constant dense<0.000000e+00> : vector<8x1024xf32>
    %3 = tpu.matmul %1, %2, %cst {dimension_numbers = #tpu.dot_dimension_numbers<[1], [0], [0], [1], [0, 0, 1, 1], [], []>} : vector<8x784xbf16>, vector<784x1024xbf16>, vector<8x1024xf32> -> vector<8x1024xf32>
    %c0_3 = arith.constant 0 : index
    %c0_4 = arith.constant 0 : index
    %4 = vector.load %arg3[%c0_3, %c0_4] : memref<1x1024xf32, #tpu.memory_space<vmem>>, vector<1x1024xf32>
    %5 = vector.broadcast %4 : vector<1x1024xf32> to vector<8x1024xf32>
    %6 = arith.addf %3, %5 : vector<8x1024xf32>
    %cst_5 = arith.constant 0.000000e+00 : f32
    %7 = vector.broadcast %cst_5 : f32 to vector<8x1024xf32>
    %8 = arith.maximumf %6, %7 : vector<8x1024xf32>
    %9 = arith.truncf %8 : vector<8x1024xf32> to vector<8x1024xbf16>
    %c0_6 = arith.constant 0 : index
    %c0_7 = arith.constant 0 : index
    %10 = vector.load %arg4[%c0_6, %c0_7] : memref<1024x128xbf16, #tpu.memory_space<vmem>>, vector<1024x128xbf16>
    %cst_8 = arith.constant dense<0.000000e+00> : vector<8x128xf32>
    %11 = tpu.matmul %9, %10, %cst_8 {dimension_numbers = #tpu.dot_dimension_numbers<[1], [0], [0], [1], [0, 0, 1, 1], [], []>} : vector<8x1024xbf16>, vector<1024x128xbf16>, vector<8x128xf32> -> vector<8x128xf32>
    %c0_9 = arith.constant 0 : index
    %c0_10 = arith.constant 0 : index
    %12 = vector.load %arg5[%c0_9, %c0_10] : memref<1x128xf32, #tpu.memory_space<vmem>>, vector<1x128xf32>
    %13 = vector.broadcast %12 : vector<1x128xf32> to vector<8x128xf32>
    %14 = arith.addf %11, %13 : vector<8x128xf32>
    %cst_11 = arith.constant dense<0xFF800000> : vector<8xf32>
    %15 = vector.multi_reduction <maximumf>, %14, %cst_11 [1] : vector<8x128xf32> to vector<8xf32>
    %16 = vector.shape_cast %15 : vector<8xf32> to vector<8x1xf32>
    %17 = vector.broadcast %16 : vector<8x1xf32> to vector<8x128xf32>
    %18 = arith.subf %14, %17 : vector<8x128xf32>
    %19 = math.exp %18 : vector<8x128xf32>
    %cst_12 = arith.constant dense<0.000000e+00> : vector<8xf32>
    %20 = vector.multi_reduction <add>, %19, %cst_12 [1] : vector<8x128xf32> to vector<8xf32>
    %21 = vector.shape_cast %20 : vector<8xf32> to vector<8x1xf32>
    %22 = math.log %21 : vector<8x1xf32>
    %23 = vector.broadcast %22 : vector<8x1xf32> to vector<8x128xf32>
    %24 = arith.subf %18, %23 : vector<8x128xf32>
    %c0_13 = arith.constant 0 : index
    %c0_14 = arith.constant 0 : index
    %25 = vector.load %arg6[%c0_13, %c0_14] : memref<8x128xf32, #tpu.memory_space<vmem>>, vector<8x128xf32>
    tpu.vector_store %arg6[%c0_13, %c0_14], %24 {strides = array<i32>} : memref<8x128xf32, #tpu.memory_space<vmem>>, vector<8x128xf32>,
    return
  }
  func.func @transform_0(%arg0: i32) -> (i32, i32) {
    %c0_i32 = arith.constant 0 : i32
    %c0_i32_0 = arith.constant 0 : i32
    return %arg0, %c0_i32 : i32, i32
  }
  func.func @transform_1(%arg0: i32) -> (i32, i32) {
    %c0_i32 = arith.constant 0 : i32
    %c0_i32_0 = arith.constant 0 : i32
    %c0_i32_1 = arith.constant 0 : i32
    return %c0_i32, %c0_i32_0 : i32, i32
  }
  func.func @transform_2(%arg0: i32) -> (i32, i32) {
    %c0_i32 = arith.constant 0 : i32
    %c0_i32_0 = arith.constant 0 : i32
    %c0_i32_1 = arith.constant 0 : i32
    return %c0_i32, %c0_i32_0 : i32, i32
  }
  func.func @transform_3(%arg0: i32) -> (i32, i32) {
    %c0_i32 = arith.constant 0 : i32
    %c0_i32_0 = arith.constant 0 : i32
    %c0_i32_1 = arith.constant 0 : i32
    return %c0_i32, %c0_i32_0 : i32, i32
  }
  func.func @transform_4(%arg0: i32) -> (i32, i32) {
    %c0_i32 = arith.constant 0 : i32
    %c0_i32_0 = arith.constant 0 : i32
    %c0_i32_1 = arith.constant 0 : i32
    return %c0_i32, %c0_i32_0 : i32, i32
  }
  func.func @transform_5(%arg0: i32) -> (i32, i32) {
    %c0_i32 = arith.constant 0 : i32
    %c0_i32_0 = arith.constant 0 : i32
    return %arg0, %c0_i32 : i32, i32
  }
}

</mosaic_0001>

<bundles_post_ra>
// kernel: tpu_custom_call.1
= control target key start
LH: loop header
LB: loop body
LE: loop exit
PB: predicated region body
PF: predicated region fallthrough
CT: control target
= control target key end

     0   :  { %10 = vsyncpa [#allocation3], 0  ;;  %s4882_s0 = inlined_call_operand.hbm [shape: f32[8,784], index: 0, kind: input, shape index: {}]   ;;  %s4883_s1 = inlined_call_operand.hbm [shape: bf16[784,1024], index: 1, kind: input, shape index: {}]   ;;  %s4884_s2 = inlined_call_operand.hbm [shape: f32[1,1024], index: 2, kind: input, shape index: {}]   ;;  %s4885_s3 = inlined_call_operand.hbm [shape: bf16[1024,128], index: 3, kind: input, shape index: {}]   ;;  %s4886_s4 = inlined_call_operand.hbm [shape: f32[1,128], index: 4, kind: input, shape index: {}]   ;;  %s4887_s5 = inlined_call_operand.hbm [shape: f32[8,128], index: 5, kind: output, shape index: {}]  }
   0x1   :  { %11 = vsyncpa [#allocation6], 0 }
   0x2   :  { %12 = vsyncpa [#allocation9], 0 }
   0x3   :  { %13 = vsyncpa [#allocation4], 0  ;;  %s4699_s18 = smov [#allocation5]   ;;  %s4559_s22 = scalar_lea.hbm %s4883_s1, 50176 }
   0x4   :  { %s29_s19 = sshll.u32 %s4699_s18, 4  ;;  %p4560_p0 = scmp.ne.s32.totalorder %s4883_s1, %s4559_s22  ;;  %s30_s19 = int_to_ptr.vmem [resolvable:$true] %s29_s19 }
   0x5   :  { %p4563_p1 = scmp.lt.u32.totalorder %s4559_s22, %s4883_s1 }
   0x7   :  { %p4565_p2 = pnand %p4563_p1, %p4560_p0 }
   0x9   :  { %4568 = shalt.err (!%p4565_p2)
}
   0xa   :  { %s4569_s27 = scalar_lea.vmem %s30_s19, 50176  ;;  %p4574_p4 = scmp.lt.s32.totalorder %s30_s19, %s30_s19 }
   0xb   :  { %p4570_p3 = scmp.ne.s32.totalorder %s30_s19, %s4569_s27  ;;  %p4575_p5 = scmp.lt.s32.totalorder %s4569_s27, %s4569_s27 }
   0xd   :  { %p4576_p6 = por %p4575_p5, %p4574_p4 }
   0xf   :  { %p4577_p7 = pnand %p4576_p6, %p4570_p3 }
  0x11   :  { %4580 = shalt.err (!%p4577_p7)
}
  0x12   :  { %s4700_s28 = smov 512   ;;  %s4701_s29 = smov 32  }
  0x13   :  { %35 = dma.hbm_to_vmem [thread:$0]  %s4883_s1, 50176, %s30_s19, [#allocation6], %s4700_s28, %s4700_s28, %s4701_s29  }
  0x14   :  { %s4702_s7 = smov [#allocation8]   ;;  %s4581_s11 = scalar_lea.hbm %s4885_s3, 8192 }
  0x15   :  { %s51_s8 = sshll.u32 %s4702_s7, 4  ;;  %p4582_p8 = scmp.ne.s32.totalorder %s4885_s3, %s4581_s11  ;;  %s52_s8 = int_to_ptr.vmem [resolvable:$true] %s51_s8 }
  0x16   :  { %p4585_p9 = scmp.lt.u32.totalorder %s4581_s11, %s4885_s3 }
  0x18   :  { %p4587_p10 = pnand %p4585_p9, %p4582_p8 }
  0x1a   :  { %4590 = shalt.err (!%p4587_p10)
}
  0x1b   :  { %s4591_s16 = scalar_lea.vmem %s52_s8, 8192  ;;  %p4596_p12 = scmp.lt.s32.totalorder %s52_s8, %s52_s8 }
  0x1c   :  { %p4592_p11 = scmp.ne.s32.totalorder %s52_s8, %s4591_s16  ;;  %p4597_p13 = scmp.lt.s32.totalorder %s4591_s16, %s4591_s16 }
  0x1e   :  { %p4598_p0 = por %p4597_p13, %p4596_p12 }
  0x20   :  { %p4599_p1 = pnand %p4598_p0, %p4592_p11 }
  0x22   :  { %4602 = shalt.err (!%p4599_p1)
}
  0x23   :  { %s4703_s1 = smov 64   ;;  %s4704_s17 = smov 4  }
  0x24   :  { %57 = dma.hbm_to_vmem [thread:$0]  %s4885_s3, 8192, %s52_s8, [#allocation9], %s4703_s1, %s4703_s1, %s4704_s17  }
  0x25   :  { %s4705_s20 = smov [#allocation2]   ;;  %s4706_s22 = smov [#allocation7]  }
  0x26   :  { %s20_s21 = sshll.u32 %s4705_s20, 4  ;;  %s42_s23 = sshll.u32 %s4706_s22, 4  ;;  %s21_s21 = int_to_ptr.vmem [resolvable:$true] %s20_s21  ;;  %s43_s23 = int_to_ptr.vmem [resolvable:$true] %s42_s23 }
  0x27   :  { %s4603_s26 = scalar_lea.hbm %s4882_s0, 896 }
  0x28   :  { %p4604_p2 = scmp.ne.s32.totalorder %s4882_s0, %s4603_s26  ;;  %p4607_p3 = scmp.lt.u32.totalorder %s4603_s26, %s4882_s0 }
  0x2a   :  { %p4609_p4 = pnand %p4607_p3, %p4604_p2 }
  0x2c   :  { %4612 = shalt.err (!%p4609_p4)
}
  0x2d   :  { %s4613_s3 = scalar_lea.vmem %s21_s21, 896  ;;  %p4618_p6 = scmp.lt.s32.totalorder %s21_s21, %s21_s21 }
  0x2e   :  { %p4614_p5 = scmp.ne.s32.totalorder %s21_s21, %s4613_s3  ;;  %p4619_p7 = scmp.lt.s32.totalorder %s4613_s3, %s4613_s3 }
  0x30   :  { %p4620_p8 = por %p4619_p7, %p4618_p6 }
  0x32   :  { %p4621_p9 = pnand %p4620_p8, %p4614_p5 }
  0x34   :  { %4624 = shalt.err (!%p4621_p9)
}
  0x35   :  { %23 = dma.hbm_to_vmem [thread:$0]  %s4882_s0, 896, %s21_s21, [#allocation3]  }
  0x36   :  { %s4625_s10 = scalar_lea.hbm %s4884_s2, 128 }
  0x37   :  { %p4626_p10 = scmp.ne.s32.totalorder %s4884_s2, %s4625_s10  ;;  %p4629_p11 = scmp.lt.u32.totalorder %s4625_s10, %s4884_s2 }
  0x39   :  { %p4631_p12 = pnand %p4629_p11, %p4626_p10 }
  0x3b   :  { %4634 = shalt.err (!%p4631_p12)
}
  0x3c   :  { %s4635_s15 = scalar_lea.vmem %s43_s23, 128  ;;  %p4640_p0 = scmp.lt.s32.totalorder %s43_s23, %s43_s23 }
  0x3d   :  { %p4636_p13 = scmp.ne.s32.totalorder %s43_s23, %s4635_s15  ;;  %p4641_p1 = scmp.lt.s32.totalorder %s4635_s15, %s4635_s15 }
  0x3f   :  { %p4642_p2 = por %p4641_p1, %p4640_p0 }
  0x41   :  { %p4643_p3 = pnand %p4642_p2, %p4636_p13 }
  0x43   :  { %4646 = shalt.err (!%p4643_p3)
}
  0x44   :  { %45 = dma.hbm_to_vmem [thread:$0]  %s4884_s2, 128, %s43_s23, [#allocation6]  }
  0x45   :  { %s4707_s1 = smov [#allocation10]   ;;  %s4647_s20 = scalar_lea.hbm %s4886_s4, 16 }
  0x46   :  { %s64_s17 = sshll.u32 %s4707_s1, 4  ;;  %p4648_p4 = scmp.ne.s32.totalorder %s4886_s4, %s4647_s20  ;;  %s65_s17 = int_to_ptr.vmem [resolvable:$true] %s64_s17 }
  0x47   :  { %p4651_p5 = scmp.lt.u32.totalorder %s4647_s20, %s4886_s4 }
  0x49   :  { %p4653_p6 = pnand %p4651_p5, %p4648_p4 }
  0x4b   :  { %4656 = shalt.err (!%p4653_p6)
}
  0x4c   :  { %s4657_s26 = scalar_lea.vmem %s65_s17, 16  ;;  %s4661_s2 = scalar_lea.vmem %s65_s17, 32 }
  0x4d   :  { %p4658_p7 = scmp.ne.s32.totalorder %s65_s17, %s4657_s26  ;;  %p4662_p8 = scmp.lt.s32.totalorder %s65_s17, %s65_s17 }
  0x4e   :  { %p4663_p9 = scmp.lt.s32.totalorder %s4661_s2, %s4657_s26 }
  0x50   :  { %p4664_p10 = por %p4663_p9, %p4662_p8 }
  0x52   :  { %p4665_p11 = pnand %p4664_p10, %p4658_p7 }
  0x54   :  { %4668 = shalt.err (!%p4665_p11)
}
  0x55   :  { %67 = dma.hbm_to_vmem [thread:$0]  %s4886_s4, 16, %s65_s17, [#allocation9]  }
  0x56   :  { %4691 = dma.done.wait [#allocation3], 896  }
  0x57   :  { %4692 = vsyncadd [#allocation3], 4294966400 }
  0x58   :  { %4693 = dma.done.wait [#allocation6], 50304  }
  0x59   :  { %4694 = vsyncadd [#allocation6], 4294916992 }
  0x5a   :  { %4695 = dma.done.wait [#allocation9], 8208  }
  0x5b   :  { %4696 = vsyncadd [#allocation9], 4294959088  ;;  %v98_v0 = vld [vmem:[#allocation5] sm:$0xff]  ;;  %v99_v2 = vld [vmem:[#allocation5 + $0x8] sm:$0xff]  ;;  %vm2492_vm0 = vcmask 130048   ;;  %s4709_s4 = smov [#allocation11]  }
  0x5c   :  { %v102_v1 = vld [vmem:[#allocation5 + $0x20] sm:$0xff]  ;;  %v103_v4 = vld [vmem:[#allocation5 + $0x28] sm:$0xff]  ;;  %v85_v53 = vld [vmem:[#allocation2 + $0x8] sm:$0xff]  ;;  %s3864_s28 = sshll.u32 %s4709_s4, 4  ;;  %s3865_s28 = int_to_ptr.vmem [resolvable:$true] %s3864_s28 }
  0x5d   :  { %v3876_v3 = vcombine.high %v98_v0, %v102_v1  ;;  %v3875_v5 = vcombine.low %v98_v0, %v102_v1  ;;  %v106_v6 = vld [vmem:[#allocation5 + $0x40] sm:$0xff]  ;;  %v3878_v8 = vcombine.high %v99_v2, %v103_v4  ;;  %v3877_v9 = vcombine.low %v99_v2, %v103_v4  ;;  %v107_v11 = vld [vmem:[#allocation5 + $0x48] sm:$0xff]  ;;  %s4669_s29 = scalar_lea.vmem %s3865_s28, 128  ;;  %p4674_p13 = scmp.lt.s32.totalorder %s3865_s28, %s3865_s28 }
  0x5e   :  { %v110_v7 = vld [vmem:[#allocation5 + $0x60] sm:$0xff]  ;;  %v111_v12 = vld [vmem:[#allocation5 + $0x68] sm:$0xff]  ;;  %v4800_v57 = vpack.c.bf16 %v85_v53, %v85_v53  ;;  %p4670_p12 = scmp.ne.s32.totalorder %s3865_s28, %s4669_s29  ;;  %p4675_p0 = scmp.lt.s32.totalorder %s4669_s29, %s4669_s29 }
  0x5f   :  { %v3884_v10 = vcombine.high %v106_v6, %v110_v7  ;;  %v114_v13 = vld [vmem:[#allocation5 + $0x80] sm:$0xff]  ;;  %2496 = vmatprep.subr.bf16.mxu0 %v3876_v3  ;;  %v3886_v14 = vcombine.high %v107_v11, %v111_v12  ;;  %v115_v16 = vld [vmem:[#allocation5 + $0x88] sm:$0xff]  ;;  %2660 = vmatprep.subr.bf16.mxu1 %v3878_v8  ;;  %v3883_v18 = vcombine.low %v106_v6, %v110_v7 }
  0x60   :  { %v118_v15 = vld [vmem:[#allocation5 + $0xa0] sm:$0xff]  ;;  %v119_v17 = vld [vmem:[#allocation5 + $0xa8] sm:$0xff]  ;;  %2497 = vmatpush1.bf16.msra.mxu0 %v3875_v5  ;;  %2661 = vmatpush1.bf16.msra.mxu1 %v3877_v9  ;;  %v3885_v19 = vcombine.low %v107_v11, %v111_v12  ;;  %p4676_p1 = por %p4675_p0, %p4674_p13 }
  0x61   :  { %2498 = vmatprep.subr.bf16.mxu0 %v3884_v10  ;;  %v3892_v20 = vcombine.high %v114_v13, %v118_v15  ;;  %2662 = vmatprep.subr.bf16.mxu1 %v3886_v14  ;;  %v3894_v21 = vcombine.high %v115_v16, %v119_v17  ;;  %v122_v22 = vld [vmem:[#allocation5 + $0xc0] sm:$0xff]  ;;  %v123_v24 = vld [vmem:[#allocation5 + $0xc8] sm:$0xff]  ;;  %v3891_v26 = vcombine.low %v114_v13, %v118_v15 }
  0x62   :  { %v126_v23 = vld [vmem:[#allocation5 + $0xe0] sm:$0xff]  ;;  %v127_v25 = vld [vmem:[#allocation5 + $0xe8] sm:$0xff]  ;;  %v3893_v27 = vcombine.low %v115_v16, %v119_v17  ;;  %2528 = vmatprep.mubr.bf16.mxu0 %v4800_v57  ;;  %2692 = vmatprep.mubr.bf16.mxu1 %v4800_v57  ;;  %p4677_p2 = pnand %p4676_p1, %p4670_p12 }
  0x63   :  { %v3900_v28 = vcombine.high %v122_v22, %v126_v23  ;;  %v3902_v29 = vcombine.high %v123_v24, %v127_v25  ;;  %v130_v30 = vld [vmem:[#allocation5 + $0x100] sm:$0xff]  ;;  %v131_v32 = vld [vmem:[#allocation5 + $0x108] sm:$0xff]  ;;  %v3899_v34 = vcombine.low %v122_v22, %v126_v23  ;;  %v3901_v35 = vcombine.low %v123_v24, %v127_v25 }
  0x64   :  { %2499 = vmatpush1.bf16.msra.mxu0 %v3883_v18  ;;  %2663 = vmatpush1.bf16.msra.mxu1 %v3885_v19  ;;  %v134_v31 = vld [vmem:[#allocation5 + $0x120] sm:$0xff]  ;;  %v135_v33 = vld [vmem:[#allocation5 + $0x128] sm:$0xff] }
  0x65   :  { %2500 = vmatprep.subr.bf16.mxu0 %v3892_v20  ;;  %2664 = vmatprep.subr.bf16.mxu1 %v3894_v21  ;;  %v3908_v36 = vcombine.high %v130_v30, %v134_v31  ;;  %v3910_v37 = vcombine.high %v131_v32, %v135_v33  ;;  %v138_v38 = vld [vmem:[#allocation5 + $0x140] sm:$0xff]  ;;  %v139_v40 = vld [vmem:[#allocation5 + $0x148] sm:$0xff]  ;;  %v3907_v42 = vcombine.low %v130_v30, %v134_v31 }
  0x66   :  { %v142_v39 = vld [vmem:[#allocation5 + $0x160] sm:$0xff]  ;;  %v143_v41 = vld [vmem:[#allocation5 + $0x168] sm:$0xff]  ;;  %v3909_v43 = vcombine.low %v131_v32, %v135_v33 }
  0x67   :  { %v3916_v44 = vcombine.high %v138_v38, %v142_v39  ;;  %v3918_v45 = vcombine.high %v139_v40, %v143_v41  ;;  %v146_v46 = vld [vmem:[#allocation5 + $0x180] sm:$0xff]  ;;  %v147_v48 = vld [vmem:[#allocation5 + $0x188] sm:$0xff]  ;;  %v3915_v50 = vcombine.low %v138_v38, %v142_v39  ;;  %v3917_v51 = vcombine.low %v139_v40, %v143_v41 }
  0x68   :  { %2501 = vmatpush1.bf16.msra.mxu0 %v3891_v26  ;;  %2665 = vmatpush1.bf16.msra.mxu1 %v3893_v27  ;;  %v150_v47 = vld [vmem:[#allocation5 + $0x1a0] sm:$0xff]  ;;  %v151_v49 = vld [vmem:[#allocation5 + $0x1a8] sm:$0xff] }
  0x69   :  { %2502 = vmatprep.subr.bf16.mxu0 %v3900_v28  ;;  %2666 = vmatprep.subr.bf16.mxu1 %v3902_v29  ;;  %v3924_v52 = vcombine.high %v146_v46, %v150_v47  ;;  %v3926_v54 = vcombine.high %v147_v48, %v151_v49  ;;  %v154_v55 = vld [vmem:[#allocation5 + $0x1c0] sm:$0xff]  ;;  %v155_v58 = vld [vmem:[#allocation5 + $0x1c8] sm:$0xff]  ;;  %v3923_v60 = vcombine.low %v146_v46, %v150_v47 }
  0x6a   :  { %v158_v56 = vld [vmem:[#allocation5 + $0x1e0] sm:$0xff]  ;;  %v159_v59 = vld [vmem:[#allocation5 + $0x1e8] sm:$0xff]  ;;  %v3925_v61 = vcombine.low %v147_v48, %v151_v49 }
  0x6b   :  { %v3932_v62 = vcombine.high %v154_v55, %v158_v56  ;;  %v3934_v63 = vcombine.high %v155_v58, %v159_v59  ;;  %v162_v0 = vld [vmem:[#allocation5 + $0x200] sm:$0xff]  ;;  %v163_v2 = vld [vmem:[#allocation5 + $0x208] sm:$0xff]  ;;  %v3931_v4 = vcombine.low %v154_v55, %v158_v56  ;;  %v3933_v5 = vcombine.low %v155_v58, %v159_v59 }
  0x6c   :  { %2503 = vmatpush1.bf16.msra.mxu0 %v3899_v34  ;;  %2667 = vmatpush1.bf16.msra.mxu1 %v3901_v35  ;;  %v166_v1 = vld [vmem:[#allocation5 + $0x220] sm:$0xff]  ;;  %v167_v3 = vld [vmem:[#allocation5 + $0x228] sm:$0xff] }
  0x6d   :  { %2504 = vmatprep.subr.bf16.mxu0 %v3908_v36  ;;  %2668 = vmatprep.subr.bf16.mxu1 %v3910_v37  ;;  %v3940_v6 = vcombine.high %v162_v0, %v166_v1  ;;  %v3942_v7 = vcombine.high %v163_v2, %v167_v3  ;;  %v170_v8 = vld [vmem:[#allocation5 + $0x240] sm:$0xff]  ;;  %v171_v10 = vld [vmem:[#allocation5 + $0x248] sm:$0xff]  ;;  %v3939_v12 = vcombine.low %v162_v0, %v166_v1 }
  0x6e   :  { %v174_v9 = vld [vmem:[#allocation5 + $0x260] sm:$0xff]  ;;  %v175_v11 = vld [vmem:[#allocation5 + $0x268] sm:$0xff]  ;;  %v3941_v13 = vcombine.low %v163_v2, %v167_v3 }
  0x6f   :  { %v3948_v14 = vcombine.high %v170_v8, %v174_v9  ;;  %v3950_v15 = vcombine.high %v171_v10, %v175_v11  ;;  %v178_v16 = vld [vmem:[#allocation5 + $0x280] sm:$0xff]  ;;  %v179_v18 = vld [vmem:[#allocation5 + $0x288] sm:$0xff]  ;;  %v3947_v20 = vcombine.low %v170_v8, %v174_v9  ;;  %v3949_v21 = vcombine.low %v171_v10, %v175_v11 }
  0x70   :  { %2505 = vmatpush1.bf16.msra.mxu0 %v3907_v42  ;;  %2669 = vmatpush1.bf16.msra.mxu1 %v3909_v43  ;;  %v182_v17 = vld [vmem:[#allocation5 + $0x2a0] sm:$0xff]  ;;  %v183_v19 = vld [vmem:[#allocation5 + $0x2a8] sm:$0xff] }
  0x71   :  { %2506 = vmatprep.subr.bf16.mxu0 %v3916_v44  ;;  %2670 = vmatprep.subr.bf16.mxu1 %v3918_v45  ;;  %v3956_v22 = vcombine.high %v178_v16, %v182_v17  ;;  %v3958_v23 = vcombine.high %v179_v18, %v183_v19  ;;  %v186_v24 = vld [vmem:[#allocation5 + $0x2c0] sm:$0xff]  ;;  %v187_v26 = vld [vmem:[#allocation5 + $0x2c8] sm:$0xff]  ;;  %v3955_v28 = vcombine.low %v178_v16, %v182_v17 }
  0x72   :  { %v190_v25 = vld [vmem:[#allocation5 + $0x2e0] sm:$0xff]  ;;  %v191_v27 = vld [vmem:[#allocation5 + $0x2e8] sm:$0xff]  ;;  %v3957_v29 = vcombine.low %v179_v18, %v183_v19 }
  0x73   :  { %v3964_v30 = vcombine.high %v186_v24, %v190_v25  ;;  %v3966_v31 = vcombine.high %v187_v26, %v191_v27  ;;  %v194_v32 = vld [vmem:[#allocation5 + $0x300] sm:$0xff]  ;;  %v195_v34 = vld [vmem:[#allocation5 + $0x308] sm:$0xff]  ;;  %v3963_v36 = vcombine.low %v186_v24, %v190_v25  ;;  %v3965_v37 = vcombine.low %v187_v26, %v191_v27 }
  0x74   :  { %2507 = vmatpush1.bf16.msra.mxu0 %v3915_v50  ;;  %2671 = vmatpush1.bf16.msra.mxu1 %v3917_v51  ;;  %v198_v33 = vld [vmem:[#allocation5 + $0x320] sm:$0xff]  ;;  %v199_v35 = vld [vmem:[#allocation5 + $0x328] sm:$0xff] }
  0x75   :  { %2508 = vmatprep.subr.bf16.mxu0 %v3924_v52  ;;  %2672 = vmatprep.subr.bf16.mxu1 %v3926_v54  ;;  %v3972_v38 = vcombine.high %v194_v32, %v198_v33  ;;  %v3974_v39 = vcombine.high %v195_v34, %v199_v35  ;;  %v202_v40 = vld [vmem:[#allocation5 + $0x340] sm:$0xff]  ;;  %v203_v42 = vld [vmem:[#allocation5 + $0x348] sm:$0xff]  ;;  %v3971_v44 = vcombine.low %v194_v32, %v198_v33 }
  0x76   :  { %v206_v41 = vld [vmem:[#allocation5 + $0x360] sm:$0xff]  ;;  %v207_v43 = vld [vmem:[#allocation5 + $0x368] sm:$0xff]  ;;  %v3973_v45 = vcombine.low %v195_v34, %v199_v35 }
  0x77   :  { %v3980_v46 = vcombine.high %v202_v40, %v206_v41  ;;  %v3982_v47 = vcombine.high %v203_v42, %v207_v43  ;;  %v210_v48 = vld [vmem:[#allocation5 + $0x380] sm:$0xff]  ;;  %v211_v50 = vld [vmem:[#allocation5 + $0x388] sm:$0xff]  ;;  %v3979_v52 = vcombine.low %v202_v40, %v206_v41  ;;  %v3981_v53 = vcombine.low %v203_v42, %v207_v43 }
  0x78   :  { %2509 = vmatpush1.bf16.msra.mxu0 %v3923_v60  ;;  %2673 = vmatpush1.bf16.msra.mxu1 %v3925_v61  ;;  %v214_v49 = vld [vmem:[#allocation5 + $0x3a0] sm:$0xff]  ;;  %v215_v51 = vld [vmem:[#allocation5 + $0x3a8] sm:$0xff] }
  0x79   :  { %2510 = vmatprep.subr.bf16.mxu0 %v3932_v62  ;;  %2674 = vmatprep.subr.bf16.mxu1 %v3934_v63  ;;  %v3988_v54 = vcombine.high %v210_v48, %v214_v49  ;;  %v3990_v55 = vcombine.high %v211_v50, %v215_v51  ;;  %v218_v56 = vld [vmem:[#allocation5 + $0x3c0] sm:$0xff]  ;;  %v219_v59 = vld [vmem:[#allocation5 + $0x3c8] sm:$0xff]  ;;  %v3987_v61 = vcombine.low %v210_v48, %v214_v49 }
  0x7a   :  { %v222_v58 = vld [vmem:[#allocation5 + $0x3e0] sm:$0xff]  ;;  %v223_v60 = vld [vmem:[#allocation5 + $0x3e8] sm:$0xff]  ;;  %v3989_v62 = vcombine.low %v211_v50, %v215_v51 }
  0x7b   :  { %v3996_v63 = vcombine.high %v218_v56, %v222_v58  ;;  %v3998_v0 = vcombine.high %v219_v59, %v223_v60  ;;  %v226_v1 = vld [vmem:[#allocation5 + $0x400] sm:$0xff]  ;;  %v227_v3 = vld [vmem:[#allocation5 + $0x408] sm:$0xff] }
  0x7c   :  { %2511 = vmatpush1.bf16.msra.mxu0 %v3931_v4  ;;  %2675 = vmatpush1.bf16.msra.mxu1 %v3933_v5  ;;  %v230_v2 = vld [vmem:[#allocation5 + $0x420] sm:$0xff]  ;;  %v231_v4 = vld [vmem:[#allocation5 + $0x428] sm:$0xff]  ;;  %v3995_v5 = vcombine.low %v218_v56, %v222_v58 }
  0x7d   :  { %2512 = vmatprep.subr.bf16.mxu0 %v3940_v6  ;;  %2676 = vmatprep.subr.bf16.mxu1 %v3942_v7  ;;  %v84_v6 = vld [vmem:[#allocation2] sm:$0xff]  ;;  %v3997_v7 = vcombine.low %v219_v59, %v223_v60  ;;  %v4004_v8 = vcombine.high %v226_v1, %v230_v2  ;;  %v4006_v9 = vcombine.high %v227_v3, %v231_v4  ;;  %v234_v10 = vld [vmem:[#allocation5 + $0x440] sm:$0xff] }
  0x7e   :  { %v238_v11 = vld [vmem:[#allocation5 + $0x460] sm:$0xff]  ;;  %v4003_v16 = vcombine.low %v226_v1, %v230_v2  ;;  %v4005_v17 = vcombine.low %v227_v3, %v231_v4  ;;  %v247_v24 = vld [vmem:[#allocation5 + $0x4a8] sm:$0xff] }
  0x7f   :  { %v4012_v18 = vcombine.high %v234_v10, %v238_v11  ;;  %v242_v19 = vld [vmem:[#allocation5 + $0x480] sm:$0xff]  ;;  %v4011_v25 = vcombine.low %v234_v10, %v238_v11  ;;  %v255_v32 = vld [vmem:[#allocation5 + $0x4e8] sm:$0xff] }
  0x80   :  { %2513 = vmatpush1.bf16.msra.mxu0 %v3939_v12  ;;  %2677 = vmatpush1.bf16.msra.mxu1 %v3941_v13  ;;  %v4804_v12 = vpack.c.bf16 %v84_v6, %v84_v6  ;;  %v235_v13 = vld [vmem:[#allocation5 + $0x448] sm:$0xff]  ;;  %v258_v34 = vld [vmem:[#allocation5 + $0x500] sm:$0xff] }
  0x81   :  { %2514 = vmatprep.subr.bf16.mxu0 %v3948_v14  ;;  %2678 = vmatprep.subr.bf16.mxu1 %v3950_v15  ;;  %v239_v14 = vld [vmem:[#allocation5 + $0x468] sm:$0xff]  ;;  %v87_v15 = vld [vmem:[#allocation2 + $0x18] sm:$0xff] }
  0x82   :  { %v4013_v26 = vcombine.low %v235_v13, %v239_v14  ;;  %v262_v35 = vld [vmem:[#allocation5 + $0x520] sm:$0xff]  ;;  %v279_v56 = vld [vmem:[#allocation5 + $0x5a8] sm:$0xff] }
  0x83   :  { %v266_v42 = vld [vmem:[#allocation5 + $0x540] sm:$0xff]  ;;  %v4035_v49 = vcombine.low %v258_v34, %v262_v35  ;;  %v287_v1 = vld [vmem:[#allocation5 + $0x5e8] sm:$0xff] }
  0x84   :  { %2515 = vmatpush1.bf16.msra.mxu0 %v3947_v20  ;;  %2679 = vmatpush1.bf16.msra.mxu1 %v3949_v21  ;;  %v246_v20 = vld [vmem:[#allocation5 + $0x4a0] sm:$0xff]  ;;  %v4014_v21 = vcombine.high %v235_v13, %v239_v14 }
  0x85   :  { %2516 = vmatprep.subr.bf16.mxu0 %v3956_v22  ;;  %2680 = vmatprep.subr.bf16.mxu1 %v3958_v23  ;;  %v4806_v22 = vpack.c.bf16 %v87_v15, %v87_v15  ;;  %v243_v23 = vld [vmem:[#allocation5 + $0x488] sm:$0xff]  ;;  %v4020_v27 = vcombine.high %v242_v19, %v246_v20  ;;  %v4019_v33 = vcombine.low %v242_v19, %v246_v20  ;;  %v270_v43 = vld [vmem:[#allocation5 + $0x560] sm:$0xff] }
  0x86   :  { %v4044_v51 = vcombine.high %v266_v42, %v270_v43  ;;  %v4043_v58 = vcombine.low %v266_v42, %v270_v43  ;;  %v294_v6 = vld [vmem:[#allocation5 + $0x620] sm:$0xff]  ;;  %v327_v43 = vld [vmem:[#allocation5 + $0x728] sm:$0xff] }
  0x87   :  { %v298_v14 = vld [vmem:[#allocation5 + $0x640] sm:$0xff] }
  0x88   :  { %2517 = vmatpush1.bf16.msra.mxu0 %v3955_v28  ;;  %2681 = vmatpush1.bf16.msra.mxu1 %v3957_v29  ;;  %v4022_v28 = vcombine.high %v243_v23, %v247_v24  ;;  %v250_v29 = vld [vmem:[#allocation5 + $0x4c0] sm:$0xff] }
  0x89   :  { %2518 = vmatprep.subr.bf16.mxu0 %v3964_v30  ;;  %2682 = vmatprep.subr.bf16.mxu1 %v3966_v31  ;;  %v254_v30 = vld [vmem:[#allocation5 + $0x4e0] sm:$0xff]  ;;  %v251_v31 = vld [vmem:[#allocation5 + $0x4c8] sm:$0xff] }
  0x8a   :  { %v4030_v40 = vcombine.high %v251_v31, %v255_v32  ;;  %v4027_v41 = vcombine.low %v250_v29, %v254_v30  ;;  %v302_v15 = vld [vmem:[#allocation5 + $0x660] sm:$0xff] }
  0x8c   :  { %2519 = vmatpush1.bf16.msra.mxu0 %v3963_v36  ;;  %2683 = vmatpush1.bf16.msra.mxu1 %v3965_v37  ;;  %v4021_v36 = vcombine.low %v243_v23, %v247_v24  ;;  %v4028_v37 = vcombine.high %v250_v29, %v254_v30  ;;  %v306_v23 = vld [vmem:[#allocation5 + $0x680] sm:$0xff] }
  0x8d   :  { %2520 = vmatprep.subr.bf16.mxu0 %v3972_v38  ;;  %2684 = vmatprep.subr.bf16.mxu1 %v3974_v39  ;;  %v259_v38 = vld [vmem:[#allocation5 + $0x508] sm:$0xff]  ;;  %v310_v24 = vld [vmem:[#allocation5 + $0x6a0] sm:$0xff] }
  0x8e   :  { %v263_v39 = vld [vmem:[#allocation5 + $0x528] sm:$0xff]  ;;  %v4084_v30 = vcombine.high %v306_v23, %v310_v24 }
  0x8f   :  { %v4038_v48 = vcombine.high %v259_v38, %v263_v39  ;;  %v4037_v50 = vcombine.low %v259_v38, %v263_v39  ;;  %v322_v39 = vld [vmem:[#allocation5 + $0x700] sm:$0xff] }
  0x90   :  { %2521 = vmatpush1.bf16.msra.mxu0 %v3971_v44  ;;  %2685 = vmatpush1.bf16.msra.mxu1 %v3973_v45  ;;  %v4029_v44 = vcombine.low %v251_v31, %v255_v32  ;;  %v4036_v45 = vcombine.high %v258_v34, %v262_v35  ;;  %v314_v31 = vld [vmem:[#allocation5 + $0x6c0] sm:$0xff]  ;;  %v319_v35 = vld [vmem:[#allocation5 + $0x6e8] sm:$0xff] }
  0x91   :  { %2522 = vmatprep.subr.bf16.mxu0 %v3980_v46  ;;  %2686 = vmatprep.subr.bf16.mxu1 %v3982_v47  ;;  %v267_v46 = vld [vmem:[#allocation5 + $0x548] sm:$0xff]  ;;  %v318_v32 = vld [vmem:[#allocation5 + $0x6e0] sm:$0xff] }
  0x92   :  { %v271_v47 = vld [vmem:[#allocation5 + $0x568] sm:$0xff]  ;;  %v4092_v38 = vcombine.high %v314_v31, %v318_v32 }
  0x93   :  { %v4045_v59 = vcombine.low %v267_v46, %v271_v47 }
  0x94   :  { %2523 = vmatpush1.bf16.msra.mxu0 %v3979_v52  ;;  %2687 = vmatpush1.bf16.msra.mxu1 %v3981_v53  ;;  %v274_v52 = vld [vmem:[#allocation5 + $0x580] sm:$0xff] }
  0x95   :  { %2524 = vmatprep.subr.bf16.mxu0 %v3988_v54  ;;  %2688 = vmatprep.subr.bf16.mxu1 %v3990_v55  ;;  %v278_v53 = vld [vmem:[#allocation5 + $0x5a0] sm:$0xff]  ;;  %v275_v54 = vld [vmem:[#allocation5 + $0x588] sm:$0xff]  ;;  %v4046_v55 = vcombine.high %v267_v46, %v271_v47 }
  0x96   :  { %v4052_v60 = vcombine.high %v274_v52, %v278_v53  ;;  %v4051_v2 = vcombine.low %v274_v52, %v278_v53  ;;  %v4053_v3 = vcombine.low %v275_v54, %v279_v56  ;;  %v330_v47 = vld [vmem:[#allocation5 + $0x740] sm:$0xff] }
  0x98   :  { %2525 = vmatpush1.bf16.msra.mxu0 %v3987_v61  ;;  %2689 = vmatpush1.bf16.msra.mxu1 %v3989_v62  ;;  %v282_v61 = vld [vmem:[#allocation5 + $0x5c0] sm:$0xff] }
  0x99   :  { %2526 = vmatprep.subr.bf16.mxu0 %v3996_v63  ;;  %2690 = vmatprep.subr.bf16.mxu1 %v3998_v0  ;;  %v286_v62 = vld [vmem:[#allocation5 + $0x5e0] sm:$0xff]  ;;  %v283_v63 = vld [vmem:[#allocation5 + $0x5c8] sm:$0xff]  ;;  %v4054_v0 = vcombine.high %v275_v54, %v279_v56 }
  0x9a   :  { %v4060_v4 = vcombine.high %v282_v61, %v286_v62  ;;  %v4059_v10 = vcombine.low %v282_v61, %v286_v62  ;;  %v4061_v11 = vcombine.low %v283_v63, %v287_v1  ;;  %v342_v56 = vld [vmem:[#allocation5 + $0x7a0] sm:$0xff] }
  0x9c   :  { %2527 = vmatpush1.bf16.msra.mxu0 %v3995_v5  ;;  %2691 = vmatpush1.bf16.msra.mxu1 %v3997_v7  ;;  %v290_v5 = vld [vmem:[#allocation5 + $0x600] sm:$0xff]  ;;  %v291_v7 = vld [vmem:[#allocation5 + $0x608] sm:$0xff] }
  0x9d   :  { %2537 = vmatprep.subr.bf16.mxu0 %v4004_v8  ;;  %2701 = vmatprep.subr.bf16.mxu1 %v4006_v9  ;;  %v4062_v8 = vcombine.high %v283_v63, %v287_v1  ;;  %v295_v9 = vld [vmem:[#allocation5 + $0x628] sm:$0xff]  ;;  %v4068_v13 = vcombine.high %v290_v5, %v294_v6  ;;  %v4067_v19 = vcombine.low %v290_v5, %v294_v6  ;;  %v350_v1 = vld [vmem:[#allocation5 + $0x7e0] sm:$0xff] }
  0x9e   :  { %v4069_v20 = vcombine.low %v291_v7, %v295_v9  ;;  %v354_v6 = vld [vmem:[#allocation5 + $0x800] sm:$0xff] }
  0x9f   :  { %2529 = vmatmul.mubr.bf16.vlgmr.msra.gmra.mrb[0].mxu0 %v4804_v12  ;;  %2693 = vmatmul.mubr.bf16.vlgmr.msra.gmra.mrb[0].mxu1 %v4804_v12 }
  0xa0   :  { %2538 = vmatpush1.bf16.msra.mxu0 %v4003_v16  ;;  %2702 = vmatpush1.bf16.msra.mxu1 %v4005_v17  ;;  %v299_v16 = vld [vmem:[#allocation5 + $0x648] sm:$0xff]  ;;  %v4070_v17 = vcombine.high %v291_v7, %v295_v9  ;;  %v358_v9 = vld [vmem:[#allocation5 + $0x820] sm:$0xff] }
  0xa1   :  { %2539 = vmatprep.subr.bf16.mxu0 %v4012_v18  ;;  %2703 = vmatprep.subr.bf16.mxu1 %v4014_v21  ;;  %v303_v18 = vld [vmem:[#allocation5 + $0x668] sm:$0xff]  ;;  %v4076_v21 = vcombine.high %v298_v14, %v302_v15 }
  0xa2   :  { %2569 = vmatprep.mubr.bf16.mxu0 %v4806_v22  ;;  %2733 = vmatprep.mubr.bf16.mxu1 %v4806_v22  ;;  %v4077_v29 = vcombine.low %v299_v16, %v303_v18 }
  0xa4   :  { %2540 = vmatpush1.bf16.msra.mxu0 %v4011_v25  ;;  %2704 = vmatpush1.bf16.msra.mxu1 %v4013_v26  ;;  %v307_v25 = vld [vmem:[#allocation5 + $0x688] sm:$0xff]  ;;  %v4078_v26 = vcombine.high %v299_v16, %v303_v18  ;;  %v362_v16 = vld [vmem:[#allocation5 + $0x840] sm:$0xff]  ;;  %v4132_v18 = vcombine.high %v354_v6, %v358_v9 }
  0xa5   :  { %2541 = vmatprep.subr.bf16.mxu0 %v4020_v27  ;;  %2705 = vmatprep.subr.bf16.mxu1 %v4022_v28  ;;  %v311_v27 = vld [vmem:[#allocation5 + $0x6a8] sm:$0xff]  ;;  %v4075_v28 = vcombine.low %v298_v14, %v302_v15  ;;  %v86_v14 = vld [vmem:[#allocation2 + $0x10] sm:$0xff] }
  0xa6   :  { %v4086_v34 = vcombine.high %v307_v25, %v311_v27 }
  0xa8   :  { %2542 = vmatpush1.bf16.msra.mxu0 %v4019_v33  ;;  %2706 = vmatpush1.bf16.msra.mxu1 %v4021_v36  ;;  %v315_v33 = vld [vmem:[#allocation5 + $0x6c8] sm:$0xff]  ;;  %v4083_v36 = vcombine.low %v306_v23, %v310_v24  ;;  %v89_v24 = vld [vmem:[#allocation2 + $0x28] sm:$0xff] }
  0xa9   :  { %2543 = vmatprep.subr.bf16.mxu0 %v4028_v37  ;;  %2707 = vmatprep.subr.bf16.mxu1 %v4030_v40  ;;  %v4085_v37 = vcombine.low %v307_v25, %v311_v27  ;;  %v326_v40 = vld [vmem:[#allocation5 + $0x720] sm:$0xff]  ;;  %v4094_v42 = vcombine.high %v315_v33, %v319_v35  ;;  %v4812_v25 = vpack.c.bf16 %v86_v14, %v86_v14 }
  0xaa   :  { %v4100_v46 = vcombine.high %v322_v39, %v326_v40  ;;  %v4099_v52 = vcombine.low %v322_v39, %v326_v40  ;;  %v378_v39 = vld [vmem:[#allocation5 + $0x8c0] sm:$0xff] }
  0xab   :  { %v382_v40 = vld [vmem:[#allocation5 + $0x8e0] sm:$0xff] }
  0xac   :  { %2544 = vmatpush1.bf16.msra.mxu0 %v4027_v41  ;;  %2708 = vmatpush1.bf16.msra.mxu1 %v4029_v44  ;;  %v323_v41 = vld [vmem:[#allocation5 + $0x708] sm:$0xff]  ;;  %v4091_v44 = vcombine.low %v314_v31, %v318_v32  ;;  %v374_v31 = vld [vmem:[#allocation5 + $0x8a0] sm:$0xff]  ;;  %v4814_v32 = vpack.c.bf16 %v89_v24, %v89_v24 }
  0xad   :  { %2545 = vmatprep.subr.bf16.mxu0 %v4036_v45  ;;  %2709 = vmatprep.subr.bf16.mxu1 %v4038_v48  ;;  %v4093_v45 = vcombine.low %v315_v33, %v319_v35  ;;  %v334_v48 = vld [vmem:[#allocation5 + $0x760] sm:$0xff]  ;;  %v4101_v53 = vcombine.low %v323_v41, %v327_v43  ;;  %v371_v33 = vld [vmem:[#allocation5 + $0x888] sm:$0xff] }
  0xae   :  { %v4108_v54 = vcombine.high %v330_v47, %v334_v48  ;;  %v4107_v61 = vcombine.low %v330_v47, %v334_v48  ;;  %v386_v47 = vld [vmem:[#allocation5 + $0x900] sm:$0xff] }
  0xaf   :  { %v390_v48 = vld [vmem:[#allocation5 + $0x920] sm:$0xff] }
  0xb0   :  { %2546 = vmatpush1.bf16.msra.mxu0 %v4035_v49  ;;  %2710 = vmatpush1.bf16.msra.mxu1 %v4037_v50  ;;  %v331_v49 = vld [vmem:[#allocation5 + $0x748] sm:$0xff]  ;;  %v4102_v50 = vcombine.high %v323_v41, %v327_v43 }
  0xb1   :  { %2547 = vmatprep.subr.bf16.mxu0 %v4044_v51  ;;  %2711 = vmatprep.subr.bf16.mxu1 %v4046_v55  ;;  %v335_v51 = vld [vmem:[#allocation5 + $0x768] sm:$0xff]  ;;  %v338_v55 = vld [vmem:[#allocation5 + $0x780] sm:$0xff] }
  0xb2   :  { %v4109_v62 = vcombine.low %v331_v49, %v335_v51  ;;  %v4116_v63 = vcombine.high %v338_v55, %v342_v56  ;;  %v4115_v5 = vcombine.low %v338_v55, %v342_v56  ;;  %v379_v41 = vld [vmem:[#allocation5 + $0x8c8] sm:$0xff]  ;;  %v394_v55 = vld [vmem:[#allocation5 + $0x940] sm:$0xff] }
  0xb3   :  { %v398_v56 = vld [vmem:[#allocation5 + $0x960] sm:$0xff] }
  0xb4   :  { %2548 = vmatpush1.bf16.msra.mxu0 %v4043_v58  ;;  %2712 = vmatpush1.bf16.msra.mxu1 %v4045_v59  ;;  %v339_v58 = vld [vmem:[#allocation5 + $0x788] sm:$0xff]  ;;  %v4110_v59 = vcombine.high %v331_v49, %v335_v51  ;;  %v4155_v51 = vcombine.low %v378_v39, %v382_v40 }
  0xb5   :  { %2549 = vmatprep.subr.bf16.mxu0 %v4052_v60  ;;  %2713 = vmatprep.subr.bf16.mxu1 %v4054_v0  ;;  %v343_v60 = vld [vmem:[#allocation5 + $0x7a8] sm:$0xff]  ;;  %v346_v0 = vld [vmem:[#allocation5 + $0x7c0] sm:$0xff] }
  0xb6   :  { %v4117_v7 = vcombine.low %v339_v58, %v343_v60  ;;  %v4123_v15 = vcombine.low %v346_v0, %v350_v1  ;;  %v387_v49 = vld [vmem:[#allocation5 + $0x908] sm:$0xff] }
  0xb8   :  { %2550 = vmatpush1.bf16.msra.mxu0 %v4051_v2  ;;  %2714 = vmatpush1.bf16.msra.mxu1 %v4053_v3  ;;  %v347_v2 = vld [vmem:[#allocation5 + $0x7c8] sm:$0xff]  ;;  %v4118_v3 = vcombine.high %v339_v58, %v343_v60  ;;  %v4163_v60 = vcombine.low %v386_v47, %v390_v48 }
  0xb9   :  { %2551 = vmatprep.subr.bf16.mxu0 %v4060_v4  ;;  %2715 = vmatprep.subr.bf16.mxu1 %v4062_v8  ;;  %v351_v4 = vld [vmem:[#allocation5 + $0x7e8] sm:$0xff]  ;;  %v4124_v8 = vcombine.high %v346_v0, %v350_v1  ;;  %v402_v0 = vld [vmem:[#allocation5 + $0x980] sm:$0xff] }
  0xba   :  { %v395_v58 = vld [vmem:[#allocation5 + $0x948] sm:$0xff]  ;;  %v406_v1 = vld [vmem:[#allocation5 + $0x9a0] sm:$0xff] }
  0xbc   :  { %2552 = vmatpush1.bf16.msra.mxu0 %v4059_v10  ;;  %2716 = vmatpush1.bf16.msra.mxu1 %v4061_v11  ;;  %v355_v10 = vld [vmem:[#allocation5 + $0x808] sm:$0xff] }
  0xbd   :  { %2553 = vmatprep.subr.bf16.mxu0 %v4068_v13  ;;  %2717 = vmatprep.subr.bf16.mxu1 %v4070_v17  ;;  %v359_v11 = vld [vmem:[#allocation5 + $0x828] sm:$0xff]  ;;  %v4126_v13 = vcombine.high %v347_v2, %v351_v4  ;;  %v4125_v17 = vcombine.low %v347_v2, %v351_v4  ;;  %v4171_v4 = vcombine.low %v394_v55, %v398_v56 }
  0xbe   :  { %v4134_v23 = vcombine.high %v355_v10, %v359_v11  ;;  %v4133_v27 = vcombine.low %v355_v10, %v359_v11  ;;  %v403_v2 = vld [vmem:[#allocation5 + $0x988] sm:$0xff] }
  0xbf   :  { %v411_v10 = vld [vmem:[#allocation5 + $0x9c8] sm:$0xff] }
  0xc0   :  { %2554 = vmatpush1.bf16.msra.mxu0 %v4067_v19  ;;  %2718 = vmatpush1.bf16.msra.mxu1 %v4069_v20  ;;  %v366_v19 = vld [vmem:[#allocation5 + $0x860] sm:$0xff]  ;;  %v363_v20 = vld [vmem:[#allocation5 + $0x848] sm:$0xff] }
  0xc1   :  { %2555 = vmatprep.subr.bf16.mxu0 %v4076_v21  ;;  %2719 = vmatprep.subr.bf16.mxu1 %v4078_v26  ;;  %v367_v21 = vld [vmem:[#allocation5 + $0x868] sm:$0xff]  ;;  %v4131_v26 = vcombine.low %v354_v6, %v358_v9  ;;  %v4139_v35 = vcombine.low %v362_v16, %v366_v19  ;;  %v4180_v6 = vcombine.high %v402_v0, %v406_v1  ;;  %v414_v9 = vld [vmem:[#allocation5 + $0x9e0] sm:$0xff] }
  0xc2   :  { %v415_v11 = vld [vmem:[#allocation5 + $0x9e8] sm:$0xff] }
  0xc4   :  { %2556 = vmatpush1.bf16.msra.mxu0 %v4075_v28  ;;  %2720 = vmatpush1.bf16.msra.mxu1 %v4077_v29  ;;  %v4140_v28 = vcombine.high %v362_v16, %v366_v19  ;;  %v4142_v29 = vcombine.high %v363_v20, %v367_v21  ;;  %v4190_v16 = vcombine.high %v411_v10, %v415_v11  ;;  %v419_v19 = vld [vmem:[#allocation5 + $0xa08] sm:$0xff] }
  0xc5   :  { %2557 = vmatprep.subr.bf16.mxu0 %v4084_v30  ;;  %2721 = vmatprep.subr.bf16.mxu1 %v4086_v34  ;;  %v370_v30 = vld [vmem:[#allocation5 + $0x880] sm:$0xff]  ;;  %v375_v34 = vld [vmem:[#allocation5 + $0x8a8] sm:$0xff] }
  0xc6   :  { %v4147_v43 = vcombine.low %v370_v30, %v374_v31 }
  0xc8   :  { %2558 = vmatpush1.bf16.msra.mxu0 %v4083_v36  ;;  %2722 = vmatpush1.bf16.msra.mxu1 %v4085_v37  ;;  %v4141_v36 = vcombine.low %v363_v20, %v367_v21  ;;  %v4148_v37 = vcombine.high %v370_v30, %v374_v31  ;;  %v423_v20 = vld [vmem:[#allocation5 + $0xa28] sm:$0xff] }
  0xc9   :  { %2559 = vmatprep.subr.bf16.mxu0 %v4092_v38  ;;  %2723 = vmatprep.subr.bf16.mxu1 %v4094_v42  ;;  %v4150_v38 = vcombine.high %v371_v33, %v375_v34  ;;  %v383_v42 = vld [vmem:[#allocation5 + $0x8e8] sm:$0xff] }
  0xca   :  { %v431_v30 = vld [vmem:[#allocation5 + $0xa68] sm:$0xff] }
  0xcc   :  { %2560 = vmatpush1.bf16.msra.mxu0 %v4091_v44  ;;  %2724 = vmatpush1.bf16.msra.mxu1 %v4093_v45  ;;  %v4149_v44 = vcombine.low %v371_v33, %v375_v34  ;;  %v4156_v45 = vcombine.high %v378_v39, %v382_v40  ;;  %v4197_v33 = vcombine.low %v419_v19, %v423_v20  ;;  %v439_v39 = vld [vmem:[#allocation5 + $0xaa8] sm:$0xff] }
  0xcd   :  { %2561 = vmatprep.subr.bf16.mxu0 %v4100_v46  ;;  %2725 = vmatprep.subr.bf16.mxu1 %v4102_v50  ;;  %v4158_v46 = vcombine.high %v379_v41, %v383_v42  ;;  %v391_v50 = vld [vmem:[#allocation5 + $0x928] sm:$0xff] }
  0xd0   :  { %2562 = vmatpush1.bf16.msra.mxu0 %v4099_v52  ;;  %2726 = vmatpush1.bf16.msra.mxu1 %v4101_v53  ;;  %v4157_v52 = vcombine.low %v379_v41, %v383_v42  ;;  %v4164_v53 = vcombine.high %v386_v47, %v390_v48  ;;  %v447_v47 = vld [vmem:[#allocation5 + $0xae8] sm:$0xff] }
  0xd1   :  { %2563 = vmatprep.subr.bf16.mxu0 %v4108_v54  ;;  %2727 = vmatprep.subr.bf16.mxu1 %v4110_v59  ;;  %v4166_v54 = vcombine.high %v387_v49, %v391_v50  ;;  %v399_v59 = vld [vmem:[#allocation5 + $0x968] sm:$0xff] }
  0xd4   :  { %2564 = vmatpush1.bf16.msra.mxu0 %v4107_v61  ;;  %2728 = vmatpush1.bf16.msra.mxu1 %v4109_v62  ;;  %v4165_v61 = vcombine.low %v387_v49, %v391_v50  ;;  %v4172_v62 = vcombine.high %v394_v55, %v398_v56  ;;  %v455_v55 = vld [vmem:[#allocation5 + $0xb28] sm:$0xff] }
  0xd5   :  { %2565 = vmatprep.subr.bf16.mxu0 %v4116_v63  ;;  %2729 = vmatprep.subr.bf16.mxu1 %v4118_v3  ;;  %v4174_v63 = vcombine.high %v395_v58, %v399_v59  ;;  %v407_v3 = vld [vmem:[#allocation5 + $0x9a8] sm:$0xff] }
  0xd6   :  { %v4181_v14 = vcombine.low %v403_v2, %v407_v3 }
  0xd8   :  { %2566 = vmatpush1.bf16.msra.mxu0 %v4115_v5  ;;  %2730 = vmatpush1.bf16.msra.mxu1 %v4117_v7  ;;  %v4173_v5 = vcombine.low %v395_v58, %v399_v59  ;;  %v4182_v7 = vcombine.high %v403_v2, %v407_v3 }
  0xd9   :  { %2567 = vmatprep.subr.bf16.mxu0 %v4124_v8  ;;  %2731 = vmatprep.subr.bf16.mxu1 %v4126_v13  ;;  %v410_v8 = vld [vmem:[#allocation5 + $0x9c0] sm:$0xff]  ;;  %v4179_v13 = vcombine.low %v402_v0, %v406_v1  ;;  %v463_v0 = vld [vmem:[#allocation5 + $0xb68] sm:$0xff] }
  0xda   :  { %v4187_v21 = vcombine.low %v410_v8, %v414_v9 }
  0xdc   :  { %2568 = vmatpush1.bf16.msra.mxu0 %v4123_v15  ;;  %2732 = vmatpush1.bf16.msra.mxu1 %v4125_v17  ;;  %v4188_v15 = vcombine.high %v410_v8, %v414_v9  ;;  %v418_v17 = vld [vmem:[#allocation5 + $0xa00] sm:$0xff]  ;;  %v471_v8 = vld [vmem:[#allocation5 + $0xba8] sm:$0xff] }
  0xdd   :  { %2578 = vmatprep.subr.bf16.mxu0 %v4132_v18  ;;  %2742 = vmatprep.subr.bf16.mxu1 %v4134_v23  ;;  %v422_v18 = vld [vmem:[#allocation5 + $0xa20] sm:$0xff]  ;;  %v4189_v23 = vcombine.low %v411_v10, %v415_v11 }
  0xde   :  { %v4196_v24 = vcombine.high %v418_v17, %v422_v18  ;;  %v4195_v31 = vcombine.low %v418_v17, %v422_v18  ;;  %v479_v17 = vld [vmem:[#allocation5 + $0xbe8] sm:$0xff] }
  0xdf   :  { %2570 = vmatmul.mubr.bf16.vlgmr.msra.gmra.mrb[0].mxu0 %v4812_v25  ;;  %2734 = vmatmul.mubr.bf16.vlgmr.msra.gmra.mrb[0].mxu1 %v4812_v25 }
  0xe0   :  { %2579 = vmatpush1.bf16.msra.mxu0 %v4131_v26  ;;  %2743 = vmatpush1.bf16.msra.mxu1 %v4133_v27  ;;  %v4198_v26 = vcombine.high %v419_v19, %v423_v20  ;;  %v426_v27 = vld [vmem:[#allocation5 + $0xa40] sm:$0xff] }
  0xe1   :  { %2580 = vmatprep.subr.bf16.mxu0 %v4140_v28  ;;  %2744 = vmatprep.subr.bf16.mxu1 %v4142_v29  ;;  %v430_v28 = vld [vmem:[#allocation5 + $0xa60] sm:$0xff]  ;;  %v427_v29 = vld [vmem:[#allocation5 + $0xa48] sm:$0xff] }
  0xe2   :  { %2610 = vmatprep.mubr.bf16.mxu0 %v4814_v32  ;;  %2774 = vmatprep.mubr.bf16.mxu1 %v4814_v32  ;;  %v4204_v34 = vcombine.high %v426_v27, %v430_v28  ;;  %v4203_v40 = vcombine.low %v426_v27, %v430_v28  ;;  %v4205_v41 = vcombine.low %v427_v29, %v431_v30  ;;  %v487_v27 = vld [vmem:[#allocation5 + $0xc28] sm:$0xff] }
  0xe4   :  { %2581 = vmatpush1.bf16.msra.mxu0 %v4139_v35  ;;  %2745 = vmatpush1.bf16.msra.mxu1 %v4141_v36  ;;  %v4206_v35 = vcombine.high %v427_v29, %v431_v30  ;;  %v434_v36 = vld [vmem:[#allocation5 + $0xa80] sm:$0xff]  ;;  %v88_v29 = vld [vmem:[#allocation2 + $0x20] sm:$0xff] }
  0xe5   :  { %2582 = vmatprep.subr.bf16.mxu0 %v4148_v37  ;;  %2746 = vmatprep.subr.bf16.mxu1 %v4150_v38  ;;  %v438_v37 = vld [vmem:[#allocation5 + $0xaa0] sm:$0xff]  ;;  %v435_v38 = vld [vmem:[#allocation5 + $0xa88] sm:$0xff] }
  0xe6   :  { %v4212_v42 = vcombine.high %v434_v36, %v438_v37  ;;  %v4211_v48 = vcombine.low %v434_v36, %v438_v37  ;;  %v4213_v49 = vcombine.low %v435_v38, %v439_v39  ;;  %v104_v36 = vld [vmem:[#allocation5 + $0x30] sm:$0xff] }
  0xe8   :  { %2583 = vmatpush1.bf16.msra.mxu0 %v4147_v43  ;;  %2747 = vmatpush1.bf16.msra.mxu1 %v4149_v44  ;;  %v4214_v43 = vcombine.high %v435_v38, %v439_v39  ;;  %v442_v44 = vld [vmem:[#allocation5 + $0xac0] sm:$0xff]  ;;  %v101_v38 = vld [vmem:[#allocation5 + $0x18] sm:$0xff] }
  0xe9   :  { %2584 = vmatprep.subr.bf16.mxu0 %v4156_v45  ;;  %2748 = vmatprep.subr.bf16.mxu1 %v4158_v46  ;;  %v446_v45 = vld [vmem:[#allocation5 + $0xae0] sm:$0xff]  ;;  %v443_v46 = vld [vmem:[#allocation5 + $0xac8] sm:$0xff]  ;;  %v105_v39 = vld [vmem:[#allocation5 + $0x38] sm:$0xff] }
  0xea   :  { %v4220_v50 = vcombine.high %v442_v44, %v446_v45  ;;  %v4219_v56 = vcombine.low %v442_v44, %v446_v45  ;;  %v4221_v58 = vcombine.low %v443_v46, %v447_v47  ;;  %v90_v44 = vld [vmem:[#allocation2 + $0x30] sm:$0xff]  ;;  %v108_v45 = vld [vmem:[#allocation5 + $0x50] sm:$0xff] }
  0xec   :  { %2585 = vmatpush1.bf16.msra.mxu0 %v4155_v51  ;;  %2749 = vmatpush1.bf16.msra.mxu1 %v4157_v52  ;;  %v4222_v51 = vcombine.high %v443_v46, %v447_v47  ;;  %v450_v52 = vld [vmem:[#allocation5 + $0xb00] sm:$0xff]  ;;  %v112_v46 = vld [vmem:[#allocation5 + $0x70] sm:$0xff]  ;;  %v4826_v47 = vpack.c.bf16 %v90_v44, %v90_v44 }
  0xed   :  { %2586 = vmatprep.subr.bf16.mxu0 %v4164_v53  ;;  %2750 = vmatprep.subr.bf16.mxu1 %v4166_v54  ;;  %v454_v53 = vld [vmem:[#allocation5 + $0xb20] sm:$0xff]  ;;  %v451_v54 = vld [vmem:[#allocation5 + $0xb08] sm:$0xff]  ;;  %v164_v44 = vld [vmem:[#allocation5 + $0x210] sm:$0xff] }
  0xee   :  { %v4228_v59 = vcombine.high %v450_v52, %v454_v53  ;;  %v4227_v1 = vcombine.low %v450_v52, %v454_v53  ;;  %v4229_v2 = vcombine.low %v451_v54, %v455_v55  ;;  %v3888_v52 = vcombine.high %v108_v45, %v112_v46 }
  0xf0   :  { %2587 = vmatpush1.bf16.msra.mxu0 %v4163_v60  ;;  %2751 = vmatpush1.bf16.msra.mxu1 %v4165_v61  ;;  %v4230_v60 = vcombine.high %v451_v54, %v455_v55  ;;  %v458_v61 = vld [vmem:[#allocation5 + $0xb40] sm:$0xff]  ;;  %v116_v54 = vld [vmem:[#allocation5 + $0x90] sm:$0xff] }
  0xf1   :  { %2588 = vmatprep.subr.bf16.mxu0 %v4172_v62  ;;  %2752 = vmatprep.subr.bf16.mxu1 %v4174_v63  ;;  %v462_v62 = vld [vmem:[#allocation5 + $0xb60] sm:$0xff]  ;;  %v459_v63 = vld [vmem:[#allocation5 + $0xb48] sm:$0xff]  ;;  %v120_v55 = vld [vmem:[#allocation5 + $0xb0] sm:$0xff] }
  0xf2   :  { %v4236_v3 = vcombine.high %v458_v61, %v462_v62  ;;  %v4235_v9 = vcombine.low %v458_v61, %v462_v62  ;;  %v4237_v10 = vcombine.low %v459_v63, %v463_v0  ;;  %v3896_v61 = vcombine.high %v116_v54, %v120_v55 }
  0xf4   :  { %2589 = vmatpush1.bf16.msra.mxu0 %v4171_v4  ;;  %2753 = vmatpush1.bf16.msra.mxu1 %v4173_v5  ;;  %v4238_v4 = vcombine.high %v459_v63, %v463_v0  ;;  %v466_v5 = vld [vmem:[#allocation5 + $0xb80] sm:$0xff]  ;;  %v124_v63 = vld [vmem:[#allocation5 + $0xd0] sm:$0xff] }
  0xf5   :  { %2590 = vmatprep.subr.bf16.mxu0 %v4180_v6  ;;  %2754 = vmatprep.subr.bf16.mxu1 %v4182_v7  ;;  %v470_v6 = vld [vmem:[#allocation5 + $0xba0] sm:$0xff]  ;;  %v467_v7 = vld [vmem:[#allocation5 + $0xb88] sm:$0xff]  ;;  %v128_v0 = vld [vmem:[#allocation5 + $0xf0] sm:$0xff] }
  0xf6   :  { %v4244_v11 = vcombine.high %v466_v5, %v470_v6  ;;  %v4243_v18 = vcombine.low %v466_v5, %v470_v6  ;;  %v4245_v19 = vcombine.low %v467_v7, %v471_v8  ;;  %v3904_v5 = vcombine.high %v124_v63, %v128_v0 }
  0xf8   :  { %2591 = vmatpush1.bf16.msra.mxu0 %v4179_v13  ;;  %2755 = vmatpush1.bf16.msra.mxu1 %v4181_v14  ;;  %v4246_v13 = vcombine.high %v467_v7, %v471_v8  ;;  %v474_v14 = vld [vmem:[#allocation5 + $0xbc0] sm:$0xff]  ;;  %v132_v7 = vld [vmem:[#allocation5 + $0x110] sm:$0xff] }
  0xf9   :  { %2592 = vmatprep.subr.bf16.mxu0 %v4188_v15  ;;  %2756 = vmatprep.subr.bf16.mxu1 %v4190_v16  ;;  %v478_v15 = vld [vmem:[#allocation5 + $0xbe0] sm:$0xff]  ;;  %v475_v16 = vld [vmem:[#allocation5 + $0xbc8] sm:$0xff]  ;;  %v136_v8 = vld [vmem:[#allocation5 + $0x130] sm:$0xff] }
  0xfa   :  { %v4252_v20 = vcombine.high %v474_v14, %v478_v15  ;;  %v4251_v28 = vcombine.low %v474_v14, %v478_v15  ;;  %v4253_v30 = vcombine.low %v475_v16, %v479_v17  ;;  %v3912_v14 = vcombine.high %v132_v7, %v136_v8  ;;  %v140_v15 = vld [vmem:[#allocation5 + $0x150] sm:$0xff] }
  0xfc   :  { %2593 = vmatpush1.bf16.msra.mxu0 %v4187_v21  ;;  %2757 = vmatpush1.bf16.msra.mxu1 %v4189_v23  ;;  %v4254_v21 = vcombine.high %v475_v16, %v479_v17  ;;  %v482_v23 = vld [vmem:[#allocation5 + $0xc00] sm:$0xff]  ;;  %v144_v16 = vld [vmem:[#allocation5 + $0x170] sm:$0xff]  ;;  %v141_v17 = vld [vmem:[#allocation5 + $0x158] sm:$0xff] }
  0xfd   :  { %2594 = vmatprep.subr.bf16.mxu0 %v4196_v24  ;;  %2758 = vmatprep.subr.bf16.mxu1 %v4198_v26  ;;  %v486_v24 = vld [vmem:[#allocation5 + $0xc20] sm:$0xff]  ;;  %v483_v26 = vld [vmem:[#allocation5 + $0xc08] sm:$0xff] }
  0xfe   :  { %v4259_v37 = vcombine.low %v482_v23, %v486_v24 }
 0x100   :  { %2595 = vmatpush1.bf16.msra.mxu0 %v4195_v31  ;;  %2759 = vmatpush1.bf16.msra.mxu1 %v4197_v33  ;;  %v4260_v31 = vcombine.high %v482_v23, %v486_v24  ;;  %v4262_v33 = vcombine.high %v483_v26, %v487_v27  ;;  %v148_v24 = vld [vmem:[#allocation5 + $0x190] sm:$0xff] }
 0x101   :  { %2596 = vmatprep.subr.bf16.mxu0 %v4204_v34  ;;  %2760 = vmatprep.subr.bf16.mxu1 %v4206_v35  ;;  %v4820_v34 = vpack.c.bf16 %v88_v29, %v88_v29  ;;  %v100_v35 = vld [vmem:[#allocation5 + $0x10] sm:$0xff]  ;;  %v3919_v29 = vcombine.low %v140_v15, %v144_v16 }
 0x104   :  { %2597 = vmatpush1.bf16.msra.mxu0 %v4203_v40  ;;  %2761 = vmatpush1.bf16.msra.mxu1 %v4205_v41  ;;  %v4261_v40 = vcombine.low %v483_v26, %v487_v27  ;;  %v3880_v41 = vcombine.high %v100_v35, %v104_v36  ;;  %v152_v26 = vld [vmem:[#allocation5 + $0x1b0] sm:$0xff]  ;;  %v149_v27 = vld [vmem:[#allocation5 + $0x198] sm:$0xff] }
 0x105   :  { %2598 = vmatprep.subr.bf16.mxu0 %v4212_v42  ;;  %2762 = vmatprep.subr.bf16.mxu1 %v4214_v43  ;;  %v3882_v42 = vcombine.high %v101_v38, %v105_v39  ;;  %v4708_v43 = vmov 0  }
 0x108   :  { %2599 = vmatpush1.bf16.msra.mxu0 %v4211_v48  ;;  %2763 = vmatpush1.bf16.msra.mxu1 %v4213_v49  ;;  %v109_v48 = vld [vmem:[#allocation5 + $0x58] sm:$0xff] }
 0x109   :  { %2600 = vmatprep.subr.bf16.mxu0 %v4220_v50  ;;  %2764 = vmatprep.subr.bf16.mxu1 %v4222_v51  ;;  %v113_v49 = vld [vmem:[#allocation5 + $0x78] sm:$0xff]  ;;  %v3879_v50 = vcombine.low %v100_v35, %v104_v36  ;;  %v3881_v51 = vcombine.low %v101_v38, %v105_v39  ;;  %v156_v35 = vld [vmem:[#allocation5 + $0x1d0] sm:$0xff]  ;;  %v3927_v39 = vcombine.low %v148_v24, %v152_v26 }
 0x10a   :  { %v3890_v53 = vcombine.high %v109_v48, %v113_v49  ;;  %v160_v36 = vld [vmem:[#allocation5 + $0x1f0] sm:$0xff]  ;;  %v161_v38 = vld [vmem:[#allocation5 + $0x1f8] sm:$0xff] }
 0x10c   :  { %2601 = vmatpush1.bf16.msra.mxu0 %v4219_v56  ;;  %2765 = vmatpush1.bf16.msra.mxu1 %v4221_v58  ;;  %v117_v56 = vld [vmem:[#allocation5 + $0x98] sm:$0xff] }
 0x10d   :  { %2602 = vmatprep.subr.bf16.mxu0 %v4228_v59  ;;  %2766 = vmatprep.subr.bf16.mxu1 %v4230_v60  ;;  %v121_v58 = vld [vmem:[#allocation5 + $0xb8] sm:$0xff]  ;;  %v3887_v59 = vcombine.low %v108_v45, %v112_v46  ;;  %v3889_v60 = vcombine.low %v109_v48, %v113_v49  ;;  %v168_v45 = vld [vmem:[#allocation5 + $0x230] sm:$0xff]  ;;  %v3935_v49 = vcombine.low %v156_v35, %v160_v36 }
 0x10e   :  { %v3898_v62 = vcombine.high %v117_v56, %v121_v58  ;;  %v165_v46 = vld [vmem:[#allocation5 + $0x218] sm:$0xff] }
 0x10f   :  { %v169_v48 = vld [vmem:[#allocation5 + $0x238] sm:$0xff] }
 0x110   :  { %2603 = vmatpush1.bf16.msra.mxu0 %v4227_v1  ;;  %2767 = vmatpush1.bf16.msra.mxu1 %v4229_v2  ;;  %v125_v1 = vld [vmem:[#allocation5 + $0xd8] sm:$0xff] }
 0x111   :  { %2604 = vmatprep.subr.bf16.mxu0 %v4236_v3  ;;  %2768 = vmatprep.subr.bf16.mxu1 %v4238_v4  ;;  %v129_v2 = vld [vmem:[#allocation5 + $0xf8] sm:$0xff]  ;;  %v3895_v3 = vcombine.low %v116_v54, %v120_v55  ;;  %v3897_v4 = vcombine.low %v117_v56, %v121_v58  ;;  %v176_v54 = vld [vmem:[#allocation5 + $0x270] sm:$0xff]  ;;  %v3943_v58 = vcombine.low %v164_v44, %v168_v45 }
 0x112   :  { %v3906_v6 = vcombine.high %v125_v1, %v129_v2  ;;  %v173_v55 = vld [vmem:[#allocation5 + $0x258] sm:$0xff] }
 0x113   :  { %v177_v56 = vld [vmem:[#allocation5 + $0x278] sm:$0xff] }
 0x114   :  { %2605 = vmatpush1.bf16.msra.mxu0 %v4235_v9  ;;  %2769 = vmatpush1.bf16.msra.mxu1 %v4237_v10  ;;  %v133_v9 = vld [vmem:[#allocation5 + $0x118] sm:$0xff] }
 0x115   :  { %2606 = vmatprep.subr.bf16.mxu0 %v4244_v11  ;;  %2770 = vmatprep.subr.bf16.mxu1 %v4246_v13  ;;  %v137_v10 = vld [vmem:[#allocation5 + $0x138] sm:$0xff]  ;;  %v3903_v11 = vcombine.low %v124_v63, %v128_v0  ;;  %v3905_v13 = vcombine.low %v125_v1, %v129_v2  ;;  %v184_v63 = vld [vmem:[#allocation5 + $0x2b0] sm:$0xff] }
 0x116   :  { %v181_v0 = vld [vmem:[#allocation5 + $0x298] sm:$0xff] }
 0x117   :  { %v185_v1 = vld [vmem:[#allocation5 + $0x2b8] sm:$0xff] }
 0x118   :  { %2607 = vmatpush1.bf16.msra.mxu0 %v4243_v18  ;;  %2771 = vmatpush1.bf16.msra.mxu1 %v4245_v19  ;;  %v145_v18 = vld [vmem:[#allocation5 + $0x178] sm:$0xff]  ;;  %v3911_v19 = vcombine.low %v132_v7, %v136_v8  ;;  %v192_v7 = vld [vmem:[#allocation5 + $0x2f0] sm:$0xff] }
 0x119   :  { %2608 = vmatprep.subr.bf16.mxu0 %v4252_v20  ;;  %2772 = vmatprep.subr.bf16.mxu1 %v4254_v21  ;;  %v3913_v20 = vcombine.low %v133_v9, %v137_v10  ;;  %v3920_v21 = vcombine.high %v140_v15, %v144_v16  ;;  %v3922_v23 = vcombine.high %v141_v17, %v145_v18  ;;  %v189_v8 = vld [vmem:[#allocation5 + $0x2d8] sm:$0xff]  ;;  %v200_v15 = vld [vmem:[#allocation5 + $0x330] sm:$0xff] }
 0x11a   :  { %v197_v16 = vld [vmem:[#allocation5 + $0x318] sm:$0xff] }
 0x11c   :  { %2609 = vmatpush1.bf16.msra.mxu0 %v4251_v28  ;;  %2773 = vmatpush1.bf16.msra.mxu1 %v4253_v30  ;;  %v153_v28 = vld [vmem:[#allocation5 + $0x1b8] sm:$0xff]  ;;  %v3921_v30 = vcombine.low %v141_v17, %v145_v18 }
 0x11d   :  { %2619 = vmatprep.subr.bf16.mxu0 %v4260_v31  ;;  %2783 = vmatprep.subr.bf16.mxu1 %v4262_v33  ;;  %v3928_v31 = vcombine.high %v148_v24, %v152_v26  ;;  %v3930_v33 = vcombine.high %v149_v27, %v153_v28  ;;  %v201_v17 = vld [vmem:[#allocation5 + $0x338] sm:$0xff]  ;;  %v208_v24 = vld [vmem:[#allocation5 + $0x370] sm:$0xff] }
 0x11e   :  { %v205_v26 = vld [vmem:[#allocation5 + $0x358] sm:$0xff] }
 0x11f   :  { %2611 = vmatmul.mubr.bf16.vlgmr.msra.gmra.mrb[0].mxu0 %v4820_v34  ;;  %2775 = vmatmul.mubr.bf16.vlgmr.msra.gmra.mrb[0].mxu1 %v4820_v34 }
 0x120   :  { %2620 = vmatpush1.bf16.msra.mxu0 %v4259_v37  ;;  %2784 = vmatpush1.bf16.msra.mxu1 %v4261_v40  ;;  %v157_v37 = vld [vmem:[#allocation5 + $0x1d8] sm:$0xff]  ;;  %v3929_v40 = vcombine.low %v149_v27, %v153_v28 }
 0x121   :  { %2651 = vmatprep.mubr.bf16.mxu0 %v4708_v43  ;;  %2815 = vmatprep.mubr.bf16.mxu1 %v4708_v43  ;;  %v209_v27 = vld [vmem:[#allocation5 + $0x378] sm:$0xff] }
 0x122   :  { %2824 = vmatprep.subr.bf16.mxu0 %v3880_v41  ;;  %2988 = vmatprep.subr.bf16.mxu1 %v3882_v42  ;;  %v3936_v41 = vcombine.high %v156_v35, %v160_v36  ;;  %v3938_v42 = vcombine.high %v157_v37, %v161_v38  ;;  %v216_v35 = vld [vmem:[#allocation5 + $0x3b0] sm:$0xff]  ;;  %v213_v36 = vld [vmem:[#allocation5 + $0x398] sm:$0xff] }
 0x12b   :  { %4267 = vmatmul.mubr.msk.bf16.vlgmr.msra.gmra.mrb[0].mxu0 %vm2492_vm0, %v4826_v47  ;;  %4268 = vmatmul.mubr.msk.bf16.vlgmr.msra.gmra.mrb[0].mxu1 %vm2492_vm0, %v4826_v47 }
 0x12c   :  { %2825 = vmatpush1.bf16.msra.mxu0 %v3879_v50  ;;  %2989 = vmatpush1.bf16.msra.mxu1 %v3881_v51  ;;  %v3937_v50 = vcombine.low %v157_v37, %v161_v38  ;;  %v3944_v51 = vcombine.high %v164_v44, %v168_v45  ;;  %v217_v37 = vld [vmem:[#allocation5 + $0x3b8] sm:$0xff]  ;;  %v224_v44 = vld [vmem:[#allocation5 + $0x3f0] sm:$0xff] }
 0x12d   :  { %2826 = vmatprep.subr.bf16.mxu0 %v3888_v52  ;;  %2990 = vmatprep.subr.bf16.mxu1 %v3890_v53  ;;  %v3946_v52 = vcombine.high %v165_v46, %v169_v48  ;;  %v172_v53 = vld [vmem:[#allocation5 + $0x250] sm:$0xff]  ;;  %v221_v45 = vld [vmem:[#allocation5 + $0x3d8] sm:$0xff] }
 0x12e   :  { %2856 = vmatprep.mubr.bf16.mxu0 %v4800_v57  ;;  %3020 = vmatprep.mubr.bf16.mxu1 %v4800_v57  ;;  %v3914_v57 = vcombine.high %v133_v9, %v137_v10  ;;  %v3951_v2 = vcombine.low %v172_v53, %v176_v54  ;;  %v193_v9 = vld [vmem:[#allocation5 + $0x2f8] sm:$0xff] }
 0x130   :  { %2827 = vmatpush1.bf16.msra.mxu0 %v3887_v59  ;;  %2991 = vmatpush1.bf16.msra.mxu1 %v3889_v60  ;;  %v3945_v59 = vcombine.low %v165_v46, %v169_v48  ;;  %v3952_v60 = vcombine.high %v172_v53, %v176_v54  ;;  %v225_v46 = vld [vmem:[#allocation5 + $0x3f8] sm:$0xff]  ;;  %v232_v53 = vld [vmem:[#allocation5 + $0x430] sm:$0xff] }
 0x131   :  { %2828 = vmatprep.subr.bf16.mxu0 %v3896_v61  ;;  %2992 = vmatprep.subr.bf16.mxu1 %v3898_v62  ;;  %v3954_v61 = vcombine.high %v173_v55, %v177_v56  ;;  %v180_v62 = vld [vmem:[#allocation5 + $0x290] sm:$0xff]  ;;  %v229_v54 = vld [vmem:[#allocation5 + $0x418] sm:$0xff] }
 0x132   :  { %v3959_v10 = vcombine.low %v180_v62, %v184_v63 }
 0x134   :  { %2829 = vmatpush1.bf16.msra.mxu0 %v3895_v3  ;;  %2993 = vmatpush1.bf16.msra.mxu1 %v3897_v4  ;;  %v3953_v3 = vcombine.low %v173_v55, %v177_v56  ;;  %v3960_v4 = vcombine.high %v180_v62, %v184_v63  ;;  %v233_v55 = vld [vmem:[#allocation5 + $0x438] sm:$0xff]  ;;  %v240_v62 = vld [vmem:[#allocation5 + $0x470] sm:$0xff] }
 0x135   :  { %2830 = vmatprep.subr.bf16.mxu0 %v3904_v5  ;;  %2994 = vmatprep.subr.bf16.mxu1 %v3906_v6  ;;  %v3962_v5 = vcombine.high %v181_v0, %v185_v1  ;;  %v188_v6 = vld [vmem:[#allocation5 + $0x2d0] sm:$0xff]  ;;  %v237_v63 = vld [vmem:[#allocation5 + $0x458] sm:$0xff] }
 0x136   :  { %v3967_v18 = vcombine.low %v188_v6, %v192_v7 }
 0x138   :  { %2831 = vmatpush1.bf16.msra.mxu0 %v3903_v11  ;;  %2995 = vmatpush1.bf16.msra.mxu1 %v3905_v13  ;;  %v3961_v11 = vcombine.low %v181_v0, %v185_v1  ;;  %v3968_v13 = vcombine.high %v188_v6, %v192_v7  ;;  %v241_v0 = vld [vmem:[#allocation5 + $0x478] sm:$0xff]  ;;  %v248_v6 = vld [vmem:[#allocation5 + $0x4b0] sm:$0xff] }
 0x139   :  { %2832 = vmatprep.subr.bf16.mxu0 %v3912_v14  ;;  %2996 = vmatprep.subr.bf16.mxu1 %v3914_v57  ;;  %v3970_v14 = vcombine.high %v189_v8, %v193_v9  ;;  %v196_v57 = vld [vmem:[#allocation5 + $0x310] sm:$0xff]  ;;  %v245_v7 = vld [vmem:[#allocation5 + $0x498] sm:$0xff] }
 0x13a   :  { %v3975_v28 = vcombine.low %v196_v57, %v200_v15 }
 0x13c   :  { %2833 = vmatpush1.bf16.msra.mxu0 %v3911_v19  ;;  %2997 = vmatpush1.bf16.msra.mxu1 %v3913_v20  ;;  %v3969_v19 = vcombine.low %v189_v8, %v193_v9  ;;  %v3976_v20 = vcombine.high %v196_v57, %v200_v15  ;;  %v249_v8 = vld [vmem:[#allocation5 + $0x4b8] sm:$0xff]  ;;  %v256_v57 = vld [vmem:[#allocation5 + $0x4f0] sm:$0xff] }
 0x13d   :  { %2834 = vmatprep.subr.bf16.mxu0 %v3920_v21  ;;  %2998 = vmatprep.subr.bf16.mxu1 %v3922_v23  ;;  %v3978_v21 = vcombine.high %v197_v16, %v201_v17  ;;  %v204_v23 = vld [vmem:[#allocation5 + $0x350] sm:$0xff]  ;;  %v253_v15 = vld [vmem:[#allocation5 + $0x4d8] sm:$0xff] }
 0x13e   :  { %v3983_v38 = vcombine.low %v204_v23, %v208_v24 }
 0x140   :  { %2835 = vmatpush1.bf16.msra.mxu0 %v3919_v29  ;;  %2999 = vmatpush1.bf16.msra.mxu1 %v3921_v30  ;;  %v3977_v29 = vcombine.low %v197_v16, %v201_v17  ;;  %v3984_v30 = vcombine.high %v204_v23, %v208_v24  ;;  %v257_v16 = vld [vmem:[#allocation5 + $0x4f8] sm:$0xff] }
 0x141   :  { %2836 = vmatprep.subr.bf16.mxu0 %v3928_v31  ;;  %3000 = vmatprep.subr.bf16.mxu1 %v3930_v33  ;;  %v3986_v31 = vcombine.high %v205_v26, %v209_v27  ;;  %v212_v33 = vld [vmem:[#allocation5 + $0x390] sm:$0xff]  ;;  %v261_v23 = vld [vmem:[#allocation5 + $0x518] sm:$0xff] }
 0x142   :  { %v3991_v48 = vcombine.low %v212_v33, %v216_v35  ;;  %v265_v24 = vld [vmem:[#allocation5 + $0x538] sm:$0xff] }
 0x144   :  { %2837 = vmatpush1.bf16.msra.mxu0 %v3927_v39  ;;  %3001 = vmatpush1.bf16.msra.mxu1 %v3929_v40  ;;  %v3985_v39 = vcombine.low %v205_v26, %v209_v27  ;;  %v3992_v40 = vcombine.high %v212_v33, %v216_v35  ;;  %v4033_v27 = vcombine.low %v253_v15, %v257_v16  ;;  %v273_v33 = vld [vmem:[#allocation5 + $0x578] sm:$0xff] }
 0x145   :  { %2838 = vmatprep.subr.bf16.mxu0 %v3936_v41  ;;  %3002 = vmatprep.subr.bf16.mxu1 %v3938_v42  ;;  %v3994_v41 = vcombine.high %v213_v36, %v217_v37  ;;  %v220_v42 = vld [vmem:[#allocation5 + $0x3d0] sm:$0xff] }
 0x146   :  { %v3999_v56 = vcombine.low %v220_v42, %v224_v44 }
 0x148   :  { %2839 = vmatpush1.bf16.msra.mxu0 %v3935_v49  ;;  %3003 = vmatpush1.bf16.msra.mxu1 %v3937_v50  ;;  %v3993_v49 = vcombine.low %v213_v36, %v217_v37  ;;  %v4000_v50 = vcombine.high %v220_v42, %v224_v44  ;;  %v4041_v36 = vcombine.low %v261_v23, %v265_v24  ;;  %v281_v42 = vld [vmem:[#allocation5 + $0x5b8] sm:$0xff] }
 0x149   :  { %2840 = vmatprep.subr.bf16.mxu0 %v3944_v51  ;;  %3004 = vmatprep.subr.bf16.mxu1 %v3946_v52  ;;  %v4002_v51 = vcombine.high %v221_v45, %v225_v46  ;;  %v228_v52 = vld [vmem:[#allocation5 + $0x410] sm:$0xff] }
 0x14a   :  { %v4007_v1 = vcombine.low %v228_v52, %v232_v53 }
 0x14c   :  { %2841 = vmatpush1.bf16.msra.mxu0 %v3943_v58  ;;  %3005 = vmatpush1.bf16.msra.mxu1 %v3945_v59  ;;  %v4001_v58 = vcombine.low %v221_v45, %v225_v46  ;;  %v4008_v59 = vcombine.high %v228_v52, %v232_v53  ;;  %v289_v52 = vld [vmem:[#allocation5 + $0x5f8] sm:$0xff] }
 0x14d   :  { %2842 = vmatprep.subr.bf16.mxu0 %v3952_v60  ;;  %3006 = vmatprep.subr.bf16.mxu1 %v3954_v61  ;;  %v4010_v60 = vcombine.high %v229_v54, %v233_v55  ;;  %v236_v61 = vld [vmem:[#allocation5 + $0x450] sm:$0xff] }
 0x14e   :  { %v4015_v9 = vcombine.low %v236_v61, %v240_v62 }
 0x150   :  { %2843 = vmatpush1.bf16.msra.mxu0 %v3951_v2  ;;  %3007 = vmatpush1.bf16.msra.mxu1 %v3953_v3  ;;  %v4009_v2 = vcombine.low %v229_v54, %v233_v55  ;;  %v4016_v3 = vcombine.high %v236_v61, %v240_v62  ;;  %v297_v61 = vld [vmem:[#allocation5 + $0x638] sm:$0xff] }
 0x151   :  { %2844 = vmatprep.subr.bf16.mxu0 %v3960_v4  ;;  %3008 = vmatprep.subr.bf16.mxu1 %v3962_v5  ;;  %v4018_v4 = vcombine.high %v237_v63, %v241_v0  ;;  %v244_v5 = vld [vmem:[#allocation5 + $0x490] sm:$0xff] }
 0x152   :  { %v4023_v17 = vcombine.low %v244_v5, %v248_v6 }
 0x154   :  { %2845 = vmatpush1.bf16.msra.mxu0 %v3959_v10  ;;  %3009 = vmatpush1.bf16.msra.mxu1 %v3961_v11  ;;  %v4017_v10 = vcombine.low %v237_v63, %v241_v0  ;;  %v4024_v11 = vcombine.high %v244_v5, %v248_v6  ;;  %v305_v5 = vld [vmem:[#allocation5 + $0x678] sm:$0xff] }
 0x155   :  { %2846 = vmatprep.subr.bf16.mxu0 %v3968_v13  ;;  %3010 = vmatprep.subr.bf16.mxu1 %v3970_v14  ;;  %v4026_v13 = vcombine.high %v245_v7, %v249_v8  ;;  %v252_v14 = vld [vmem:[#allocation5 + $0x4d0] sm:$0xff] }
 0x156   :  { %v4031_v26 = vcombine.low %v252_v14, %v256_v57 }
 0x158   :  { %2847 = vmatpush1.bf16.msra.mxu0 %v3967_v18  ;;  %3011 = vmatpush1.bf16.msra.mxu1 %v3969_v19  ;;  %v4032_v18 = vcombine.high %v252_v14, %v256_v57  ;;  %v4034_v19 = vcombine.high %v253_v15, %v257_v16  ;;  %v313_v14 = vld [vmem:[#allocation5 + $0x6b8] sm:$0xff] }
 0x159   :  { %2848 = vmatprep.subr.bf16.mxu0 %v3976_v20  ;;  %3012 = vmatprep.subr.bf16.mxu1 %v3978_v21  ;;  %v260_v20 = vld [vmem:[#allocation5 + $0x510] sm:$0xff] }
 0x15a   :  { %v264_v21 = vld [vmem:[#allocation5 + $0x530] sm:$0xff] }
 0x15b   :  { %v4039_v35 = vcombine.low %v260_v20, %v264_v21 }
 0x15c   :  { %2849 = vmatpush1.bf16.msra.mxu0 %v3975_v28  ;;  %3013 = vmatpush1.bf16.msra.mxu1 %v3977_v29  ;;  %v4040_v28 = vcombine.high %v260_v20, %v264_v21  ;;  %v268_v29 = vld [vmem:[#allocation5 + $0x550] sm:$0xff]  ;;  %v321_v20 = vld [vmem:[#allocation5 + $0x6f8] sm:$0xff] }
 0x15d   :  { %2850 = vmatprep.subr.bf16.mxu0 %v3984_v30  ;;  %3014 = vmatprep.subr.bf16.mxu1 %v3986_v31  ;;  %v272_v30 = vld [vmem:[#allocation5 + $0x570] sm:$0xff]  ;;  %v269_v31 = vld [vmem:[#allocation5 + $0x558] sm:$0xff] }
 0x15e   :  { %v4048_v37 = vcombine.high %v268_v29, %v272_v30  ;;  %v4047_v44 = vcombine.low %v268_v29, %v272_v30  ;;  %v4049_v45 = vcombine.low %v269_v31, %v273_v33  ;;  %v329_v29 = vld [vmem:[#allocation5 + $0x738] sm:$0xff] }
 0x160   :  { %2851 = vmatpush1.bf16.msra.mxu0 %v3983_v38  ;;  %3015 = vmatpush1.bf16.msra.mxu1 %v3985_v39  ;;  %v4050_v38 = vcombine.high %v269_v31, %v273_v33  ;;  %v276_v39 = vld [vmem:[#allocation5 + $0x590] sm:$0xff] }
 0x161   :  { %2852 = vmatprep.subr.bf16.mxu0 %v3992_v40  ;;  %3016 = vmatprep.subr.bf16.mxu1 %v3994_v41  ;;  %v280_v40 = vld [vmem:[#allocation5 + $0x5b0] sm:$0xff]  ;;  %v277_v41 = vld [vmem:[#allocation5 + $0x598] sm:$0xff] }
 0x162   :  { %v4056_v46 = vcombine.high %v276_v39, %v280_v40  ;;  %v4055_v53 = vcombine.low %v276_v39, %v280_v40  ;;  %v4057_v54 = vcombine.low %v277_v41, %v281_v42  ;;  %v337_v39 = vld [vmem:[#allocation5 + $0x778] sm:$0xff] }
 0x164   :  { %2853 = vmatpush1.bf16.msra.mxu0 %v3991_v48  ;;  %3017 = vmatpush1.bf16.msra.mxu1 %v3993_v49  ;;  %v4058_v48 = vcombine.high %v277_v41, %v281_v42  ;;  %v284_v49 = vld [vmem:[#allocation5 + $0x5d0] sm:$0xff] }
 0x165   :  { %2854 = vmatprep.subr.bf16.mxu0 %v4000_v50  ;;  %3018 = vmatprep.subr.bf16.mxu1 %v4002_v51  ;;  %v288_v50 = vld [vmem:[#allocation5 + $0x5f0] sm:$0xff]  ;;  %v285_v51 = vld [vmem:[#allocation5 + $0x5d8] sm:$0xff] }
 0x166   :  { %v4064_v55 = vcombine.high %v284_v49, %v288_v50  ;;  %v4063_v62 = vcombine.low %v284_v49, %v288_v50  ;;  %v4065_v63 = vcombine.low %v285_v51, %v289_v52  ;;  %v345_v49 = vld [vmem:[#allocation5 + $0x7b8] sm:$0xff] }
 0x168   :  { %2855 = vmatpush1.bf16.msra.mxu0 %v3999_v56  ;;  %3019 = vmatpush1.bf16.msra.mxu1 %v4001_v58  ;;  %v4066_v56 = vcombine.high %v285_v51, %v289_v52  ;;  %v292_v58 = vld [vmem:[#allocation5 + $0x610] sm:$0xff] }
 0x169   :  { %2865 = vmatprep.subr.bf16.mxu0 %v4008_v59  ;;  %3029 = vmatprep.subr.bf16.mxu1 %v4010_v60  ;;  %v296_v59 = vld [vmem:[#allocation5 + $0x630] sm:$0xff]  ;;  %v293_v60 = vld [vmem:[#allocation5 + $0x618] sm:$0xff] }
 0x16a   :  { %v4072_v0 = vcombine.high %v292_v58, %v296_v59  ;;  %v4071_v6 = vcombine.low %v292_v58, %v296_v59  ;;  %v353_v58 = vld [vmem:[#allocation5 + $0x7f8] sm:$0xff] }
 0x16b   :  { %2857 = vmatmul.mubr.bf16.vlgmr.msra.gmra.mrb[4].mxu0 %v4804_v12  ;;  %3021 = vmatmul.mubr.bf16.vlgmr.msra.gmra.mrb[4].mxu1 %v4804_v12  ;;  %v4025_v12 = vcombine.low %v245_v7, %v249_v8  ;;  %v4073_v7 = vcombine.low %v293_v60, %v297_v61 }
 0x16c   :  { %2866 = vmatpush1.bf16.msra.mxu0 %v4007_v1  ;;  %3030 = vmatpush1.bf16.msra.mxu1 %v4009_v2  ;;  %v4074_v1 = vcombine.high %v293_v60, %v297_v61  ;;  %v300_v2 = vld [vmem:[#allocation5 + $0x650] sm:$0xff] }
 0x16d   :  { %2867 = vmatprep.subr.bf16.mxu0 %v4016_v3  ;;  %3031 = vmatprep.subr.bf16.mxu1 %v4018_v4  ;;  %v304_v3 = vld [vmem:[#allocation5 + $0x670] sm:$0xff]  ;;  %v301_v4 = vld [vmem:[#allocation5 + $0x658] sm:$0xff] }
 0x16e   :  { %2897 = vmatprep.mubr.bf16.mxu0 %v4806_v22  ;;  %3061 = vmatprep.mubr.bf16.mxu1 %v4806_v22  ;;  %v4042_v22 = vcombine.high %v261_v23, %v265_v24  ;;  %v4080_v8 = vcombine.high %v300_v2, %v304_v3  ;;  %v4079_v57 = vcombine.low %v300_v2, %v304_v3  ;;  %v361_v2 = vld [vmem:[#allocation5 + $0x838] sm:$0xff] }
 0x16f   :  { %v4081_v15 = vcombine.low %v301_v4, %v305_v5 }
 0x170   :  { %2868 = vmatpush1.bf16.msra.mxu0 %v4015_v9  ;;  %3032 = vmatpush1.bf16.msra.mxu1 %v4017_v10  ;;  %v4082_v9 = vcombine.high %v301_v4, %v305_v5  ;;  %v308_v10 = vld [vmem:[#allocation5 + $0x690] sm:$0xff] }
 0x171   :  { %2869 = vmatprep.subr.bf16.mxu0 %v4024_v11  ;;  %3033 = vmatprep.subr.bf16.mxu1 %v4026_v13  ;;  %v312_v11 = vld [vmem:[#allocation5 + $0x6b0] sm:$0xff]  ;;  %v309_v13 = vld [vmem:[#allocation5 + $0x698] sm:$0xff] }
 0x172   :  { %v4088_v16 = vcombine.high %v308_v10, %v312_v11  ;;  %v4087_v21 = vcombine.low %v308_v10, %v312_v11  ;;  %v4089_v23 = vcombine.low %v309_v13, %v313_v14  ;;  %v369_v10 = vld [vmem:[#allocation5 + $0x878] sm:$0xff] }
 0x174   :  { %2870 = vmatpush1.bf16.msra.mxu0 %v4023_v17  ;;  %3034 = vmatpush1.bf16.msra.mxu1 %v4025_v12  ;;  %v4090_v17 = vcombine.high %v309_v13, %v313_v14  ;;  %v316_v12 = vld [vmem:[#allocation5 + $0x6d0] sm:$0xff] }
 0x175   :  { %2871 = vmatprep.subr.bf16.mxu0 %v4032_v18  ;;  %3035 = vmatprep.subr.bf16.mxu1 %v4034_v19  ;;  %v320_v18 = vld [vmem:[#allocation5 + $0x6f0] sm:$0xff]  ;;  %v317_v19 = vld [vmem:[#allocation5 + $0x6d8] sm:$0xff] }
 0x176   :  { %v4096_v24 = vcombine.high %v316_v12, %v320_v18  ;;  %v4095_v30 = vcombine.low %v316_v12, %v320_v18  ;;  %v4097_v31 = vcombine.low %v317_v19, %v321_v20  ;;  %v377_v12 = vld [vmem:[#allocation5 + $0x8b8] sm:$0xff] }
 0x178   :  { %2872 = vmatpush1.bf16.msra.mxu0 %v4031_v26  ;;  %3036 = vmatpush1.bf16.msra.mxu1 %v4033_v27  ;;  %v4098_v26 = vcombine.high %v317_v19, %v321_v20  ;;  %v324_v27 = vld [vmem:[#allocation5 + $0x710] sm:$0xff] }
 0x179   :  { %2873 = vmatprep.subr.bf16.mxu0 %v4040_v28  ;;  %3037 = vmatprep.subr.bf16.mxu1 %v4042_v22  ;;  %v328_v28 = vld [vmem:[#allocation5 + $0x730] sm:$0xff]  ;;  %v325_v22 = vld [vmem:[#allocation5 + $0x718] sm:$0xff] }
 0x17a   :  { %v4104_v33 = vcombine.high %v324_v27, %v328_v28  ;;  %v4103_v40 = vcombine.low %v324_v27, %v328_v28  ;;  %v4105_v41 = vcombine.low %v325_v22, %v329_v29  ;;  %v385_v27 = vld [vmem:[#allocation5 + $0x8f8] sm:$0xff] }
 0x17c   :  { %2874 = vmatpush1.bf16.msra.mxu0 %v4039_v35  ;;  %3038 = vmatpush1.bf16.msra.mxu1 %v4041_v36  ;;  %v4106_v35 = vcombine.high %v325_v22, %v329_v29  ;;  %v332_v36 = vld [vmem:[#allocation5 + $0x750] sm:$0xff] }
 0x17d   :  { %2875 = vmatprep.subr.bf16.mxu0 %v4048_v37  ;;  %3039 = vmatprep.subr.bf16.mxu1 %v4050_v38  ;;  %v336_v37 = vld [vmem:[#allocation5 + $0x770] sm:$0xff]  ;;  %v333_v38 = vld [vmem:[#allocation5 + $0x758] sm:$0xff] }
 0x17e   :  { %v4112_v42 = vcombine.high %v332_v36, %v336_v37  ;;  %v4111_v50 = vcombine.low %v332_v36, %v336_v37  ;;  %v4113_v51 = vcombine.low %v333_v38, %v337_v39 }
 0x180   :  { %2876 = vmatpush1.bf16.msra.mxu0 %v4047_v44  ;;  %3040 = vmatpush1.bf16.msra.mxu1 %v4049_v45  ;;  %v4114_v44 = vcombine.high %v333_v38, %v337_v39  ;;  %v340_v45 = vld [vmem:[#allocation5 + $0x790] sm:$0xff] }
 0x181   :  { %2877 = vmatprep.subr.bf16.mxu0 %v4056_v46  ;;  %3041 = vmatprep.subr.bf16.mxu1 %v4058_v48  ;;  %v344_v46 = vld [vmem:[#allocation5 + $0x7b0] sm:$0xff]  ;;  %v341_v48 = vld [vmem:[#allocation5 + $0x798] sm:$0xff] }
 0x182   :  { %v4120_v52 = vcombine.high %v340_v45, %v344_v46  ;;  %v4119_v59 = vcombine.low %v340_v45, %v344_v46  ;;  %v4121_v60 = vcombine.low %v341_v48, %v345_v49  ;;  %v396_v39 = vld [vmem:[#allocation5 + $0x950] sm:$0xff] }
 0x184   :  { %2878 = vmatpush1.bf16.msra.mxu0 %v4055_v53  ;;  %3042 = vmatpush1.bf16.msra.mxu1 %v4057_v54  ;;  %v4122_v53 = vcombine.high %v341_v48, %v345_v49  ;;  %v348_v54 = vld [vmem:[#allocation5 + $0x7d0] sm:$0xff] }
 0x185   :  { %2879 = vmatprep.subr.bf16.mxu0 %v4064_v55  ;;  %3043 = vmatprep.subr.bf16.mxu1 %v4066_v56  ;;  %v352_v55 = vld [vmem:[#allocation5 + $0x7f0] sm:$0xff]  ;;  %v349_v56 = vld [vmem:[#allocation5 + $0x7d8] sm:$0xff] }
 0x186   :  { %v4128_v61 = vcombine.high %v348_v54, %v352_v55  ;;  %v4127_v3 = vcombine.low %v348_v54, %v352_v55  ;;  %v4129_v4 = vcombine.low %v349_v56, %v353_v58  ;;  %v404_v49 = vld [vmem:[#allocation5 + $0x990] sm:$0xff] }
 0x188   :  { %2880 = vmatpush1.bf16.msra.mxu0 %v4063_v62  ;;  %3044 = vmatpush1.bf16.msra.mxu1 %v4065_v63  ;;  %v4130_v62 = vcombine.high %v349_v56, %v353_v58  ;;  %v356_v63 = vld [vmem:[#allocation5 + $0x810] sm:$0xff] }
 0x189   :  { %2881 = vmatprep.subr.bf16.mxu0 %v4072_v0  ;;  %3045 = vmatprep.subr.bf16.mxu1 %v4074_v1  ;;  %v360_v0 = vld [vmem:[#allocation5 + $0x830] sm:$0xff]  ;;  %v357_v1 = vld [vmem:[#allocation5 + $0x818] sm:$0xff] }
 0x18a   :  { %v4136_v5 = vcombine.high %v356_v63, %v360_v0  ;;  %v4135_v11 = vcombine.low %v356_v63, %v360_v0  ;;  %v4137_v13 = vcombine.low %v357_v1, %v361_v2  ;;  %v412_v58 = vld [vmem:[#allocation5 + $0x9d0] sm:$0xff] }
 0x18c   :  { %2882 = vmatpush1.bf16.msra.mxu0 %v4071_v6  ;;  %3046 = vmatpush1.bf16.msra.mxu1 %v4073_v7  ;;  %v4138_v6 = vcombine.high %v357_v1, %v361_v2  ;;  %v364_v7 = vld [vmem:[#allocation5 + $0x850] sm:$0xff] }
 0x18d   :  { %2883 = vmatprep.subr.bf16.mxu0 %v4080_v8  ;;  %3047 = vmatprep.subr.bf16.mxu1 %v4082_v9  ;;  %v368_v8 = vld [vmem:[#allocation5 + $0x870] sm:$0xff]  ;;  %v365_v9 = vld [vmem:[#allocation5 + $0x858] sm:$0xff] }
 0x18e   :  { %v4144_v14 = vcombine.high %v364_v7, %v368_v8  ;;  %v4143_v18 = vcombine.low %v364_v7, %v368_v8  ;;  %v4145_v19 = vcombine.low %v365_v9, %v369_v10  ;;  %v420_v2 = vld [vmem:[#allocation5 + $0xa10] sm:$0xff] }
 0x190   :  { %2884 = vmatpush1.bf16.msra.mxu0 %v4079_v57  ;;  %3048 = vmatpush1.bf16.msra.mxu1 %v4081_v15  ;;  %v4146_v57 = vcombine.high %v365_v9, %v369_v10  ;;  %v372_v15 = vld [vmem:[#allocation5 + $0x890] sm:$0xff] }
 0x191   :  { %2885 = vmatprep.subr.bf16.mxu0 %v4088_v16  ;;  %3049 = vmatprep.subr.bf16.mxu1 %v4090_v17  ;;  %v376_v16 = vld [vmem:[#allocation5 + $0x8b0] sm:$0xff]  ;;  %v373_v17 = vld [vmem:[#allocation5 + $0x898] sm:$0xff] }
 0x192   :  { %v4152_v20 = vcombine.high %v372_v15, %v376_v16  ;;  %v4151_v28 = vcombine.low %v372_v15, %v376_v16  ;;  %v428_v10 = vld [vmem:[#allocation5 + $0xa50] sm:$0xff] }
 0x194   :  { %2886 = vmatpush1.bf16.msra.mxu0 %v4087_v21  ;;  %3050 = vmatpush1.bf16.msra.mxu1 %v4089_v23  ;;  %v4154_v21 = vcombine.high %v373_v17, %v377_v12  ;;  %v380_v23 = vld [vmem:[#allocation5 + $0x8d0] sm:$0xff] }
 0x195   :  { %2887 = vmatprep.subr.bf16.mxu0 %v4096_v24  ;;  %3051 = vmatprep.subr.bf16.mxu1 %v4098_v26  ;;  %v384_v24 = vld [vmem:[#allocation5 + $0x8f0] sm:$0xff]  ;;  %v381_v26 = vld [vmem:[#allocation5 + $0x8d8] sm:$0xff] }
 0x196   :  { %v4160_v22 = vcombine.high %v380_v23, %v384_v24  ;;  %v4162_v29 = vcombine.high %v381_v26, %v385_v27  ;;  %v4159_v36 = vcombine.low %v380_v23, %v384_v24  ;;  %v4161_v37 = vcombine.low %v381_v26, %v385_v27  ;;  %v444_v27 = vld [vmem:[#allocation5 + $0xad0] sm:$0xff] }
 0x198   :  { %2888 = vmatpush1.bf16.msra.mxu0 %v4095_v30  ;;  %3052 = vmatpush1.bf16.msra.mxu1 %v4097_v31  ;;  %v388_v30 = vld [vmem:[#allocation5 + $0x910] sm:$0xff] }
 0x199   :  { %2889 = vmatprep.subr.bf16.mxu0 %v4104_v33  ;;  %3053 = vmatprep.subr.bf16.mxu1 %v4106_v35  ;;  %v392_v31 = vld [vmem:[#allocation5 + $0x930] sm:$0xff]  ;;  %v389_v33 = vld [vmem:[#allocation5 + $0x918] sm:$0xff] }
 0x19a   :  { %v393_v35 = vld [vmem:[#allocation5 + $0x938] sm:$0xff]  ;;  %v4168_v38 = vcombine.high %v388_v30, %v392_v31 }
 0x19b   :  { %v4169_v45 = vcombine.low %v389_v33, %v393_v35 }
 0x19c   :  { %2890 = vmatpush1.bf16.msra.mxu0 %v4103_v40  ;;  %3054 = vmatpush1.bf16.msra.mxu1 %v4105_v41  ;;  %v400_v40 = vld [vmem:[#allocation5 + $0x970] sm:$0xff]  ;;  %v397_v41 = vld [vmem:[#allocation5 + $0x958] sm:$0xff] }
 0x19d   :  { %2891 = vmatprep.subr.bf16.mxu0 %v4112_v42  ;;  %3055 = vmatprep.subr.bf16.mxu1 %v4114_v44  ;;  %v401_v42 = vld [vmem:[#allocation5 + $0x978] sm:$0xff]  ;;  %v4167_v44 = vcombine.low %v388_v30, %v392_v31  ;;  %v4176_v46 = vcombine.high %v396_v39, %v400_v40 }
 0x19e   :  { %v4178_v48 = vcombine.high %v397_v41, %v401_v42  ;;  %v4177_v54 = vcombine.low %v397_v41, %v401_v42  ;;  %v460_v42 = vld [vmem:[#allocation5 + $0xb50] sm:$0xff] }
 0x1a0   :  { %2892 = vmatpush1.bf16.msra.mxu0 %v4111_v50  ;;  %3056 = vmatpush1.bf16.msra.mxu1 %v4113_v51  ;;  %v408_v50 = vld [vmem:[#allocation5 + $0x9b0] sm:$0xff]  ;;  %v405_v51 = vld [vmem:[#allocation5 + $0x998] sm:$0xff] }
 0x1a1   :  { %2893 = vmatprep.subr.bf16.mxu0 %v4120_v52  ;;  %3057 = vmatprep.subr.bf16.mxu1 %v4122_v53  ;;  %v409_v52 = vld [vmem:[#allocation5 + $0x9b8] sm:$0xff]  ;;  %v4175_v53 = vcombine.low %v396_v39, %v400_v40  ;;  %v4184_v55 = vcombine.high %v404_v49, %v408_v50 }
 0x1a2   :  { %v4186_v56 = vcombine.high %v405_v51, %v409_v52  ;;  %v4185_v63 = vcombine.low %v405_v51, %v409_v52  ;;  %v468_v52 = vld [vmem:[#allocation5 + $0xb90] sm:$0xff] }
 0x1a4   :  { %2894 = vmatpush1.bf16.msra.mxu0 %v4119_v59  ;;  %3058 = vmatpush1.bf16.msra.mxu1 %v4121_v60  ;;  %v416_v59 = vld [vmem:[#allocation5 + $0x9f0] sm:$0xff]  ;;  %v413_v60 = vld [vmem:[#allocation5 + $0x9d8] sm:$0xff] }
 0x1a5   :  { %2895 = vmatprep.subr.bf16.mxu0 %v4128_v61  ;;  %3059 = vmatprep.subr.bf16.mxu1 %v4130_v62  ;;  %v417_v61 = vld [vmem:[#allocation5 + $0x9f8] sm:$0xff]  ;;  %v4183_v62 = vcombine.low %v404_v49, %v408_v50  ;;  %v4192_v0 = vcombine.high %v412_v58, %v416_v59 }
 0x1a6   :  { %v4194_v1 = vcombine.high %v413_v60, %v417_v61  ;;  %v4193_v7 = vcombine.low %v413_v60, %v417_v61  ;;  %v476_v61 = vld [vmem:[#allocation5 + $0xbd0] sm:$0xff] }
 0x1a8   :  { %2896 = vmatpush1.bf16.msra.mxu0 %v4127_v3  ;;  %3060 = vmatpush1.bf16.msra.mxu1 %v4129_v4  ;;  %v424_v3 = vld [vmem:[#allocation5 + $0xa30] sm:$0xff]  ;;  %v421_v4 = vld [vmem:[#allocation5 + $0xa18] sm:$0xff] }
 0x1a9   :  { %2906 = vmatprep.subr.bf16.mxu0 %v4136_v5  ;;  %3070 = vmatprep.subr.bf16.mxu1 %v4138_v6  ;;  %v425_v5 = vld [vmem:[#allocation5 + $0xa38] sm:$0xff]  ;;  %v4191_v6 = vcombine.low %v412_v58, %v416_v59  ;;  %v4200_v8 = vcombine.high %v420_v2, %v424_v3 }
 0x1aa   :  { %v4202_v9 = vcombine.high %v421_v4, %v425_v5  ;;  %v4201_v15 = vcombine.low %v421_v4, %v425_v5  ;;  %v484_v5 = vld [vmem:[#allocation5 + $0xc10] sm:$0xff] }
 0x1ab   :  { %2898 = vmatmul.mubr.bf16.vlgmr.msra.gmra.mrb[4].mxu0 %v4812_v25  ;;  %3062 = vmatmul.mubr.bf16.vlgmr.msra.gmra.mrb[4].mxu1 %v4812_v25  ;;  %v4153_v25 = vcombine.low %v373_v17, %v377_v12  ;;  %v436_v12 = vld [vmem:[#allocation5 + $0xa90] sm:$0xff] }
 0x1ac   :  { %2907 = vmatpush1.bf16.msra.mxu0 %v4135_v11  ;;  %3071 = vmatpush1.bf16.msra.mxu1 %v4137_v13  ;;  %v432_v11 = vld [vmem:[#allocation5 + $0xa70] sm:$0xff]  ;;  %v429_v13 = vld [vmem:[#allocation5 + $0xa58] sm:$0xff] }
 0x1ad   :  { %2908 = vmatprep.subr.bf16.mxu0 %v4144_v14  ;;  %3072 = vmatprep.subr.bf16.mxu1 %v4146_v57  ;;  %v433_v14 = vld [vmem:[#allocation5 + $0xa78] sm:$0xff]  ;;  %v4199_v57 = vcombine.low %v420_v2, %v424_v3  ;;  %v4208_v16 = vcombine.high %v428_v10, %v432_v11 }
 0x1ae   :  { %2938 = vmatprep.mubr.bf16.mxu0 %v4814_v32  ;;  %3102 = vmatprep.mubr.bf16.mxu1 %v4814_v32  ;;  %v4170_v32 = vcombine.high %v389_v33, %v393_v35  ;;  %v4210_v17 = vcombine.high %v429_v13, %v433_v14  ;;  %v4209_v23 = vcombine.low %v429_v13, %v433_v14  ;;  %v452_v35 = vld [vmem:[#allocation5 + $0xb10] sm:$0xff] }
 0x1b0   :  { %2909 = vmatpush1.bf16.msra.mxu0 %v4143_v18  ;;  %3073 = vmatpush1.bf16.msra.mxu1 %v4145_v19  ;;  %v440_v18 = vld [vmem:[#allocation5 + $0xab0] sm:$0xff]  ;;  %v437_v19 = vld [vmem:[#allocation5 + $0xa98] sm:$0xff] }
 0x1b1   :  { %2910 = vmatprep.subr.bf16.mxu0 %v4152_v20  ;;  %3074 = vmatprep.subr.bf16.mxu1 %v4154_v21  ;;  %v441_v20 = vld [vmem:[#allocation5 + $0xab8] sm:$0xff]  ;;  %v4207_v21 = vcombine.low %v428_v10, %v432_v11  ;;  %v4216_v24 = vcombine.high %v436_v12, %v440_v18 }
 0x1b2   :  { %v4218_v26 = vcombine.high %v437_v19, %v441_v20  ;;  %v4217_v30 = vcombine.low %v437_v19, %v441_v20  ;;  %v4494_v19 = vld [vmem:[#allocation8 + $0x80] sm:$0xff]   ;;  %v4495_v20 = vld [vmem:[#allocation8 + $0x48] sm:$0xff]  }
 0x1b4   :  { %2911 = vmatpush1.bf16.msra.mxu0 %v4151_v28  ;;  %3075 = vmatpush1.bf16.msra.mxu1 %v4153_v25  ;;  %v448_v28 = vld [vmem:[#allocation5 + $0xaf0] sm:$0xff]  ;;  %v445_v25 = vld [vmem:[#allocation5 + $0xad8] sm:$0xff] }
 0x1b5   :  { %2912 = vmatprep.subr.bf16.mxu0 %v4160_v22  ;;  %3076 = vmatprep.subr.bf16.mxu1 %v4162_v29  ;;  %v449_v22 = vld [vmem:[#allocation5 + $0xaf8] sm:$0xff]  ;;  %v4215_v29 = vcombine.low %v436_v12, %v440_v18  ;;  %v4224_v31 = vcombine.high %v444_v27, %v448_v28  ;;  %v4493_v12 = vld [vmem:[#allocation8] sm:$0xff]  }
 0x1b6   :  { %v4226_v33 = vcombine.high %v445_v25, %v449_v22  ;;  %v4225_v39 = vcombine.low %v445_v25, %v449_v22  ;;  %v4501_v25 = vld [vmem:[#allocation8 + $0x10] sm:$0xff]  }
 0x1b8   :  { %2913 = vmatpush1.bf16.msra.mxu0 %v4159_v36  ;;  %3077 = vmatpush1.bf16.msra.mxu1 %v4161_v37  ;;  %v456_v36 = vld [vmem:[#allocation5 + $0xb30] sm:$0xff]  ;;  %v453_v37 = vld [vmem:[#allocation5 + $0xb18] sm:$0xff] }
 0x1b9   :  { %2914 = vmatprep.subr.bf16.mxu0 %v4168_v38  ;;  %3078 = vmatprep.subr.bf16.mxu1 %v4170_v32  ;;  %v457_v38 = vld [vmem:[#allocation5 + $0xb38] sm:$0xff]  ;;  %v4223_v32 = vcombine.low %v444_v27, %v448_v28  ;;  %v4232_v40 = vcombine.high %v452_v35, %v456_v36 }
 0x1ba   :  { %v4234_v41 = vcombine.high %v453_v37, %v457_v38  ;;  %v4233_v49 = vcombine.low %v453_v37, %v457_v38  ;;  %v4500_v28 = vld [vmem:[#allocation8 + $0xd0] sm:$0xff]  }
 0x1bc   :  { %2915 = vmatpush1.bf16.msra.mxu0 %v4167_v44  ;;  %3079 = vmatpush1.bf16.msra.mxu1 %v4169_v45  ;;  %v464_v44 = vld [vmem:[#allocation5 + $0xb70] sm:$0xff]  ;;  %v461_v45 = vld [vmem:[#allocation5 + $0xb58] sm:$0xff] }
 0x1bd   :  { %2916 = vmatprep.subr.bf16.mxu0 %v4176_v46  ;;  %3080 = vmatprep.subr.bf16.mxu1 %v4178_v48  ;;  %v465_v46 = vld [vmem:[#allocation5 + $0xb78] sm:$0xff]  ;;  %v4231_v48 = vcombine.low %v452_v35, %v456_v36  ;;  %v4240_v50 = vcombine.high %v460_v42, %v464_v44 }
 0x1be   :  { %v4242_v51 = vcombine.high %v461_v45, %v465_v46  ;;  %v4241_v58 = vcombine.low %v461_v45, %v465_v46  ;;  %v4507_v45 = vld [vmem:[#allocation8 + $0x60] sm:$0xff]  }
 0x1c0   :  { %2917 = vmatpush1.bf16.msra.mxu0 %v4175_v53  ;;  %3081 = vmatpush1.bf16.msra.mxu1 %v4177_v54  ;;  %v472_v53 = vld [vmem:[#allocation5 + $0xbb0] sm:$0xff]  ;;  %v469_v54 = vld [vmem:[#allocation5 + $0xb98] sm:$0xff] }
 0x1c1   :  { %2918 = vmatprep.subr.bf16.mxu0 %v4184_v55  ;;  %3082 = vmatprep.subr.bf16.mxu1 %v4186_v56  ;;  %v473_v55 = vld [vmem:[#allocation5 + $0xbb8] sm:$0xff]  ;;  %v4239_v56 = vcombine.low %v460_v42, %v464_v44  ;;  %v4248_v59 = vcombine.high %v468_v52, %v472_v53  ;;  %v4506_v44 = vld [vmem:[#allocation8 + $0x98] sm:$0xff]  }
 0x1c2   :  { %v4250_v60 = vcombine.high %v469_v54, %v473_v55  ;;  %v4249_v2 = vcombine.low %v469_v54, %v473_v55  ;;  %v4510_v55 = vld [vmem:[#allocation8 + $0xa0] sm:$0xff]  }
 0x1c4   :  { %2919 = vmatpush1.bf16.msra.mxu0 %v4183_v62  ;;  %3083 = vmatpush1.bf16.msra.mxu1 %v4185_v63  ;;  %v480_v62 = vld [vmem:[#allocation5 + $0xbf0] sm:$0xff]  ;;  %v477_v63 = vld [vmem:[#allocation5 + $0xbd8] sm:$0xff] }
 0x1c5   :  { %2920 = vmatprep.subr.bf16.mxu0 %v4192_v0  ;;  %3084 = vmatprep.subr.bf16.mxu1 %v4194_v1  ;;  %v481_v0 = vld [vmem:[#allocation5 + $0xbf8] sm:$0xff]  ;;  %v4247_v1 = vcombine.low %v468_v52, %v472_v53  ;;  %v4256_v3 = vcombine.high %v476_v61, %v480_v62  ;;  %v4509_v52 = vld [vmem:[#allocation8 + $0x20] sm:$0xff]  }
 0x1c6   :  { %v4258_v4 = vcombine.high %v477_v63, %v481_v0  ;;  %v4257_v10 = vcombine.low %v477_v63, %v481_v0  ;;  %v4515_v63 = vld [vmem:[#allocation8 + $0x70] sm:$0xff]  }
 0x1c8   :  { %2921 = vmatpush1.bf16.msra.mxu0 %v4191_v6  ;;  %3085 = vmatpush1.bf16.msra.mxu1 %v4193_v7  ;;  %v488_v6 = vld [vmem:[#allocation5 + $0xc30] sm:$0xff]  ;;  %v485_v7 = vld [vmem:[#allocation5 + $0xc18] sm:$0xff] }
 0x1c9   :  { %2922 = vmatprep.subr.bf16.mxu0 %v4200_v8  ;;  %3086 = vmatprep.subr.bf16.mxu1 %v4202_v9  ;;  %v489_v8 = vld [vmem:[#allocation5 + $0xc38] sm:$0xff]  ;;  %v4255_v9 = vcombine.low %v476_v61, %v480_v62  ;;  %v4264_v11 = vcombine.high %v484_v5, %v488_v6  ;;  %v4263_v14 = vcombine.low %v484_v5, %v488_v6  ;;  %v4514_v62 = vld [vmem:[#allocation8 + $0xa8] sm:$0xff]   ;;  %v4519_v5 = vld [vmem:[#allocation8 + $0x78] sm:$0xff]  }
 0x1ca   :  { %v4266_v13 = vcombine.high %v485_v7, %v489_v8 }
 0x1cc   :  { %2923 = vmatpush1.bf16.msra.mxu0 %v4199_v57  ;;  %3087 = vmatpush1.bf16.msra.mxu1 %v4201_v15  ;;  %v4265_v57 = vcombine.low %v485_v7, %v489_v8  ;;  %v4491_v15 = vld [vmem:[#allocation8 + $0x40] sm:$0xff]   ;;  %v4520_v7 = vld [vmem:[#allocation8 + $0xf8] sm:$0xff]  }
 0x1cd   :  { %2924 = vmatprep.subr.bf16.mxu0 %v4208_v16  ;;  %3088 = vmatprep.subr.bf16.mxu1 %v4210_v17  ;;  %v4492_v16 = vld [vmem:[#allocation8 + $0xc0] sm:$0xff]   ;;  %v492_v17 = vlaneseq  ;;  %v4521_v8 = vld [vmem:[#allocation8 + $0x38] sm:$0xff]  }
 0x1cf   :  { %v4846_v18 = vshrl.u32 %v492_v17, 7  ;;  %v4527_v17 = vld [vmem:[#allocation8 + $0x148] sm:$0xff]  }
 0x1d0   :  { %2925 = vmatpush1.bf16.msra.mxu0 %v4207_v21  ;;  %3089 = vmatpush1.bf16.msra.mxu1 %v4209_v23  ;;  %v4496_v21 = vld [vmem:[#allocation8 + $0xc8] sm:$0xff]  }
 0x1d1   :  { %2926 = vmatprep.subr.bf16.mxu0 %v4216_v24  ;;  %3090 = vmatprep.subr.bf16.mxu1 %v4218_v26  ;;  %v498_v23 = vsub.s32 1, %v4846_v18  ;;  %v4499_v24 = vld [vmem:[#allocation8 + $0x50] sm:$0xff]   ;;  %v4853_v26 = vld [vmem:[#allocation7] sm:$0xff]  ;;  %v506_v27 = vsub.s32 3, %v4846_v18  ;;  %v494_v53 = vsub.s32 0, %v4846_v18 }
 0x1d3   :  { %v499_v22 = vrot.slane %v4853_v26, %v498_v23  ;;  %v495_v61 = vrot.slane %v4853_v26, %v494_v53  ;;  %v4532_v23 = vld [vmem:[#allocation8 + $0x1d0] sm:$0xff]  }
 0x1d4   :  { %2927 = vmatpush1.bf16.msra.mxu0 %v4215_v29  ;;  %3091 = vmatpush1.bf16.msra.mxu1 %v4217_v30  ;;  %v507_v29 = vrot.slane %v4853_v26, %v506_v27  ;;  %v4503_v30 = vld [vmem:[#allocation8 + $0x58] sm:$0xff]  }
 0x1d5   :  { %2928 = vmatprep.subr.bf16.mxu0 %v4224_v31  ;;  %3092 = vmatprep.subr.bf16.mxu1 %v4226_v33  ;;  %v4504_v33 = vld [vmem:[#allocation8 + $0xd8] sm:$0xff]  }
 0x1d6   :  { %v4535_v27 = vld [vmem:[#allocation8 + $0x158] sm:$0xff]  }
 0x1d8   :  { %2929 = vmatpush1.bf16.msra.mxu0 %v4223_v32  ;;  %3093 = vmatpush1.bf16.msra.mxu1 %v4225_v39  ;;  %v4505_v39 = vld [vmem:[#allocation8 + $0x18] sm:$0xff]  }
 0x1d9   :  { %2930 = vmatprep.subr.bf16.mxu0 %v4232_v40  ;;  %3094 = vmatprep.subr.bf16.mxu1 %v4234_v41 }
 0x1dc   :  { %2931 = vmatpush1.bf16.msra.mxu0 %v4231_v48  ;;  %3095 = vmatpush1.bf16.msra.mxu1 %v4233_v49  ;;  %v4508_v49 = vld [vmem:[#allocation8 + $0xe0] sm:$0xff]  }
 0x1dd   :  { %2932 = vmatprep.subr.bf16.mxu0 %v4240_v50  ;;  %3096 = vmatprep.subr.bf16.mxu1 %v4242_v51 }
 0x1e0   :  { %2933 = vmatpush1.bf16.msra.mxu0 %v4239_v56  ;;  %3097 = vmatpush1.bf16.msra.mxu1 %v4241_v58  ;;  %v4511_v56 = vld [vmem:[#allocation8 + $0x68] sm:$0xff]   ;;  %v502_v58 = vsub.s32 2, %v4846_v18 }
 0x1e1   :  { %2934 = vmatprep.subr.bf16.mxu0 %v4248_v59  ;;  %3098 = vmatprep.subr.bf16.mxu1 %v4250_v60  ;;  %v4512_v59 = vld [vmem:[#allocation8 + $0xe8] sm:$0xff]  }
 0x1e2   :  { %v4513_v60 = vld [vmem:[#allocation8 + $0x28] sm:$0xff]   ;;  %v503_v0 = vrot.slane %v4853_v26, %v502_v58 }
 0x1e4   :  { %2935 = vmatpush1.bf16.msra.mxu0 %v4247_v1  ;;  %3099 = vmatpush1.bf16.msra.mxu1 %v4249_v2  ;;  %v4516_v1 = vld [vmem:[#allocation8 + $0xf0] sm:$0xff]  }
 0x1e5   :  { %2936 = vmatprep.subr.bf16.mxu0 %v4256_v3  ;;  %3100 = vmatprep.subr.bf16.mxu1 %v4258_v4  ;;  %v4517_v2 = vld [vmem:[#allocation8 + $0x30] sm:$0xff]  }
 0x1e6   :  { %v4518_v4 = vld [vmem:[#allocation8 + $0xb0] sm:$0xff]  }
 0x1e8   :  { %2937 = vmatpush1.bf16.msra.mxu0 %v4255_v9  ;;  %3101 = vmatpush1.bf16.msra.mxu1 %v4257_v10  ;;  %v4522_v10 = vld [vmem:[#allocation8 + $0xb8] sm:$0xff]  }
 0x1e9   :  { %2947 = vmatprep.subr.bf16.mxu0 %v4264_v11  ;;  %3111 = vmatprep.subr.bf16.mxu1 %v4266_v13  ;;  %v4523_v11 = vld [vmem:[#allocation8 + $0x140] sm:$0xff]  }
 0x1eb   :  { %2939 = vmatmul.mubr.bf16.vlgmr.msra.gmra.mrb[4].mxu0 %v4820_v34  ;;  %3103 = vmatmul.mubr.bf16.vlgmr.msra.gmra.mrb[4].mxu1 %v4820_v34  ;;  %v4497_v34 = vld [vmem:[#allocation8 + $0x8] sm:$0xff]  }
 0x1ec   :  { %2948 = vmatpush1.bf16.msra.mxu0 %v4263_v14  ;;  %3112 = vmatpush1.bf16.msra.mxu1 %v4265_v57  ;;  %v4524_v14 = vld [vmem:[#allocation8 + $0x1c0] sm:$0xff]  }
 0x1ed   :  { %2979 = vmatprep.mubr.bf16.mxu0 %v4708_v43  ;;  %3143 = vmatprep.mubr.bf16.mxu1 %v4708_v43  ;;  %v4498_v43 = vld [vmem:[#allocation8 + $0x88] sm:$0xff]   ;;  %v4525_v57 = vld [vmem:[#allocation8 + $0x100] sm:$0xff]  }
 0x1ee   :  { %4336 = vmatprep.subr.bf16.mxu0 %v4491_v15  ;;  %4358 = vmatprep.subr.bf16.mxu1 %v4492_v16  ;;  %v4526_v16 = vld [vmem:[#allocation8 + $0x180] sm:$0xff]  }
 0x1f7   :  { %4269 = vmatmul.mubr.msk.bf16.vlgmr.msra.gmra.mrb[4].mxu0 %vm2492_vm0, %v4826_v47  ;;  %4270 = vmatmul.mubr.msk.bf16.vlgmr.msra.gmra.mrb[4].mxu1 %vm2492_vm0, %v4826_v47  ;;  %v4502_v47 = vld [vmem:[#allocation8 + $0x90] sm:$0xff]  }
 0x1f8   :  { %4337 = vmatpush3.bf16.msra.mxu0 %v4493_v12  ;;  %4359 = vmatpush3.bf16.msra.mxu1 %v4494_v19  ;;  %v4528_v19 = vld [vmem:[#allocation8 + $0x1c8] sm:$0xff]  }
 0x1f9   :  { %4338 = vmatprep.subr.bf16.mxu0 %v4495_v20  ;;  %4360 = vmatprep.subr.bf16.mxu1 %v4496_v21  ;;  %v4529_v20 = vld [vmem:[#allocation8 + $0x108] sm:$0xff]  }
 0x1fa   :  { %v4530_v21 = vld [vmem:[#allocation8 + $0x188] sm:$0xff]  }
 0x1fc   :  { %4339 = vmatpush3.bf16.msra.mxu0 %v4497_v34  ;;  %4361 = vmatpush3.bf16.msra.mxu1 %v4498_v43  ;;  %v4531_v34 = vld [vmem:[#allocation8 + $0x150] sm:$0xff]  }
 0x1fd   :  { %4340 = vmatprep.subr.bf16.mxu0 %v4499_v24  ;;  %4362 = vmatprep.subr.bf16.mxu1 %v4500_v28  ;;  %v4533_v43 = vld [vmem:[#allocation8 + $0x110] sm:$0xff]   ;;  %v4536_v28 = vld [vmem:[#allocation8 + $0x1d8] sm:$0xff]  }
 0x1fe   :  { %v2653_v31 = vpop.f32.mrb[0].mxu0  ;;  %v2817_v35 = vpop.f32.mrb[0].mxu1  ;;  %v4534_v24 = vld [vmem:[#allocation8 + $0x190] sm:$0xff]  }
 0x1ff   :  { %v2655_v36 = vpop.f32.mrb[1].mxu0  ;;  %v2819_v38 = vpop.f32.mrb[1].mxu1  ;;  %v4424_v3 = vadd.f32 %v2653_v31, %v495_v61  ;;  %v4426_v6 = vadd.f32 %v2817_v35, %v503_v0  ;;  %v4542_v31 = vld [vmem:[#allocation8 + $0x1a0] sm:$0xff]   ;;  %v4544_v35 = vld [vmem:[#allocation8 + $0x1e8] sm:$0xff]  }
 0x200   :  { %4341 = vmatpush3.bf16.msra.mxu0 %v4501_v25  ;;  %v4425_v37 = vadd.f32 %v2655_v36, %v499_v22  ;;  %v2657_v32 = vpop.f32.mrb[2].mxu0  ;;  %4363 = vmatpush3.bf16.msra.mxu1 %v4502_v47  ;;  %v4427_v40 = vadd.f32 %v2819_v38, %v507_v29  ;;  %v2821_v41 = vpop.f32.mrb[2].mxu1  ;;  %v4537_v25 = vld [vmem:[#allocation8 + $0x118] sm:$0xff]   ;;  %v4539_v47 = vld [vmem:[#allocation8 + $0x160] sm:$0xff]   ;;  %v4545_v36 = vld [vmem:[#allocation8 + $0x128] sm:$0xff]  }
 0x201   :  { %v2658_v42 = vpop.f32.mrb[3].mxu0  ;;  %4342 = vmatprep.subr.bf16.mxu0 %v4503_v30  ;;  %v2822_v48 = vpop.f32.mrb[3].mxu1  ;;  %4364 = vmatprep.subr.bf16.mxu1 %v4504_v33  ;;  %v3152_v9 = vmax.f32 %v4424_v3, 0.0  ;;  %v3154_v13 = vmax.f32 %v4426_v6, 0.0  ;;  %v4538_v22 = vld [vmem:[#allocation8 + $0x198] sm:$0xff]   ;;  %v4540_v29 = vld [vmem:[#allocation8 + $0x1e0] sm:$0xff]  }
 0x202   :  { %v3153_v46 = vmax.f32 %v4425_v37, 0.0  ;;  %v3155_v50 = vmax.f32 %v4427_v40, 0.0  ;;  %v4541_v30 = vld [vmem:[#allocation8 + $0x120] sm:$0xff]   ;;  %v4543_v33 = vld [vmem:[#allocation8 + $0x168] sm:$0xff]   ;;  %v4547_v38 = vld [vmem:[#allocation8 + $0x170] sm:$0xff]   ;;  %v518_v48 = vsub.s32 6, %v4846_v18 }
 0x203   :  { %v3160_v15 = vpack.c.bf16 %v3152_v9, %v3152_v9  ;;  %v3162_v12 = vpack.c.bf16 %v3154_v13, %v3154_v13  ;;  %v4546_v37 = vld [vmem:[#allocation8 + $0x1a8] sm:$0xff]   ;;  %v4548_v32 = vld [vmem:[#allocation8 + $0x1f0] sm:$0xff]   ;;  %v4551_v41 = vld [vmem:[#allocation8 + $0x178] sm:$0xff]  }
 0x204   :  { %v3161_v51 = vpack.c.bf16 %v3153_v46, %v3153_v46  ;;  %4343 = vmatpush3.bf16.msra.mxu0 %v4505_v39  ;;  %v3163_v54 = vpack.c.bf16 %v3155_v50, %v3155_v50  ;;  %4365 = vmatpush3.bf16.msra.mxu1 %v4506_v44  ;;  %v4549_v39 = vld [vmem:[#allocation8 + $0x130] sm:$0xff]   ;;  %v4552_v42 = vld [vmem:[#allocation8 + $0x1f8] sm:$0xff]   ;;  %v510_v46 = vsub.s32 4, %v4846_v18  ;;  %v522_v50 = vsub.s32 7, %v4846_v18  ;;  %v4271_v13 = vld [vmem:[#allocation10] ss:$0 sm:$0xff] }
 0x205   :  { %4344 = vmatprep.subr.bf16.mxu0 %v4507_v45  ;;  %4366 = vmatprep.subr.bf16.mxu1 %v4508_v49  ;;  %v4550_v40 = vld [vmem:[#allocation8 + $0x1b0] sm:$0xff]   ;;  %v4553_v44 = vld [vmem:[#allocation8 + $0x138] sm:$0xff]   ;;  %v514_v49 = vsub.s32 5, %v4846_v18 }
 0x206   :  { %3719 = vmatprep.mubr.bf16.mxu0 %v3161_v51  ;;  %3759 = vmatprep.mubr.bf16.mxu1 %v3163_v54  ;;  %v4554_v45 = vld [vmem:[#allocation8 + $0x1b8] sm:$0xff]   ;;  %v511_v51 = vrot.slane %v4853_v26, %v510_v46  ;;  %v523_v54 = vrot.slane %v4853_v26, %v522_v50 }
 0x207   :  { %v515_v53 = vrot.slane %v4853_v26, %v514_v49 }
 0x208   :  { %4345 = vmatpush3.bf16.msra.mxu0 %v4509_v52  ;;  %4367 = vmatpush3.bf16.msra.mxu1 %v4510_v55  ;;  %v519_v52 = vrot.slane %v4853_v26, %v518_v48 }
 0x209   :  { %4346 = vmatprep.subr.bf16.mxu0 %v4511_v56  ;;  %4368 = vmatprep.subr.bf16.mxu1 %v4512_v59 }
 0x20c   :  { %4347 = vmatpush3.bf16.msra.mxu0 %v4513_v60  ;;  %4369 = vmatpush3.bf16.msra.mxu1 %v4514_v62 }
 0x20d   :  { %4348 = vmatprep.subr.bf16.mxu0 %v4515_v63  ;;  %4370 = vmatprep.subr.bf16.mxu1 %v4516_v1 }
 0x210   :  { %4349 = vmatpush3.bf16.msra.mxu0 %v4517_v2  ;;  %4371 = vmatpush3.bf16.msra.mxu1 %v4518_v4 }
 0x211   :  { %4350 = vmatprep.subr.bf16.mxu0 %v4519_v5  ;;  %4372 = vmatprep.subr.bf16.mxu1 %v4520_v7 }
 0x214   :  { %4351 = vmatpush3.bf16.msra.mxu0 %v4521_v8  ;;  %4373 = vmatpush3.bf16.msra.mxu1 %v4522_v10 }
 0x215   :  { %4380 = vmatprep.subr.bf16.mxu0 %v4523_v11  ;;  %4402 = vmatprep.subr.bf16.mxu1 %v4524_v14 }
 0x217   :  { %3720 = vmatmul.mubr.bf16.vlgmr.msra.gmra.mrb[8].mxu0 %v3160_v15  ;;  %3760 = vmatmul.mubr.bf16.vlgmr.msra.gmra.mrb[8].mxu1 %v3162_v12 }
 0x218   :  { %4381 = vmatpush3.bf16.msra.mxu0 %v4525_v57  ;;  %4403 = vmatpush3.bf16.msra.mxu1 %v4526_v16 }
 0x219   :  { %4382 = vmatprep.subr.bf16.mxu0 %v4527_v17  ;;  %4404 = vmatprep.subr.bf16.mxu1 %v4528_v19 }
 0x21c   :  { %4383 = vmatpush3.bf16.msra.mxu0 %v4529_v20  ;;  %4405 = vmatpush3.bf16.msra.mxu1 %v4530_v21 }
 0x21d   :  { %4384 = vmatprep.subr.bf16.mxu0 %v4531_v34  ;;  %4406 = vmatprep.subr.bf16.mxu1 %v4532_v23 }
 0x220   :  { %4385 = vmatpush3.bf16.msra.mxu0 %v4533_v43  ;;  %4407 = vmatpush3.bf16.msra.mxu1 %v4534_v24 }
 0x221   :  { %4386 = vmatprep.subr.bf16.mxu0 %v4535_v27  ;;  %4408 = vmatprep.subr.bf16.mxu1 %v4536_v28 }
 0x224   :  { %4387 = vmatpush3.bf16.msra.mxu0 %v4537_v25  ;;  %4409 = vmatpush3.bf16.msra.mxu1 %v4538_v22 }
 0x225   :  { %4388 = vmatprep.subr.bf16.mxu0 %v4539_v47  ;;  %4410 = vmatprep.subr.bf16.mxu1 %v4540_v29 }
 0x228   :  { %4389 = vmatpush3.bf16.msra.mxu0 %v4541_v30  ;;  %4411 = vmatpush3.bf16.msra.mxu1 %v4542_v31 }
 0x229   :  { %4390 = vmatprep.subr.bf16.mxu0 %v4543_v33  ;;  %4412 = vmatprep.subr.bf16.mxu1 %v4544_v35 }
 0x22c   :  { %4391 = vmatpush3.bf16.msra.mxu0 %v4545_v36  ;;  %4413 = vmatpush3.bf16.msra.mxu1 %v4546_v37 }
 0x22d   :  { %4392 = vmatprep.subr.bf16.mxu0 %v4547_v38  ;;  %4414 = vmatprep.subr.bf16.mxu1 %v4548_v32 }
 0x230   :  { %4393 = vmatpush3.bf16.msra.mxu0 %v4549_v39  ;;  %4415 = vmatpush3.bf16.msra.mxu1 %v4550_v40 }
 0x231   :  { %4394 = vmatprep.subr.bf16.mxu0 %v4551_v41  ;;  %4416 = vmatprep.subr.bf16.mxu1 %v4552_v42 }
 0x234   :  { %4395 = vmatpush3.bf16.msra.mxu0 %v4553_v44  ;;  %4417 = vmatpush3.bf16.msra.mxu1 %v4554_v45 }
 0x2ca   :  { %v2981_v55 = vpop.f32.mrb[4].mxu0  ;;  %v3145_v58 = vpop.f32.mrb[4].mxu1 }
 0x2cb   :  { %v4428_v56 = vadd.f32 %v2981_v55, %v511_v51  ;;  %v2983_v59 = vpop.f32.mrb[5].mxu0  ;;  %v4430_v60 = vadd.f32 %v3145_v58, %v519_v52  ;;  %v3147_v62 = vpop.f32.mrb[5].mxu1 }
 0x2cc   :  { %v4429_v61 = vadd.f32 %v2983_v59, %v515_v53  ;;  %v2985_v63 = vpop.f32.mrb[6].mxu0  ;;  %v4431_v1 = vadd.f32 %v3147_v62, %v523_v54  ;;  %v3149_v2 = vpop.f32.mrb[6].mxu1 }
 0x2cd   :  { %v3156_v0 = vmax.f32 %v4428_v56, 0.0  ;;  %v2986_v18 = vpop.f32.mrb[7].mxu0  ;;  %v3158_v3 = vmax.f32 %v4430_v60, 0.0  ;;  %v3150_v5 = vpop.f32.mrb[7].mxu1 }
 0x2ce   :  { %v3157_v4 = vmax.f32 %v4429_v61, 0.0  ;;  %v3159_v6 = vmax.f32 %v4431_v1, 0.0 }
 0x2cf   :  { %v3164_v8 = vpack.c.bf16 %v3156_v0, %v3156_v0  ;;  %v3166_v26 = vpack.c.bf16 %v3158_v3, %v3158_v3 }
 0x2d0   :  { %v3165_v7 = vpack.c.bf16 %v3157_v4, %v3157_v4  ;;  %v3167_v9 = vpack.c.bf16 %v3159_v6, %v3159_v6 }
 0x2d2   :  { %3799 = vmatprep.mubr.bf16.mxu0 %v3165_v7  ;;  %3839 = vmatprep.mubr.bf16.mxu1 %v3167_v9 }
 0x2d3   :  { %3800 = vmatmul.mubr.bf16.vlgmr.msra.gmra.mrb[12].mxu0 %v3164_v8  ;;  %3840 = vmatmul.mubr.bf16.vlgmr.msra.gmra.mrb[12].mxu1 %v3166_v26 }
 0x2ea   :  { %v4352_v10 = vpop.f32.mrb[8].mxu0  ;;  %v4374_v11 = vpop.f32.mrb[8].mxu1 }
 0x2eb   :  { %v4353_v14 = vpop.f32.mrb[9].mxu0  ;;  %v4375_v15 = vpop.f32.mrb[9].mxu1 }
 0x2ec   :  { %v4354_v57 = vadd.f32 %v4353_v14, %v4352_v10  ;;  %v4355_v16 = vpop.f32.mrb[10].mxu0  ;;  %v4376_v17 = vadd.f32 %v4375_v15, %v4374_v11  ;;  %v4377_v12 = vpop.f32.mrb[10].mxu1 }
 0x2ed   :  { %v4356_v19 = vpop.f32.mrb[11].mxu0  ;;  %v4378_v21 = vpop.f32.mrb[11].mxu1 }
 0x2ee   :  { %v3722_v20 = vadd.f32 %v4354_v57, %v4271_v13 }
 0x2f0   :  { %v3762_v34 = vadd.f32 %v4376_v17, %v3722_v20 }
 0x3a6   :  { %v4396_v23 = vpop.f32.mrb[12].mxu0  ;;  %v4418_v43 = vpop.f32.mrb[12].mxu1 }
 0x3a7   :  { %v4397_v24 = vpop.f32.mrb[13].mxu0  ;;  %v4419_v28 = vpop.f32.mrb[13].mxu1 }
 0x3a8   :  { %v4398_v27 = vadd.f32 %v4397_v24, %v4396_v23  ;;  %v4399_v25 = vpop.f32.mrb[14].mxu0  ;;  %v4420_v22 = vadd.f32 %v4419_v28, %v4418_v43  ;;  %v4421_v47 = vpop.f32.mrb[14].mxu1 }
 0x3a9   :  { %v4400_v29 = vpop.f32.mrb[15].mxu0  ;;  %v4422_v31 = vpop.f32.mrb[15].mxu1 }
 0x3aa   :  { %v3802_v30 = vadd.f32 %v4398_v27, %v3762_v34 }
 0x3ac   :  { %v3842_v33 = vadd.f32 %v4420_v22, %v3802_v30 }
 0x3ae   :  { %3847 = vmax.xlane.f32.xlu0 %v3842_v33 }
 0x43b   :  { %v3848_v35 = vpop.xlane.xlu0 %3847 }
 0x43c   :  { %v3849_v36 = vsub.f32 %v3842_v33, %v3848_v35 }
 0x43e   :  { %v3850_v37 = vmul.f32 1.442695, %v3849_v36 }
 0x440   :  { %4555 = vpow2.f32 %v3850_v37 }
 0x44a   :  { %v4556_v38 = vpop.eup %4555 }
 0x44b   :  { %3852 = vadd.xlane.f32.xlu0 %v4556_v38 }
 0x4d8   :  { %v3853_v32 = vpop.xlane.xlu0 %3852 }
 0x4d9   :  { %4557 = vlog2.f32 %v3853_v32 }
 0x4e3   :  { %v4558_v39 = vpop.eup %4557 }
 0x4e4   :  { %v3855_v40 = vmul.f32 0.6931472, %v4558_v39 }
 0x4e6   :  { %v3856_v41 = vsub.f32 %v3849_v36, %v3855_v40 }
 0x4e8   :  { %3857 = vst [vmem:[#allocation11] sm:$0xff] %v3856_v41 }
 0x4e9   :  { %4680 = shalt.err (!%p4677_p2)
}
 0x4ea   :  { %s4681_s6 = scalar_lea.hbm %s4887_s5, 128 }
 0x4eb   :  { %p4682_p3 = scmp.ne.s32.totalorder %s4887_s5, %s4681_s6  ;;  %p4685_p4 = scmp.lt.u32.totalorder %s4681_s6, %s4887_s5 }
 0x4ed   :  { %p4687_p5 = pnand %p4685_p4, %p4682_p3 }
 0x4ef   :  { %4690 = shalt.err (!%p4687_p5)
}
 0x4f0   :  { %3867 = dma.vmem_to_hbm [thread:$0]  %s3865_s28, 128, %s4887_s5, [#allocation4]  }
 0x4f1   :  { %4697 = dma.done.wait [#allocation4], 128  }
 0x4f2   :  { %4698 = vsyncadd [#allocation4], 4294967168 }
 0x4f3   :  { %3871 = vsyncpa [#allocation3], 1 }
 0x4f4   :  { %3872 = vsyncpa [#allocation6], 1 }
 0x4f5   :  { %3873 = vsyncpa [#allocation9], 1 }
 0x4f6   :  { %3874 = vsyncpa [#allocation4], 1 }

// kernel: tpu_custom_call.1
= control target key start
LH: loop header
LB: loop body
LE: loop exit
PB: predicated region body
PF: predicated region fallthrough
CT: control target
= control target key end

     0   :  { %10 = vsyncpa [#allocation3], 0  ;;  %s4882_s0 = inlined_call_operand.hbm [shape: f32[8,784], index: 0, kind: input, shape index: {}]   ;;  %s4883_s1 = inlined_call_operand.hbm [shape: bf16[784,1024], index: 1, kind: input, shape index: {}]   ;;  %s4884_s2 = inlined_call_operand.hbm [shape: f32[1,1024], index: 2, kind: input, shape index: {}]   ;;  %s4885_s3 = inlined_call_operand.hbm [shape: bf16[1024,128], index: 3, kind: input, shape index: {}]   ;;  %s4886_s4 = inlined_call_operand.hbm [shape: f32[1,128], index: 4, kind: input, shape index: {}]   ;;  %s4887_s5 = inlined_call_operand.hbm [shape: f32[8,128], index: 5, kind: output, shape index: {}]  }
   0x1   :  { %11 = vsyncpa [#allocation6], 0 }
   0x2   :  { %12 = vsyncpa [#allocation9], 0 }
   0x3   :  { %13 = vsyncpa [#allocation4], 0  ;;  %s4699_s18 = smov [#allocation5]   ;;  %s4559_s22 = scalar_lea.hbm %s4883_s1, 50176 }
   0x4   :  { %s29_s19 = sshll.u32 %s4699_s18, 4  ;;  %p4560_p0 = scmp.ne.s32.totalorder %s4883_s1, %s4559_s22  ;;  %s30_s19 = int_to_ptr.vmem [resolvable:$true] %s29_s19 }
   0x5   :  { %p4563_p1 = scmp.lt.u32.totalorder %s4559_s22, %s4883_s1 }
   0x7   :  { %p4565_p2 = pnand %p4563_p1, %p4560_p0 }
   0x9   :  { %4568 = shalt.err (!%p4565_p2)
}
   0xa   :  { %s4569_s27 = scalar_lea.vmem %s30_s19, 50176  ;;  %p4574_p4 = scmp.lt.s32.totalorder %s30_s19, %s30_s19 }
   0xb   :  { %p4570_p3 = scmp.ne.s32.totalorder %s30_s19, %s4569_s27  ;;  %p4575_p5 = scmp.lt.s32.totalorder %s4569_s27, %s4569_s27 }
   0xd   :  { %p4576_p6 = por %p4575_p5, %p4574_p4 }
   0xf   :  { %p4577_p7 = pnand %p4576_p6, %p4570_p3 }
  0x11   :  { %4580 = shalt.err (!%p4577_p7)
}
  0x12   :  { %s4700_s28 = smov 512   ;;  %s4701_s29 = smov 32  }
  0x13   :  { %35 = dma.hbm_to_vmem [thread:$0]  %s4883_s1, 50176, %s30_s19, [#allocation6], %s4700_s28, %s4700_s28, %s4701_s29  }
  0x14   :  { %s4702_s7 = smov [#allocation8]   ;;  %s4581_s11 = scalar_lea.hbm %s4885_s3, 8192 }
  0x15   :  { %s51_s8 = sshll.u32 %s4702_s7, 4  ;;  %p4582_p8 = scmp.ne.s32.totalorder %s4885_s3, %s4581_s11  ;;  %s52_s8 = int_to_ptr.vmem [resolvable:$true] %s51_s8 }
  0x16   :  { %p4585_p9 = scmp.lt.u32.totalorder %s4581_s11, %s4885_s3 }
  0x18   :  { %p4587_p10 = pnand %p4585_p9, %p4582_p8 }
  0x1a   :  { %4590 = shalt.err (!%p4587_p10)
}
  0x1b   :  { %s4591_s16 = scalar_lea.vmem %s52_s8, 8192  ;;  %p4596_p12 = scmp.lt.s32.totalorder %s52_s8, %s52_s8 }
  0x1c   :  { %p4592_p11 = scmp.ne.s32.totalorder %s52_s8, %s4591_s16  ;;  %p4597_p13 = scmp.lt.s32.totalorder %s4591_s16, %s4591_s16 }
  0x1e   :  { %p4598_p0 = por %p4597_p13, %p4596_p12 }
  0x20   :  { %p4599_p1 = pnand %p4598_p0, %p4592_p11 }
  0x22   :  { %4602 = shalt.err (!%p4599_p1)
}
  0x23   :  { %s4703_s1 = smov 64   ;;  %s4704_s17 = smov 4  }
  0x24   :  { %57 = dma.hbm_to_vmem [thread:$0]  %s4885_s3, 8192, %s52_s8, [#allocation9], %s4703_s1, %s4703_s1, %s4704_s17  }
  0x25   :  { %s4705_s20 = smov [#allocation2]   ;;  %s4706_s22 = smov [#allocation7]  }
  0x26   :  { %s20_s21 = sshll.u32 %s4705_s20, 4  ;;  %s42_s23 = sshll.u32 %s4706_s22, 4  ;;  %s21_s21 = int_to_ptr.vmem [resolvable:$true] %s20_s21  ;;  %s43_s23 = int_to_ptr.vmem [resolvable:$true] %s42_s23 }
  0x27   :  { %s4603_s26 = scalar_lea.hbm %s4882_s0, 896 }
  0x28   :  { %p4604_p2 = scmp.ne.s32.totalorder %s4882_s0, %s4603_s26  ;;  %p4607_p3 = scmp.lt.u32.totalorder %s4603_s26, %s4882_s0 }
  0x2a   :  { %p4609_p4 = pnand %p4607_p3, %p4604_p2 }
  0x2c   :  { %4612 = shalt.err (!%p4609_p4)
}
  0x2d   :  { %s4613_s3 = scalar_lea.vmem %s21_s21, 896  ;;  %p4618_p6 = scmp.lt.s32.totalorder %s21_s21, %s21_s21 }
  0x2e   :  { %p4614_p5 = scmp.ne.s32.totalorder %s21_s21, %s4613_s3  ;;  %p4619_p7 = scmp.lt.s32.totalorder %s4613_s3, %s4613_s3 }
  0x30   :  { %p4620_p8 = por %p4619_p7, %p4618_p6 }
  0x32   :  { %p4621_p9 = pnand %p4620_p8, %p4614_p5 }
  0x34   :  { %4624 = shalt.err (!%p4621_p9)
}
  0x35   :  { %23 = dma.hbm_to_vmem [thread:$0]  %s4882_s0, 896, %s21_s21, [#allocation3]  }
  0x36   :  { %s4625_s10 = scalar_lea.hbm %s4884_s2, 128 }
  0x37   :  { %p4626_p10 = scmp.ne.s32.totalorder %s4884_s2, %s4625_s10  ;;  %p4629_p11 = scmp.lt.u32.totalorder %s4625_s10, %s4884_s2 }
  0x39   :  { %p4631_p12 = pnand %p4629_p11, %p4626_p10 }
  0x3b   :  { %4634 = shalt.err (!%p4631_p12)
}
  0x3c   :  { %s4635_s15 = scalar_lea.vmem %s43_s23, 128  ;;  %p4640_p0 = scmp.lt.s32.totalorder %s43_s23, %s43_s23 }
  0x3d   :  { %p4636_p13 = scmp.ne.s32.totalorder %s43_s23, %s4635_s15  ;;  %p4641_p1 = scmp.lt.s32.totalorder %s4635_s15, %s4635_s15 }
  0x3f   :  { %p4642_p2 = por %p4641_p1, %p4640_p0 }
  0x41   :  { %p4643_p3 = pnand %p4642_p2, %p4636_p13 }
  0x43   :  { %4646 = shalt.err (!%p4643_p3)
}
  0x44   :  { %45 = dma.hbm_to_vmem [thread:$0]  %s4884_s2, 128, %s43_s23, [#allocation6]  }
  0x45   :  { %s4707_s1 = smov [#allocation10]   ;;  %s4647_s20 = scalar_lea.hbm %s4886_s4, 16 }
  0x46   :  { %s64_s17 = sshll.u32 %s4707_s1, 4  ;;  %p4648_p4 = scmp.ne.s32.totalorder %s4886_s4, %s4647_s20  ;;  %s65_s17 = int_to_ptr.vmem [resolvable:$true] %s64_s17 }
  0x47   :  { %p4651_p5 = scmp.lt.u32.totalorder %s4647_s20, %s4886_s4 }
  0x49   :  { %p4653_p6 = pnand %p4651_p5, %p4648_p4 }
  0x4b   :  { %4656 = shalt.err (!%p4653_p6)
}
  0x4c   :  { %s4657_s26 = scalar_lea.vmem %s65_s17, 16  ;;  %s4661_s2 = scalar_lea.vmem %s65_s17, 32 }
  0x4d   :  { %p4658_p7 = scmp.ne.s32.totalorder %s65_s17, %s4657_s26  ;;  %p4662_p8 = scmp.lt.s32.totalorder %s65_s17, %s65_s17 }
  0x4e   :  { %p4663_p9 = scmp.lt.s32.totalorder %s4661_s2, %s4657_s26 }
  0x50   :  { %p4664_p10 = por %p4663_p9, %p4662_p8 }
  0x52   :  { %p4665_p11 = pnand %p4664_p10, %p4658_p7 }
  0x54   :  { %4668 = shalt.err (!%p4665_p11)
}
  0x55   :  { %67 = dma.hbm_to_vmem [thread:$0]  %s4886_s4, 16, %s65_s17, [#allocation9]  }
  0x56   :  { %4691 = dma.done.wait [#allocation3], 896  }
  0x57   :  { %4692 = vsyncadd [#allocation3], 4294966400 }
  0x58   :  { %4693 = dma.done.wait [#allocation6], 50304  }
  0x59   :  { %4694 = vsyncadd [#allocation6], 4294916992 }
  0x5a   :  { %4695 = dma.done.wait [#allocation9], 8208  }
  0x5b   :  { %4696 = vsyncadd [#allocation9], 4294959088  ;;  %v98_v0 = vld [vmem:[#allocation5] sm:$0xff]  ;;  %v99_v2 = vld [vmem:[#allocation5 + $0x8] sm:$0xff]  ;;  %vm2492_vm0 = vcmask 130048   ;;  %s4709_s4 = smov [#allocation11]  }
  0x5c   :  { %v102_v1 = vld [vmem:[#allocation5 + $0x20] sm:$0xff]  ;;  %v103_v4 = vld [vmem:[#allocation5 + $0x28] sm:$0xff]  ;;  %v85_v53 = vld [vmem:[#allocation2 + $0x8] sm:$0xff]  ;;  %s3864_s28 = sshll.u32 %s4709_s4, 4  ;;  %s3865_s28 = int_to_ptr.vmem [resolvable:$true] %s3864_s28 }
  0x5d   :  { %v3876_v3 = vcombine.high %v98_v0, %v102_v1  ;;  %v3875_v5 = vcombine.low %v98_v0, %v102_v1  ;;  %v106_v6 = vld [vmem:[#allocation5 + $0x40] sm:$0xff]  ;;  %v3878_v8 = vcombine.high %v99_v2, %v103_v4  ;;  %v3877_v9 = vcombine.low %v99_v2, %v103_v4  ;;  %v107_v11 = vld [vmem:[#allocation5 + $0x48] sm:$0xff]  ;;  %s4669_s29 = scalar_lea.vmem %s3865_s28, 128  ;;  %p4674_p13 = scmp.lt.s32.totalorder %s3865_s28, %s3865_s28 }
  0x5e   :  { %v110_v7 = vld [vmem:[#allocation5 + $0x60] sm:$0xff]  ;;  %v111_v12 = vld [vmem:[#allocation5 + $0x68] sm:$0xff]  ;;  %v4800_v57 = vpack.c.bf16 %v85_v53, %v85_v53  ;;  %p4670_p12 = scmp.ne.s32.totalorder %s3865_s28, %s4669_s29  ;;  %p4675_p0 = scmp.lt.s32.totalorder %s4669_s29, %s4669_s29 }
  0x5f   :  { %v3884_v10 = vcombine.high %v106_v6, %v110_v7  ;;  %v114_v13 = vld [vmem:[#allocation5 + $0x80] sm:$0xff]  ;;  %2496 = vmatprep.subr.bf16.mxu0 %v3876_v3  ;;  %v3886_v14 = vcombine.high %v107_v11, %v111_v12  ;;  %v115_v16 = vld [vmem:[#allocation5 + $0x88] sm:$0xff]  ;;  %2660 = vmatprep.subr.bf16.mxu1 %v3878_v8  ;;  %v3883_v18 = vcombine.low %v106_v6, %v110_v7 }
  0x60   :  { %v118_v15 = vld [vmem:[#allocation5 + $0xa0] sm:$0xff]  ;;  %v119_v17 = vld [vmem:[#allocation5 + $0xa8] sm:$0xff]  ;;  %2497 = vmatpush1.bf16.msra.mxu0 %v3875_v5  ;;  %2661 = vmatpush1.bf16.msra.mxu1 %v3877_v9  ;;  %v3885_v19 = vcombine.low %v107_v11, %v111_v12  ;;  %p4676_p1 = por %p4675_p0, %p4674_p13 }
  0x61   :  { %2498 = vmatprep.subr.bf16.mxu0 %v3884_v10  ;;  %v3892_v20 = vcombine.high %v114_v13, %v118_v15  ;;  %2662 = vmatprep.subr.bf16.mxu1 %v3886_v14  ;;  %v3894_v21 = vcombine.high %v115_v16, %v119_v17  ;;  %v122_v22 = vld [vmem:[#allocation5 + $0xc0] sm:$0xff]  ;;  %v123_v24 = vld [vmem:[#allocation5 + $0xc8] sm:$0xff]  ;;  %v3891_v26 = vcombine.low %v114_v13, %v118_v15 }
  0x62   :  { %v126_v23 = vld [vmem:[#allocation5 + $0xe0] sm:$0xff]  ;;  %v127_v25 = vld [vmem:[#allocation5 + $0xe8] sm:$0xff]  ;;  %v3893_v27 = vcombine.low %v115_v16, %v119_v17  ;;  %2528 = vmatprep.mubr.bf16.mxu0 %v4800_v57  ;;  %2692 = vmatprep.mubr.bf16.mxu1 %v4800_v57  ;;  %p4677_p2 = pnand %p4676_p1, %p4670_p12 }
  0x63   :  { %v3900_v28 = vcombine.high %v122_v22, %v126_v23  ;;  %v3902_v29 = vcombine.high %v123_v24, %v127_v25  ;;  %v130_v30 = vld [vmem:[#allocation5 + $0x100] sm:$0xff]  ;;  %v131_v32 = vld [vmem:[#allocation5 + $0x108] sm:$0xff]  ;;  %v3899_v34 = vcombine.low %v122_v22, %v126_v23  ;;  %v3901_v35 = vcombine.low %v123_v24, %v127_v25 }
  0x64   :  { %2499 = vmatpush1.bf16.msra.mxu0 %v3883_v18  ;;  %2663 = vmatpush1.bf16.msra.mxu1 %v3885_v19  ;;  %v134_v31 = vld [vmem:[#allocation5 + $0x120] sm:$0xff]  ;;  %v135_v33 = vld [vmem:[#allocation5 + $0x128] sm:$0xff] }
  0x65   :  { %2500 = vmatprep.subr.bf16.mxu0 %v3892_v20  ;;  %2664 = vmatprep.subr.bf16.mxu1 %v3894_v21  ;;  %v3908_v36 = vcombine.high %v130_v30, %v134_v31  ;;  %v3910_v37 = vcombine.high %v131_v32, %v135_v33  ;;  %v138_v38 = vld [vmem:[#allocation5 + $0x140] sm:$0xff]  ;;  %v139_v40 = vld [vmem:[#allocation5 + $0x148] sm:$0xff]  ;;  %v3907_v42 = vcombine.low %v130_v30, %v134_v31 }
  0x66   :  { %v142_v39 = vld [vmem:[#allocation5 + $0x160] sm:$0xff]  ;;  %v143_v41 = vld [vmem:[#allocation5 + $0x168] sm:$0xff]  ;;  %v3909_v43 = vcombine.low %v131_v32, %v135_v33 }
  0x67   :  { %v3916_v44 = vcombine.high %v138_v38, %v142_v39  ;;  %v3918_v45 = vcombine.high %v139_v40, %v143_v41  ;;  %v146_v46 = vld [vmem:[#allocation5 + $0x180] sm:$0xff]  ;;  %v147_v48 = vld [vmem:[#allocation5 + $0x188] sm:$0xff]  ;;  %v3915_v50 = vcombine.low %v138_v38, %v142_v39  ;;  %v3917_v51 = vcombine.low %v139_v40, %v143_v41 }
  0x68   :  { %2501 = vmatpush1.bf16.msra.mxu0 %v3891_v26  ;;  %2665 = vmatpush1.bf16.msra.mxu1 %v3893_v27  ;;  %v150_v47 = vld [vmem:[#allocation5 + $0x1a0] sm:$0xff]  ;;  %v151_v49 = vld [vmem:[#allocation5 + $0x1a8] sm:$0xff] }
  0x69   :  { %2502 = vmatprep.subr.bf16.mxu0 %v3900_v28  ;;  %2666 = vmatprep.subr.bf16.mxu1 %v3902_v29  ;;  %v3924_v52 = vcombine.high %v146_v46, %v150_v47  ;;  %v3926_v54 = vcombine.high %v147_v48, %v151_v49  ;;  %v154_v55 = vld [vmem:[#allocation5 + $0x1c0] sm:$0xff]  ;;  %v155_v58 = vld [vmem:[#allocation5 + $0x1c8] sm:$0xff]  ;;  %v3923_v60 = vcombine.low %v146_v46, %v150_v47 }
  0x6a   :  { %v158_v56 = vld [vmem:[#allocation5 + $0x1e0] sm:$0xff]  ;;  %v159_v59 = vld [vmem:[#allocation5 + $0x1e8] sm:$0xff]  ;;  %v3925_v61 = vcombine.low %v147_v48, %v151_v49 }
  0x6b   :  { %v3932_v62 = vcombine.high %v154_v55, %v158_v56  ;;  %v3934_v63 = vcombine.high %v155_v58, %v159_v59  ;;  %v162_v0 = vld [vmem:[#allocation5 + $0x200] sm:$0xff]  ;;  %v163_v2 = vld [vmem:[#allocation5 + $0x208] sm:$0xff]  ;;  %v3931_v4 = vcombine.low %v154_v55, %v158_v56  ;;  %v3933_v5 = vcombine.low %v155_v58, %v159_v59 }
  0x6c   :  { %2503 = vmatpush1.bf16.msra.mxu0 %v3899_v34  ;;  %2667 = vmatpush1.bf16.msra.mxu1 %v3901_v35  ;;  %v166_v1 = vld [vmem:[#allocation5 + $0x220] sm:$0xff]  ;;  %v167_v3 = vld [vmem:[#allocation5 + $0x228] sm:$0xff] }
  0x6d   :  { %2504 = vmatprep.subr.bf16.mxu0 %v3908_v36  ;;  %2668 = vmatprep.subr.bf16.mxu1 %v3910_v37  ;;  %v3940_v6 = vcombine.high %v162_v0, %v166_v1  ;;  %v3942_v7 = vcombine.high %v163_v2, %v167_v3  ;;  %v170_v8 = vld [vmem:[#allocation5 + $0x240] sm:$0xff]  ;;  %v171_v10 = vld [vmem:[#allocation5 + $0x248] sm:$0xff]  ;;  %v3939_v12 = vcombine.low %v162_v0, %v166_v1 }
  0x6e   :  { %v174_v9 = vld [vmem:[#allocation5 + $0x260] sm:$0xff]  ;;  %v175_v11 = vld [vmem:[#allocation5 + $0x268] sm:$0xff]  ;;  %v3941_v13 = vcombine.low %v163_v2, %v167_v3 }
  0x6f   :  { %v3948_v14 = vcombine.high %v170_v8, %v174_v9  ;;  %v3950_v15 = vcombine.high %v171_v10, %v175_v11  ;;  %v178_v16 = vld [vmem:[#allocation5 + $0x280] sm:$0xff]  ;;  %v179_v18 = vld [vmem:[#allocation5 + $0x288] sm:$0xff]  ;;  %v3947_v20 = vcombine.low %v170_v8, %v174_v9  ;;  %v3949_v21 = vcombine.low %v171_v10, %v175_v11 }
  0x70   :  { %2505 = vmatpush1.bf16.msra.mxu0 %v3907_v42  ;;  %2669 = vmatpush1.bf16.msra.mxu1 %v3909_v43  ;;  %v182_v17 = vld [vmem:[#allocation5 + $0x2a0] sm:$0xff]  ;;  %v183_v19 = vld [vmem:[#allocation5 + $0x2a8] sm:$0xff] }
  0x71   :  { %2506 = vmatprep.subr.bf16.mxu0 %v3916_v44  ;;  %2670 = vmatprep.subr.bf16.mxu1 %v3918_v45  ;;  %v3956_v22 = vcombine.high %v178_v16, %v182_v17  ;;  %v3958_v23 = vcombine.high %v179_v18, %v183_v19  ;;  %v186_v24 = vld [vmem:[#allocation5 + $0x2c0] sm:$0xff]  ;;  %v187_v26 = vld [vmem:[#allocation5 + $0x2c8] sm:$0xff]  ;;  %v3955_v28 = vcombine.low %v178_v16, %v182_v17 }
  0x72   :  { %v190_v25 = vld [vmem:[#allocation5 + $0x2e0] sm:$0xff]  ;;  %v191_v27 = vld [vmem:[#allocation5 + $0x2e8] sm:$0xff]  ;;  %v3957_v29 = vcombine.low %v179_v18, %v183_v19 }
  0x73   :  { %v3964_v30 = vcombine.high %v186_v24, %v190_v25  ;;  %v3966_v31 = vcombine.high %v187_v26, %v191_v27  ;;  %v194_v32 = vld [vmem:[#allocation5 + $0x300] sm:$0xff]  ;;  %v195_v34 = vld [vmem:[#allocation5 + $0x308] sm:$0xff]  ;;  %v3963_v36 = vcombine.low %v186_v24, %v190_v25  ;;  %v3965_v37 = vcombine.low %v187_v26, %v191_v27 }
  0x74   :  { %2507 = vmatpush1.bf16.msra.mxu0 %v3915_v50  ;;  %2671 = vmatpush1.bf16.msra.mxu1 %v3917_v51  ;;  %v198_v33 = vld [vmem:[#allocation5 + $0x320] sm:$0xff]  ;;  %v199_v35 = vld [vmem:[#allocation5 + $0x328] sm:$0xff] }
  0x75   :  { %2508 = vmatprep.subr.bf16.mxu0 %v3924_v52  ;;  %2672 = vmatprep.subr.bf16.mxu1 %v3926_v54  ;;  %v3972_v38 = vcombine.high %v194_v32, %v198_v33  ;;  %v3974_v39 = vcombine.high %v195_v34, %v199_v35  ;;  %v202_v40 = vld [vmem:[#allocation5 + $0x340] sm:$0xff]  ;;  %v203_v42 = vld [vmem:[#allocation5 + $0x348] sm:$0xff]  ;;  %v3971_v44 = vcombine.low %v194_v32, %v198_v33 }
  0x76   :  { %v206_v41 = vld [vmem:[#allocation5 + $0x360] sm:$0xff]  ;;  %v207_v43 = vld [vmem:[#allocation5 + $0x368] sm:$0xff]  ;;  %v3973_v45 = vcombine.low %v195_v34, %v199_v35 }
  0x77   :  { %v3980_v46 = vcombine.high %v202_v40, %v206_v41  ;;  %v3982_v47 = vcombine.high %v203_v42, %v207_v43  ;;  %v210_v48 = vld [vmem:[#allocation5 + $0x380] sm:$0xff]  ;;  %v211_v50 = vld [vmem:[#allocation5 + $0x388] sm:$0xff]  ;;  %v3979_v52 = vcombine.low %v202_v40, %v206_v41  ;;  %v3981_v53 = vcombine.low %v203_v42, %v207_v43 }
  0x78   :  { %2509 = vmatpush1.bf16.msra.mxu0 %v3923_v60  ;;  %2673 = vmatpush1.bf16.msra.mxu1 %v3925_v61  ;;  %v214_v49 = vld [vmem:[#allocation5 + $0x3a0] sm:$0xff]  ;;  %v215_v51 = vld [vmem:[#allocation5 + $0x3a8] sm:$0xff] }
  0x79   :  { %2510 = vmatprep.subr.bf16.mxu0 %v3932_v62  ;;  %2674 = vmatprep.subr.bf16.mxu1 %v3934_v63  ;;  %v3988_v54 = vcombine.high %v210_v48, %v214_v49  ;;  %v3990_v55 = vcombine.high %v211_v50, %v215_v51  ;;  %v218_v56 = vld [vmem:[#allocation5 + $0x3c0] sm:$0xff]  ;;  %v219_v59 = vld [vmem:[#allocation5 + $0x3c8] sm:$0xff]  ;;  %v3987_v61 = vcombine.low %v210_v48, %v214_v49 }
  0x7a   :  { %v222_v58 = vld [vmem:[#allocation5 + $0x3e0] sm:$0xff]  ;;  %v223_v60 = vld [vmem:[#allocation5 + $0x3e8] sm:$0xff]  ;;  %v3989_v62 = vcombine.low %v211_v50, %v215_v51 }
  0x7b   :  { %v3996_v63 = vcombine.high %v218_v56, %v222_v58  ;;  %v3998_v0 = vcombine.high %v219_v59, %v223_v60  ;;  %v226_v1 = vld [vmem:[#allocation5 + $0x400] sm:$0xff]  ;;  %v227_v3 = vld [vmem:[#allocation5 + $0x408] sm:$0xff] }
  0x7c   :  { %2511 = vmatpush1.bf16.msra.mxu0 %v3931_v4  ;;  %2675 = vmatpush1.bf16.msra.mxu1 %v3933_v5  ;;  %v230_v2 = vld [vmem:[#allocation5 + $0x420] sm:$0xff]  ;;  %v231_v4 = vld [vmem:[#allocation5 + $0x428] sm:$0xff]  ;;  %v3995_v5 = vcombine.low %v218_v56, %v222_v58 }
  0x7d   :  { %2512 = vmatprep.subr.bf16.mxu0 %v3940_v6  ;;  %2676 = vmatprep.subr.bf16.mxu1 %v3942_v7  ;;  %v84_v6 = vld [vmem:[#allocation2] sm:$0xff]  ;;  %v3997_v7 = vcombine.low %v219_v59, %v223_v60  ;;  %v4004_v8 = vcombine.high %v226_v1, %v230_v2  ;;  %v4006_v9 = vcombine.high %v227_v3, %v231_v4  ;;  %v234_v10 = vld [vmem:[#allocation5 + $0x440] sm:$0xff] }
  0x7e   :  { %v238_v11 = vld [vmem:[#allocation5 + $0x460] sm:$0xff]  ;;  %v4003_v16 = vcombine.low %v226_v1, %v230_v2  ;;  %v4005_v17 = vcombine.low %v227_v3, %v231_v4  ;;  %v247_v24 = vld [vmem:[#allocation5 + $0x4a8] sm:$0xff] }
  0x7f   :  { %v4012_v18 = vcombine.high %v234_v10, %v238_v11  ;;  %v242_v19 = vld [vmem:[#allocation5 + $0x480] sm:$0xff]  ;;  %v4011_v25 = vcombine.low %v234_v10, %v238_v11  ;;  %v255_v32 = vld [vmem:[#allocation5 + $0x4e8] sm:$0xff] }
  0x80   :  { %2513 = vmatpush1.bf16.msra.mxu0 %v3939_v12  ;;  %2677 = vmatpush1.bf16.msra.mxu1 %v3941_v13  ;;  %v4804_v12 = vpack.c.bf16 %v84_v6, %v84_v6  ;;  %v235_v13 = vld [vmem:[#allocation5 + $0x448] sm:$0xff]  ;;  %v258_v34 = vld [vmem:[#allocation5 + $0x500] sm:$0xff] }
  0x81   :  { %2514 = vmatprep.subr.bf16.mxu0 %v3948_v14  ;;  %2678 = vmatprep.subr.bf16.mxu1 %v3950_v15  ;;  %v239_v14 = vld [vmem:[#allocation5 + $0x468] sm:$0xff]  ;;  %v87_v15 = vld [vmem:[#allocation2 + $0x18] sm:$0xff] }
  0x82   :  { %v4013_v26 = vcombine.low %v235_v13, %v239_v14  ;;  %v262_v35 = vld [vmem:[#allocation5 + $0x520] sm:$0xff]  ;;  %v279_v56 = vld [vmem:[#allocation5 + $0x5a8] sm:$0xff] }
  0x83   :  { %v266_v42 = vld [vmem:[#allocation5 + $0x540] sm:$0xff]  ;;  %v4035_v49 = vcombine.low %v258_v34, %v262_v35  ;;  %v287_v1 = vld [vmem:[#allocation5 + $0x5e8] sm:$0xff] }
  0x84   :  { %2515 = vmatpush1.bf16.msra.mxu0 %v3947_v20  ;;  %2679 = vmatpush1.bf16.msra.mxu1 %v3949_v21  ;;  %v246_v20 = vld [vmem:[#allocation5 + $0x4a0] sm:$0xff]  ;;  %v4014_v21 = vcombine.high %v235_v13, %v239_v14 }
  0x85   :  { %2516 = vmatprep.subr.bf16.mxu0 %v3956_v22  ;;  %2680 = vmatprep.subr.bf16.mxu1 %v3958_v23  ;;  %v4806_v22 = vpack.c.bf16 %v87_v15, %v87_v15  ;;  %v243_v23 = vld [vmem:[#allocation5 + $0x488] sm:$0xff]  ;;  %v4020_v27 = vcombine.high %v242_v19, %v246_v20  ;;  %v4019_v33 = vcombine.low %v242_v19, %v246_v20  ;;  %v270_v43 = vld [vmem:[#allocation5 + $0x560] sm:$0xff] }
  0x86   :  { %v4044_v51 = vcombine.high %v266_v42, %v270_v43  ;;  %v4043_v58 = vcombine.low %v266_v42, %v270_v43  ;;  %v294_v6 = vld [vmem:[#allocation5 + $0x620] sm:$0xff]  ;;  %v327_v43 = vld [vmem:[#allocation5 + $0x728] sm:$0xff] }
  0x87   :  { %v298_v14 = vld [vmem:[#allocation5 + $0x640] sm:$0xff] }
  0x88   :  { %2517 = vmatpush1.bf16.msra.mxu0 %v3955_v28  ;;  %2681 = vmatpush1.bf16.msra.mxu1 %v3957_v29  ;;  %v4022_v28 = vcombine.high %v243_v23, %v247_v24  ;;  %v250_v29 = vld [vmem:[#allocation5 + $0x4c0] sm:$0xff] }
  0x89   :  { %2518 = vmatprep.subr.bf16.mxu0 %v3964_v30  ;;  %2682 = vmatprep.subr.bf16.mxu1 %v3966_v31  ;;  %v254_v30 = vld [vmem:[#allocation5 + $0x4e0] sm:$0xff]  ;;  %v251_v31 = vld [vmem:[#allocation5 + $0x4c8] sm:$0xff] }
  0x8a   :  { %v4030_v40 = vcombine.high %v251_v31, %v255_v32  ;;  %v4027_v41 = vcombine.low %v250_v29, %v254_v30  ;;  %v302_v15 = vld [vmem:[#allocation5 + $0x660] sm:$0xff] }
  0x8c   :  { %2519 = vmatpush1.bf16.msra.mxu0 %v3963_v36  ;;  %2683 = vmatpush1.bf16.msra.mxu1 %v3965_v37  ;;  %v4021_v36 = vcombine.low %v243_v23, %v247_v24  ;;  %v4028_v37 = vcombine.high %v250_v29, %v254_v30  ;;  %v306_v23 = vld [vmem:[#allocation5 + $0x680] sm:$0xff] }
  0x8d   :  { %2520 = vmatprep.subr.bf16.mxu0 %v3972_v38  ;;  %2684 = vmatprep.subr.bf16.mxu1 %v3974_v39  ;;  %v259_v38 = vld [vmem:[#allocation5 + $0x508] sm:$0xff]  ;;  %v310_v24 = vld [vmem:[#allocation5 + $0x6a0] sm:$0xff] }
  0x8e   :  { %v263_v39 = vld [vmem:[#allocation5 + $0x528] sm:$0xff]  ;;  %v4084_v30 = vcombine.high %v306_v23, %v310_v24 }
  0x8f   :  { %v4038_v48 = vcombine.high %v259_v38, %v263_v39  ;;  %v4037_v50 = vcombine.low %v259_v38, %v263_v39  ;;  %v322_v39 = vld [vmem:[#allocation5 + $0x700] sm:$0xff] }
  0x90   :  { %2521 = vmatpush1.bf16.msra.mxu0 %v3971_v44  ;;  %2685 = vmatpush1.bf16.msra.mxu1 %v3973_v45  ;;  %v4029_v44 = vcombine.low %v251_v31, %v255_v32  ;;  %v4036_v45 = vcombine.high %v258_v34, %v262_v35  ;;  %v314_v31 = vld [vmem:[#allocation5 + $0x6c0] sm:$0xff]  ;;  %v319_v35 = vld [vmem:[#allocation5 + $0x6e8] sm:$0xff] }
  0x91   :  { %2522 = vmatprep.subr.bf16.mxu0 %v3980_v46  ;;  %2686 = vmatprep.subr.bf16.mxu1 %v3982_v47  ;;  %v267_v46 = vld [vmem:[#allocation5 + $0x548] sm:$0xff]  ;;  %v318_v32 = vld [vmem:[#allocation5 + $0x6e0] sm:$0xff] }
  0x92   :  { %v271_v47 = vld [vmem:[#allocation5 + $0x568] sm:$0xff]  ;;  %v4092_v38 = vcombine.high %v314_v31, %v318_v32 }
  0x93   :  { %v4045_v59 = vcombine.low %v267_v46, %v271_v47 }
  0x94   :  { %2523 = vmatpush1.bf16.msra.mxu0 %v3979_v52  ;;  %2687 = vmatpush1.bf16.msra.mxu1 %v3981_v53  ;;  %v274_v52 = vld [vmem:[#allocation5 + $0x580] sm:$0xff] }
  0x95   :  { %2524 = vmatprep.subr.bf16.mxu0 %v3988_v54  ;;  %2688 = vmatprep.subr.bf16.mxu1 %v3990_v55  ;;  %v278_v53 = vld [vmem:[#allocation5 + $0x5a0] sm:$0xff]  ;;  %v275_v54 = vld [vmem:[#allocation5 + $0x588] sm:$0xff]  ;;  %v4046_v55 = vcombine.high %v267_v46, %v271_v47 }
  0x96   :  { %v4052_v60 = vcombine.high %v274_v52, %v278_v53  ;;  %v4051_v2 = vcombine.low %v274_v52, %v278_v53  ;;  %v4053_v3 = vcombine.low %v275_v54, %v279_v56  ;;  %v330_v47 = vld [vmem:[#allocation5 + $0x740] sm:$0xff] }
  0x98   :  { %2525 = vmatpush1.bf16.msra.mxu0 %v3987_v61  ;;  %2689 = vmatpush1.bf16.msra.mxu1 %v3989_v62  ;;  %v282_v61 = vld [vmem:[#allocation5 + $0x5c0] sm:$0xff] }
  0x99   :  { %2526 = vmatprep.subr.bf16.mxu0 %v3996_v63  ;;  %2690 = vmatprep.subr.bf16.mxu1 %v3998_v0  ;;  %v286_v62 = vld [vmem:[#allocation5 + $0x5e0] sm:$0xff]  ;;  %v283_v63 = vld [vmem:[#allocation5 + $0x5c8] sm:$0xff]  ;;  %v4054_v0 = vcombine.high %v275_v54, %v279_v56 }
  0x9a   :  { %v4060_v4 = vcombine.high %v282_v61, %v286_v62  ;;  %v4059_v10 = vcombine.low %v282_v61, %v286_v62  ;;  %v4061_v11 = vcombine.low %v283_v63, %v287_v1  ;;  %v342_v56 = vld [vmem:[#allocation5 + $0x7a0] sm:$0xff] }
  0x9c   :  { %2527 = vmatpush1.bf16.msra.mxu0 %v3995_v5  ;;  %2691 = vmatpush1.bf16.msra.mxu1 %v3997_v7  ;;  %v290_v5 = vld [vmem:[#allocation5 + $0x600] sm:$0xff]  ;;  %v291_v7 = vld [vmem:[#allocation5 + $0x608] sm:$0xff] }
  0x9d   :  { %2537 = vmatprep.subr.bf16.mxu0 %v4004_v8  ;;  %2701 = vmatprep.subr.bf16.mxu1 %v4006_v9  ;;  %v4062_v8 = vcombine.high %v283_v63, %v287_v1  ;;  %v295_v9 = vld [vmem:[#allocation5 + $0x628] sm:$0xff]  ;;  %v4068_v13 = vcombine.high %v290_v5, %v294_v6  ;;  %v4067_v19 = vcombine.low %v290_v5, %v294_v6  ;;  %v350_v1 = vld [vmem:[#allocation5 + $0x7e0] sm:$0xff] }
  0x9e   :  { %v4069_v20 = vcombine.low %v291_v7, %v295_v9  ;;  %v354_v6 = vld [vmem:[#allocation5 + $0x800] sm:$0xff] }
  0x9f   :  { %2529 = vmatmul.mubr.bf16.vlgmr.msra.gmra.mrb[0].mxu0 %v4804_v12  ;;  %2693 = vmatmul.mubr.bf16.vlgmr.msra.gmra.mrb[0].mxu1 %v4804_v12 }
  0xa0   :  { %2538 = vmatpush1.bf16.msra.mxu0 %v4003_v16  ;;  %2702 = vmatpush1.bf16.msra.mxu1 %v4005_v17  ;;  %v299_v16 = vld [vmem:[#allocation5 + $0x648] sm:$0xff]  ;;  %v4070_v17 = vcombine.high %v291_v7, %v295_v9  ;;  %v358_v9 = vld [vmem:[#allocation5 + $0x820] sm:$0xff] }
  0xa1   :  { %2539 = vmatprep.subr.bf16.mxu0 %v4012_v18  ;;  %2703 = vmatprep.subr.bf16.mxu1 %v4014_v21  ;;  %v303_v18 = vld [vmem:[#allocation5 + $0x668] sm:$0xff]  ;;  %v4076_v21 = vcombine.high %v298_v14, %v302_v15 }
  0xa2   :  { %2569 = vmatprep.mubr.bf16.mxu0 %v4806_v22  ;;  %2733 = vmatprep.mubr.bf16.mxu1 %v4806_v22  ;;  %v4077_v29 = vcombine.low %v299_v16, %v303_v18 }
  0xa4   :  { %2540 = vmatpush1.bf16.msra.mxu0 %v4011_v25  ;;  %2704 = vmatpush1.bf16.msra.mxu1 %v4013_v26  ;;  %v307_v25 = vld [vmem:[#allocation5 + $0x688] sm:$0xff]  ;;  %v4078_v26 = vcombine.high %v299_v16, %v303_v18  ;;  %v362_v16 = vld [vmem:[#allocation5 + $0x840] sm:$0xff]  ;;  %v4132_v18 = vcombine.high %v354_v6, %v358_v9 }
  0xa5   :  { %2541 = vmatprep.subr.bf16.mxu0 %v4020_v27  ;;  %2705 = vmatprep.subr.bf16.mxu1 %v4022_v28  ;;  %v311_v27 = vld [vmem:[#allocation5 + $0x6a8] sm:$0xff]  ;;  %v4075_v28 = vcombine.low %v298_v14, %v302_v15  ;;  %v86_v14 = vld [vmem:[#allocation2 + $0x10] sm:$0xff] }
  0xa6   :  { %v4086_v34 = vcombine.high %v307_v25, %v311_v27 }
  0xa8   :  { %2542 = vmatpush1.bf16.msra.mxu0 %v4019_v33  ;;  %2706 = vmatpush1.bf16.msra.mxu1 %v4021_v36  ;;  %v315_v33 = vld [vmem:[#allocation5 + $0x6c8] sm:$0xff]  ;;  %v4083_v36 = vcombine.low %v306_v23, %v310_v24  ;;  %v89_v24 = vld [vmem:[#allocation2 + $0x28] sm:$0xff] }
  0xa9   :  { %2543 = vmatprep.subr.bf16.mxu0 %v4028_v37  ;;  %2707 = vmatprep.subr.bf16.mxu1 %v4030_v40  ;;  %v4085_v37 = vcombine.low %v307_v25, %v311_v27  ;;  %v326_v40 = vld [vmem:[#allocation5 + $0x720] sm:$0xff]  ;;  %v4094_v42 = vcombine.high %v315_v33, %v319_v35  ;;  %v4812_v25 = vpack.c.bf16 %v86_v14, %v86_v14 }
  0xaa   :  { %v4100_v46 = vcombine.high %v322_v39, %v326_v40  ;;  %v4099_v52 = vcombine.low %v322_v39, %v326_v40  ;;  %v378_v39 = vld [vmem:[#allocation5 + $0x8c0] sm:$0xff] }
  0xab   :  { %v382_v40 = vld [vmem:[#allocation5 + $0x8e0] sm:$0xff] }
  0xac   :  { %2544 = vmatpush1.bf16.msra.mxu0 %v4027_v41  ;;  %2708 = vmatpush1.bf16.msra.mxu1 %v4029_v44  ;;  %v323_v41 = vld [vmem:[#allocation5 + $0x708] sm:$0xff]  ;;  %v4091_v44 = vcombine.low %v314_v31, %v318_v32  ;;  %v374_v31 = vld [vmem:[#allocation5 + $0x8a0] sm:$0xff]  ;;  %v4814_v32 = vpack.c.bf16 %v89_v24, %v89_v24 }
  0xad   :  { %2545 = vmatprep.subr.bf16.mxu0 %v4036_v45  ;;  %2709 = vmatprep.subr.bf16.mxu1 %v4038_v48  ;;  %v4093_v45 = vcombine.low %v315_v33, %v319_v35  ;;  %v334_v48 = vld [vmem:[#allocation5 + $0x760] sm:$0xff]  ;;  %v4101_v53 = vcombine.low %v323_v41, %v327_v43  ;;  %v371_v33 = vld [vmem:[#allocation5 + $0x888] sm:$0xff] }
  0xae   :  { %v4108_v54 = vcombine.high %v330_v47, %v334_v48  ;;  %v4107_v61 = vcombine.low %v330_v47, %v334_v48  ;;  %v386_v47 = vld [vmem:[#allocation5 + $0x900] sm:$0xff] }
  0xaf   :  { %v390_v48 = vld [vmem:[#allocation5 + $0x920] sm:$0xff] }
  0xb0   :  { %2546 = vmatpush1.bf16.msra.mxu0 %v4035_v49  ;;  %2710 = vmatpush1.bf16.msra.mxu1 %v4037_v50  ;;  %v331_v49 = vld [vmem:[#allocation5 + $0x748] sm:$0xff]  ;;  %v4102_v50 = vcombine.high %v323_v41, %v327_v43 }
  0xb1   :  { %2547 = vmatprep.subr.bf16.mxu0 %v4044_v51  ;;  %2711 = vmatprep.subr.bf16.mxu1 %v4046_v55  ;;  %v335_v51 = vld [vmem:[#allocation5 + $0x768] sm:$0xff]  ;;  %v338_v55 = vld [vmem:[#allocation5 + $0x780] sm:$0xff] }
  0xb2   :  { %v4109_v62 = vcombine.low %v331_v49, %v335_v51  ;;  %v4116_v63 = vcombine.high %v338_v55, %v342_v56  ;;  %v4115_v5 = vcombine.low %v338_v55, %v342_v56  ;;  %v379_v41 = vld [vmem:[#allocation5 + $0x8c8] sm:$0xff]  ;;  %v394_v55 = vld [vmem:[#allocation5 + $0x940] sm:$0xff] }
  0xb3   :  { %v398_v56 = vld [vmem:[#allocation5 + $0x960] sm:$0xff] }
  0xb4   :  { %2548 = vmatpush1.bf16.msra.mxu0 %v4043_v58  ;;  %2712 = vmatpush1.bf16.msra.mxu1 %v4045_v59  ;;  %v339_v58 = vld [vmem:[#allocation5 + $0x788] sm:$0xff]  ;;  %v4110_v59 = vcombine.high %v331_v49, %v335_v51  ;;  %v4155_v51 = vcombine.low %v378_v39, %v382_v40 }
  0xb5   :  { %2549 = vmatprep.subr.bf16.mxu0 %v4052_v60  ;;  %2713 = vmatprep.subr.bf16.mxu1 %v4054_v0  ;;  %v343_v60 = vld [vmem:[#allocation5 + $0x7a8] sm:$0xff]  ;;  %v346_v0 = vld [vmem:[#allocation5 + $0x7c0] sm:$0xff] }
  0xb6   :  { %v4117_v7 = vcombine.low %v339_v58, %v343_v60  ;;  %v4123_v15 = vcombine.low %v346_v0, %v350_v1  ;;  %v387_v49 = vld [vmem:[#allocation5 + $0x908] sm:$0xff] }
  0xb8   :  { %2550 = vmatpush1.bf16.msra.mxu0 %v4051_v2  ;;  %2714 = vmatpush1.bf16.msra.mxu1 %v4053_v3  ;;  %v347_v2 = vld [vmem:[#allocation5 + $0x7c8] sm:$0xff]  ;;  %v4118_v3 = vcombine.high %v339_v58, %v343_v60  ;;  %v4163_v60 = vcombine.low %v386_v47, %v390_v48 }
  0xb9   :  { %2551 = vmatprep.subr.bf16.mxu0 %v4060_v4  ;;  %2715 = vmatprep.subr.bf16.mxu1 %v4062_v8  ;;  %v351_v4 = vld [vmem:[#allocation5 + $0x7e8] sm:$0xff]  ;;  %v4124_v8 = vcombine.high %v346_v0, %v350_v1  ;;  %v402_v0 = vld [vmem:[#allocation5 + $0x980] sm:$0xff] }
  0xba   :  { %v395_v58 = vld [vmem:[#allocation5 + $0x948] sm:$0xff]  ;;  %v406_v1 = vld [vmem:[#allocation5 + $0x9a0] sm:$0xff] }
  0xbc   :  { %2552 = vmatpush1.bf16.msra.mxu0 %v4059_v10  ;;  %2716 = vmatpush1.bf16.msra.mxu1 %v4061_v11  ;;  %v355_v10 = vld [vmem:[#allocation5 + $0x808] sm:$0xff] }
  0xbd   :  { %2553 = vmatprep.subr.bf16.mxu0 %v4068_v13  ;;  %2717 = vmatprep.subr.bf16.mxu1 %v4070_v17  ;;  %v359_v11 = vld [vmem:[#allocation5 + $0x828] sm:$0xff]  ;;  %v4126_v13 = vcombine.high %v347_v2, %v351_v4  ;;  %v4125_v17 = vcombine.low %v347_v2, %v351_v4  ;;  %v4171_v4 = vcombine.low %v394_v55, %v398_v56 }
  0xbe   :  { %v4134_v23 = vcombine.high %v355_v10, %v359_v11  ;;  %v4133_v27 = vcombine.low %v355_v10, %v359_v11  ;;  %v403_v2 = vld [vmem:[#allocation5 + $0x988] sm:$0xff] }
  0xbf   :  { %v411_v10 = vld [vmem:[#allocation5 + $0x9c8] sm:$0xff] }
  0xc0   :  { %2554 = vmatpush1.bf16.msra.mxu0 %v4067_v19  ;;  %2718 = vmatpush1.bf16.msra.mxu1 %v4069_v20  ;;  %v366_v19 = vld [vmem:[#allocation5 + $0x860] sm:$0xff]  ;;  %v363_v20 = vld [vmem:[#allocation5 + $0x848] sm:$0xff] }
  0xc1   :  { %2555 = vmatprep.subr.bf16.mxu0 %v4076_v21  ;;  %2719 = vmatprep.subr.bf16.mxu1 %v4078_v26  ;;  %v367_v21 = vld [vmem:[#allocation5 + $0x868] sm:$0xff]  ;;  %v4131_v26 = vcombine.low %v354_v6, %v358_v9  ;;  %v4139_v35 = vcombine.low %v362_v16, %v366_v19  ;;  %v4180_v6 = vcombine.high %v402_v0, %v406_v1  ;;  %v414_v9 = vld [vmem:[#allocation5 + $0x9e0] sm:$0xff] }
  0xc2   :  { %v415_v11 = vld [vmem:[#allocation5 + $0x9e8] sm:$0xff] }
  0xc4   :  { %2556 = vmatpush1.bf16.msra.mxu0 %v4075_v28  ;;  %2720 = vmatpush1.bf16.msra.mxu1 %v4077_v29  ;;  %v4140_v28 = vcombine.high %v362_v16, %v366_v19  ;;  %v4142_v29 = vcombine.high %v363_v20, %v367_v21  ;;  %v4190_v16 = vcombine.high %v411_v10, %v415_v11  ;;  %v419_v19 = vld [vmem:[#allocation5 + $0xa08] sm:$0xff] }
  0xc5   :  { %2557 = vmatprep.subr.bf16.mxu0 %v4084_v30  ;;  %2721 = vmatprep.subr.bf16.mxu1 %v4086_v34  ;;  %v370_v30 = vld [vmem:[#allocation5 + $0x880] sm:$0xff]  ;;  %v375_v34 = vld [vmem:[#allocation5 + $0x8a8] sm:$0xff] }
  0xc6   :  { %v4147_v43 = vcombine.low %v370_v30, %v374_v31 }
  0xc8   :  { %2558 = vmatpush1.bf16.msra.mxu0 %v4083_v36  ;;  %2722 = vmatpush1.bf16.msra.mxu1 %v4085_v37  ;;  %v4141_v36 = vcombine.low %v363_v20, %v367_v21  ;;  %v4148_v37 = vcombine.high %v370_v30, %v374_v31  ;;  %v423_v20 = vld [vmem:[#allocation5 + $0xa28] sm:$0xff] }
  0xc9   :  { %2559 = vmatprep.subr.bf16.mxu0 %v4092_v38  ;;  %2723 = vmatprep.subr.bf16.mxu1 %v4094_v42  ;;  %v4150_v38 = vcombine.high %v371_v33, %v375_v34  ;;  %v383_v42 = vld [vmem:[#allocation5 + $0x8e8] sm:$0xff] }
  0xca   :  { %v431_v30 = vld [vmem:[#allocation5 + $0xa68] sm:$0xff] }
  0xcc   :  { %2560 = vmatpush1.bf16.msra.mxu0 %v4091_v44  ;;  %2724 = vmatpush1.bf16.msra.mxu1 %v4093_v45  ;;  %v4149_v44 = vcombine.low %v371_v33, %v375_v34  ;;  %v4156_v45 = vcombine.high %v378_v39, %v382_v40  ;;  %v4197_v33 = vcombine.low %v419_v19, %v423_v20  ;;  %v439_v39 = vld [vmem:[#allocation5 + $0xaa8] sm:$0xff] }
  0xcd   :  { %2561 = vmatprep.subr.bf16.mxu0 %v4100_v46  ;;  %2725 = vmatprep.subr.bf16.mxu1 %v4102_v50  ;;  %v4158_v46 = vcombine.high %v379_v41, %v383_v42  ;;  %v391_v50 = vld [vmem:[#allocation5 + $0x928] sm:$0xff] }
  0xd0   :  { %2562 = vmatpush1.bf16.msra.mxu0 %v4099_v52  ;;  %2726 = vmatpush1.bf16.msra.mxu1 %v4101_v53  ;;  %v4157_v52 = vcombine.low %v379_v41, %v383_v42  ;;  %v4164_v53 = vcombine.high %v386_v47, %v390_v48  ;;  %v447_v47 = vld [vmem:[#allocation5 + $0xae8] sm:$0xff] }
  0xd1   :  { %2563 = vmatprep.subr.bf16.mxu0 %v4108_v54  ;;  %2727 = vmatprep.subr.bf16.mxu1 %v4110_v59  ;;  %v4166_v54 = vcombine.high %v387_v49, %v391_v50  ;;  %v399_v59 = vld [vmem:[#allocation5 + $0x968] sm:$0xff] }
  0xd4   :  { %2564 = vmatpush1.bf16.msra.mxu0 %v4107_v61  ;;  %2728 = vmatpush1.bf16.msra.mxu1 %v4109_v62  ;;  %v4165_v61 = vcombine.low %v387_v49, %v391_v50  ;;  %v4172_v62 = vcombine.high %v394_v55, %v398_v56  ;;  %v455_v55 = vld [vmem:[#allocation5 + $0xb28] sm:$0xff] }
  0xd5   :  { %2565 = vmatprep.subr.bf16.mxu0 %v4116_v63  ;;  %2729 = vmatprep.subr.bf16.mxu1 %v4118_v3  ;;  %v4174_v63 = vcombine.high %v395_v58, %v399_v59  ;;  %v407_v3 = vld [vmem:[#allocation5 + $0x9a8] sm:$0xff] }
  0xd6   :  { %v4181_v14 = vcombine.low %v403_v2, %v407_v3 }
  0xd8   :  { %2566 = vmatpush1.bf16.msra.mxu0 %v4115_v5  ;;  %2730 = vmatpush1.bf16.msra.mxu1 %v4117_v7  ;;  %v4173_v5 = vcombine.low %v395_v58, %v399_v59  ;;  %v4182_v7 = vcombine.high %v403_v2, %v407_v3 }
  0xd9   :  { %2567 = vmatprep.subr.bf16.mxu0 %v4124_v8  ;;  %2731 = vmatprep.subr.bf16.mxu1 %v4126_v13  ;;  %v410_v8 = vld [vmem:[#allocation5 + $0x9c0] sm:$0xff]  ;;  %v4179_v13 = vcombine.low %v402_v0, %v406_v1  ;;  %v463_v0 = vld [vmem:[#allocation5 + $0xb68] sm:$0xff] }
  0xda   :  { %v4187_v21 = vcombine.low %v410_v8, %v414_v9 }
  0xdc   :  { %2568 = vmatpush1.bf16.msra.mxu0 %v4123_v15  ;;  %2732 = vmatpush1.bf16.msra.mxu1 %v4125_v17  ;;  %v4188_v15 = vcombine.high %v410_v8, %v414_v9  ;;  %v418_v17 = vld [vmem:[#allocation5 + $0xa00] sm:$0xff]  ;;  %v471_v8 = vld [vmem:[#allocation5 + $0xba8] sm:$0xff] }
  0xdd   :  { %2578 = vmatprep.subr.bf16.mxu0 %v4132_v18  ;;  %2742 = vmatprep.subr.bf16.mxu1 %v4134_v23  ;;  %v422_v18 = vld [vmem:[#allocation5 + $0xa20] sm:$0xff]  ;;  %v4189_v23 = vcombine.low %v411_v10, %v415_v11 }
  0xde   :  { %v4196_v24 = vcombine.high %v418_v17, %v422_v18  ;;  %v4195_v31 = vcombine.low %v418_v17, %v422_v18  ;;  %v479_v17 = vld [vmem:[#allocation5 + $0xbe8] sm:$0xff] }
  0xdf   :  { %2570 = vmatmul.mubr.bf16.vlgmr.msra.gmra.mrb[0].mxu0 %v4812_v25  ;;  %2734 = vmatmul.mubr.bf16.vlgmr.msra.gmra.mrb[0].mxu1 %v4812_v25 }
  0xe0   :  { %2579 = vmatpush1.bf16.msra.mxu0 %v4131_v26  ;;  %2743 = vmatpush1.bf16.msra.mxu1 %v4133_v27  ;;  %v4198_v26 = vcombine.high %v419_v19, %v423_v20  ;;  %v426_v27 = vld [vmem:[#allocation5 + $0xa40] sm:$0xff] }
  0xe1   :  { %2580 = vmatprep.subr.bf16.mxu0 %v4140_v28  ;;  %2744 = vmatprep.subr.bf16.mxu1 %v4142_v29  ;;  %v430_v28 = vld [vmem:[#allocation5 + $0xa60] sm:$0xff]  ;;  %v427_v29 = vld [vmem:[#allocation5 + $0xa48] sm:$0xff] }
  0xe2   :  { %2610 = vmatprep.mubr.bf16.mxu0 %v4814_v32  ;;  %2774 = vmatprep.mubr.bf16.mxu1 %v4814_v32  ;;  %v4204_v34 = vcombine.high %v426_v27, %v430_v28  ;;  %v4203_v40 = vcombine.low %v426_v27, %v430_v28  ;;  %v4205_v41 = vcombine.low %v427_v29, %v431_v30  ;;  %v487_v27 = vld [vmem:[#allocation5 + $0xc28] sm:$0xff] }
  0xe4   :  { %2581 = vmatpush1.bf16.msra.mxu0 %v4139_v35  ;;  %2745 = vmatpush1.bf16.msra.mxu1 %v4141_v36  ;;  %v4206_v35 = vcombine.high %v427_v29, %v431_v30  ;;  %v434_v36 = vld [vmem:[#allocation5 + $0xa80] sm:$0xff]  ;;  %v88_v29 = vld [vmem:[#allocation2 + $0x20] sm:$0xff] }
  0xe5   :  { %2582 = vmatprep.subr.bf16.mxu0 %v4148_v37  ;;  %2746 = vmatprep.subr.bf16.mxu1 %v4150_v38  ;;  %v438_v37 = vld [vmem:[#allocation5 + $0xaa0] sm:$0xff]  ;;  %v435_v38 = vld [vmem:[#allocation5 + $0xa88] sm:$0xff] }
  0xe6   :  { %v4212_v42 = vcombine.high %v434_v36, %v438_v37  ;;  %v4211_v48 = vcombine.low %v434_v36, %v438_v37  ;;  %v4213_v49 = vcombine.low %v435_v38, %v439_v39  ;;  %v104_v36 = vld [vmem:[#allocation5 + $0x30] sm:$0xff] }
  0xe8   :  { %2583 = vmatpush1.bf16.msra.mxu0 %v4147_v43  ;;  %2747 = vmatpush1.bf16.msra.mxu1 %v4149_v44  ;;  %v4214_v43 = vcombine.high %v435_v38, %v439_v39  ;;  %v442_v44 = vld [vmem:[#allocation5 + $0xac0] sm:$0xff]  ;;  %v101_v38 = vld [vmem:[#allocation5 + $0x18] sm:$0xff] }
  0xe9   :  { %2584 = vmatprep.subr.bf16.mxu0 %v4156_v45  ;;  %2748 = vmatprep.subr.bf16.mxu1 %v4158_v46  ;;  %v446_v45 = vld [vmem:[#allocation5 + $0xae0] sm:$0xff]  ;;  %v443_v46 = vld [vmem:[#allocation5 + $0xac8] sm:$0xff]  ;;  %v105_v39 = vld [vmem:[#allocation5 + $0x38] sm:$0xff] }
  0xea   :  { %v4220_v50 = vcombine.high %v442_v44, %v446_v45  ;;  %v4219_v56 = vcombine.low %v442_v44, %v446_v45  ;;  %v4221_v58 = vcombine.low %v443_v46, %v447_v47  ;;  %v90_v44 = vld [vmem:[#allocation2 + $0x30] sm:$0xff]  ;;  %v108_v45 = vld [vmem:[#allocation5 + $0x50] sm:$0xff] }
  0xec   :  { %2585 = vmatpush1.bf16.msra.mxu0 %v4155_v51  ;;  %2749 = vmatpush1.bf16.msra.mxu1 %v4157_v52  ;;  %v4222_v51 = vcombine.high %v443_v46, %v447_v47  ;;  %v450_v52 = vld [vmem:[#allocation5 + $0xb00] sm:$0xff]  ;;  %v112_v46 = vld [vmem:[#allocation5 + $0x70] sm:$0xff]  ;;  %v4826_v47 = vpack.c.bf16 %v90_v44, %v90_v44 }
  0xed   :  { %2586 = vmatprep.subr.bf16.mxu0 %v4164_v53  ;;  %2750 = vmatprep.subr.bf16.mxu1 %v4166_v54  ;;  %v454_v53 = vld [vmem:[#allocation5 + $0xb20] sm:$0xff]  ;;  %v451_v54 = vld [vmem:[#allocation5 + $0xb08] sm:$0xff]  ;;  %v164_v44 = vld [vmem:[#allocation5 + $0x210] sm:$0xff] }
  0xee   :  { %v4228_v59 = vcombine.high %v450_v52, %v454_v53  ;;  %v4227_v1 = vcombine.low %v450_v52, %v454_v53  ;;  %v4229_v2 = vcombine.low %v451_v54, %v455_v55  ;;  %v3888_v52 = vcombine.high %v108_v45, %v112_v46 }
  0xf0   :  { %2587 = vmatpush1.bf16.msra.mxu0 %v4163_v60  ;;  %2751 = vmatpush1.bf16.msra.mxu1 %v4165_v61  ;;  %v4230_v60 = vcombine.high %v451_v54, %v455_v55  ;;  %v458_v61 = vld [vmem:[#allocation5 + $0xb40] sm:$0xff]  ;;  %v116_v54 = vld [vmem:[#allocation5 + $0x90] sm:$0xff] }
  0xf1   :  { %2588 = vmatprep.subr.bf16.mxu0 %v4172_v62  ;;  %2752 = vmatprep.subr.bf16.mxu1 %v4174_v63  ;;  %v462_v62 = vld [vmem:[#allocation5 + $0xb60] sm:$0xff]  ;;  %v459_v63 = vld [vmem:[#allocation5 + $0xb48] sm:$0xff]  ;;  %v120_v55 = vld [vmem:[#allocation5 + $0xb0] sm:$0xff] }
  0xf2   :  { %v4236_v3 = vcombine.high %v458_v61, %v462_v62  ;;  %v4235_v9 = vcombine.low %v458_v61, %v462_v62  ;;  %v4237_v10 = vcombine.low %v459_v63, %v463_v0  ;;  %v3896_v61 = vcombine.high %v116_v54, %v120_v55 }
  0xf4   :  { %2589 = vmatpush1.bf16.msra.mxu0 %v4171_v4  ;;  %2753 = vmatpush1.bf16.msra.mxu1 %v4173_v5  ;;  %v4238_v4 = vcombine.high %v459_v63, %v463_v0  ;;  %v466_v5 = vld [vmem:[#allocation5 + $0xb80] sm:$0xff]  ;;  %v124_v63 = vld [vmem:[#allocation5 + $0xd0] sm:$0xff] }
  0xf5   :  { %2590 = vmatprep.subr.bf16.mxu0 %v4180_v6  ;;  %2754 = vmatprep.subr.bf16.mxu1 %v4182_v7  ;;  %v470_v6 = vld [vmem:[#allocation5 + $0xba0] sm:$0xff]  ;;  %v467_v7 = vld [vmem:[#allocation5 + $0xb88] sm:$0xff]  ;;  %v128_v0 = vld [vmem:[#allocation5 + $0xf0] sm:$0xff] }
  0xf6   :  { %v4244_v11 = vcombine.high %v466_v5, %v470_v6  ;;  %v4243_v18 = vcombine.low %v466_v5, %v470_v6  ;;  %v4245_v19 = vcombine.low %v467_v7, %v471_v8  ;;  %v3904_v5 = vcombine.high %v124_v63, %v128_v0 }
  0xf8   :  { %2591 = vmatpush1.bf16.msra.mxu0 %v4179_v13  ;;  %2755 = vmatpush1.bf16.msra.mxu1 %v4181_v14  ;;  %v4246_v13 = vcombine.high %v467_v7, %v471_v8  ;;  %v474_v14 = vld [vmem:[#allocation5 + $0xbc0] sm:$0xff]  ;;  %v132_v7 = vld [vmem:[#allocation5 + $0x110] sm:$0xff] }
  0xf9   :  { %2592 = vmatprep.subr.bf16.mxu0 %v4188_v15  ;;  %2756 = vmatprep.subr.bf16.mxu1 %v4190_v16  ;;  %v478_v15 = vld [vmem:[#allocation5 + $0xbe0] sm:$0xff]  ;;  %v475_v16 = vld [vmem:[#allocation5 + $0xbc8] sm:$0xff]  ;;  %v136_v8 = vld [vmem:[#allocation5 + $0x130] sm:$0xff] }
  0xfa   :  { %v4252_v20 = vcombine.high %v474_v14, %v478_v15  ;;  %v4251_v28 = vcombine.low %v474_v14, %v478_v15  ;;  %v4253_v30 = vcombine.low %v475_v16, %v479_v17  ;;  %v3912_v14 = vcombine.high %v132_v7, %v136_v8  ;;  %v140_v15 = vld [vmem:[#allocation5 + $0x150] sm:$0xff] }
  0xfc   :  { %2593 = vmatpush1.bf16.msra.mxu0 %v4187_v21  ;;  %2757 = vmatpush1.bf16.msra.mxu1 %v4189_v23  ;;  %v4254_v21 = vcombine.high %v475_v16, %v479_v17  ;;  %v482_v23 = vld [vmem:[#allocation5 + $0xc00] sm:$0xff]  ;;  %v144_v16 = vld [vmem:[#allocation5 + $0x170] sm:$0xff]  ;;  %v141_v17 = vld [vmem:[#allocation5 + $0x158] sm:$0xff] }
  0xfd   :  { %2594 = vmatprep.subr.bf16.mxu0 %v4196_v24  ;;  %2758 = vmatprep.subr.bf16.mxu1 %v4198_v26  ;;  %v486_v24 = vld [vmem:[#allocation5 + $0xc20] sm:$0xff]  ;;  %v483_v26 = vld [vmem:[#allocation5 + $0xc08] sm:$0xff] }
  0xfe   :  { %v4259_v37 = vcombine.low %v482_v23, %v486_v24 }
 0x100   :  { %2595 = vmatpush1.bf16.msra.mxu0 %v4195_v31  ;;  %2759 = vmatpush1.bf16.msra.mxu1 %v4197_v33  ;;  %v4260_v31 = vcombine.high %v482_v23, %v486_v24  ;;  %v4262_v33 = vcombine.high %v483_v26, %v487_v27  ;;  %v148_v24 = vld [vmem:[#allocation5 + $0x190] sm:$0xff] }
 0x101   :  { %2596 = vmatprep.subr.bf16.mxu0 %v4204_v34  ;;  %2760 = vmatprep.subr.bf16.mxu1 %v4206_v35  ;;  %v4820_v34 = vpack.c.bf16 %v88_v29, %v88_v29  ;;  %v100_v35 = vld [vmem:[#allocation5 + $0x10] sm:$0xff]  ;;  %v3919_v29 = vcombine.low %v140_v15, %v144_v16 }
 0x104   :  { %2597 = vmatpush1.bf16.msra.mxu0 %v4203_v40  ;;  %2761 = vmatpush1.bf16.msra.mxu1 %v4205_v41  ;;  %v4261_v40 = vcombine.low %v483_v26, %v487_v27  ;;  %v3880_v41 = vcombine.high %v100_v35, %v104_v36  ;;  %v152_v26 = vld [vmem:[#allocation5 + $0x1b0] sm:$0xff]  ;;  %v149_v27 = vld [vmem:[#allocation5 + $0x198] sm:$0xff] }
 0x105   :  { %2598 = vmatprep.subr.bf16.mxu0 %v4212_v42  ;;  %2762 = vmatprep.subr.bf16.mxu1 %v4214_v43  ;;  %v3882_v42 = vcombine.high %v101_v38, %v105_v39  ;;  %v4708_v43 = vmov 0  }
 0x108   :  { %2599 = vmatpush1.bf16.msra.mxu0 %v4211_v48  ;;  %2763 = vmatpush1.bf16.msra.mxu1 %v4213_v49  ;;  %v109_v48 = vld [vmem:[#allocation5 + $0x58] sm:$0xff] }
 0x109   :  { %2600 = vmatprep.subr.bf16.mxu0 %v4220_v50  ;;  %2764 = vmatprep.subr.bf16.mxu1 %v4222_v51  ;;  %v113_v49 = vld [vmem:[#allocation5 + $0x78] sm:$0xff]  ;;  %v3879_v50 = vcombine.low %v100_v35, %v104_v36  ;;  %v3881_v51 = vcombine.low %v101_v38, %v105_v39  ;;  %v156_v35 = vld [vmem:[#allocation5 + $0x1d0] sm:$0xff]  ;;  %v3927_v39 = vcombine.low %v148_v24, %v152_v26 }
 0x10a   :  { %v3890_v53 = vcombine.high %v109_v48, %v113_v49  ;;  %v160_v36 = vld [vmem:[#allocation5 + $0x1f0] sm:$0xff]  ;;  %v161_v38 = vld [vmem:[#allocation5 + $0x1f8] sm:$0xff] }
 0x10c   :  { %2601 = vmatpush1.bf16.msra.mxu0 %v4219_v56  ;;  %2765 = vmatpush1.bf16.msra.mxu1 %v4221_v58  ;;  %v117_v56 = vld [vmem:[#allocation5 + $0x98] sm:$0xff] }
 0x10d   :  { %2602 = vmatprep.subr.bf16.mxu0 %v4228_v59  ;;  %2766 = vmatprep.subr.bf16.mxu1 %v4230_v60  ;;  %v121_v58 = vld [vmem:[#allocation5 + $0xb8] sm:$0xff]  ;;  %v3887_v59 = vcombine.low %v108_v45, %v112_v46  ;;  %v3889_v60 = vcombine.low %v109_v48, %v113_v49  ;;  %v168_v45 = vld [vmem:[#allocation5 + $0x230] sm:$0xff]  ;;  %v3935_v49 = vcombine.low %v156_v35, %v160_v36 }
 0x10e   :  { %v3898_v62 = vcombine.high %v117_v56, %v121_v58  ;;  %v165_v46 = vld [vmem:[#allocation5 + $0x218] sm:$0xff] }
 0x10f   :  { %v169_v48 = vld [vmem:[#allocation5 + $0x238] sm:$0xff] }
 0x110   :  { %2603 = vmatpush1.bf16.msra.mxu0 %v4227_v1  ;;  %2767 = vmatpush1.bf16.msra.mxu1 %v4229_v2  ;;  %v125_v1 = vld [vmem:[#allocation5 + $0xd8] sm:$0xff] }
 0x111   :  { %2604 = vmatprep.subr.bf16.mxu0 %v4236_v3  ;;  %2768 = vmatprep.subr.bf16.mxu1 %v4238_v4  ;;  %v129_v2 = vld [vmem:[#allocation5 + $0xf8] sm:$0xff]  ;;  %v3895_v3 = vcombine.low %v116_v54, %v120_v55  ;;  %v3897_v4 = vcombine.low %v117_v56, %v121_v58  ;;  %v176_v54 = vld [vmem:[#allocation5 + $0x270] sm:$0xff]  ;;  %v3943_v58 = vcombine.low %v164_v44, %v168_v45 }
 0x112   :  { %v3906_v6 = vcombine.high %v125_v1, %v129_v2  ;;  %v173_v55 = vld [vmem:[#allocation5 + $0x258] sm:$0xff] }
 0x113   :  { %v177_v56 = vld [vmem:[#allocation5 + $0x278] sm:$0xff] }
 0x114   :  { %2605 = vmatpush1.bf16.msra.mxu0 %v4235_v9  ;;  %2769 = vmatpush1.bf16.msra.mxu1 %v4237_v10  ;;  %v133_v9 = vld [vmem:[#allocation5 + $0x118] sm:$0xff] }
 0x115   :  { %2606 = vmatprep.subr.bf16.mxu0 %v4244_v11  ;;  %2770 = vmatprep.subr.bf16.mxu1 %v4246_v13  ;;  %v137_v10 = vld [vmem:[#allocation5 + $0x138] sm:$0xff]  ;;  %v3903_v11 = vcombine.low %v124_v63, %v128_v0  ;;  %v3905_v13 = vcombine.low %v125_v1, %v129_v2  ;;  %v184_v63 = vld [vmem:[#allocation5 + $0x2b0] sm:$0xff] }
 0x116   :  { %v181_v0 = vld [vmem:[#allocation5 + $0x298] sm:$0xff] }
 0x117   :  { %v185_v1 = vld [vmem:[#allocation5 + $0x2b8] sm:$0xff] }
 0x118   :  { %2607 = vmatpush1.bf16.msra.mxu0 %v4243_v18  ;;  %2771 = vmatpush1.bf16.msra.mxu1 %v4245_v19  ;;  %v145_v18 = vld [vmem:[#allocation5 + $0x178] sm:$0xff]  ;;  %v3911_v19 = vcombine.low %v132_v7, %v136_v8  ;;  %v192_v7 = vld [vmem:[#allocation5 + $0x2f0] sm:$0xff] }
 0x119   :  { %2608 = vmatprep.subr.bf16.mxu0 %v4252_v20  ;;  %2772 = vmatprep.subr.bf16.mxu1 %v4254_v21  ;;  %v3913_v20 = vcombine.low %v133_v9, %v137_v10  ;;  %v3920_v21 = vcombine.high %v140_v15, %v144_v16  ;;  %v3922_v23 = vcombine.high %v141_v17, %v145_v18  ;;  %v189_v8 = vld [vmem:[#allocation5 + $0x2d8] sm:$0xff]  ;;  %v200_v15 = vld [vmem:[#allocation5 + $0x330] sm:$0xff] }
 0x11a   :  { %v197_v16 = vld [vmem:[#allocation5 + $0x318] sm:$0xff] }
 0x11c   :  { %2609 = vmatpush1.bf16.msra.mxu0 %v4251_v28  ;;  %2773 = vmatpush1.bf16.msra.mxu1 %v4253_v30  ;;  %v153_v28 = vld [vmem:[#allocation5 + $0x1b8] sm:$0xff]  ;;  %v3921_v30 = vcombine.low %v141_v17, %v145_v18 }
 0x11d   :  { %2619 = vmatprep.subr.bf16.mxu0 %v4260_v31  ;;  %2783 = vmatprep.subr.bf16.mxu1 %v4262_v33  ;;  %v3928_v31 = vcombine.high %v148_v24, %v152_v26  ;;  %v3930_v33 = vcombine.high %v149_v27, %v153_v28  ;;  %v201_v17 = vld [vmem:[#allocation5 + $0x338] sm:$0xff]  ;;  %v208_v24 = vld [vmem:[#allocation5 + $0x370] sm:$0xff] }
 0x11e   :  { %v205_v26 = vld [vmem:[#allocation5 + $0x358] sm:$0xff] }
 0x11f   :  { %2611 = vmatmul.mubr.bf16.vlgmr.msra.gmra.mrb[0].mxu0 %v4820_v34  ;;  %2775 = vmatmul.mubr.bf16.vlgmr.msra.gmra.mrb[0].mxu1 %v4820_v34 }
 0x120   :  { %2620 = vmatpush1.bf16.msra.mxu0 %v4259_v37  ;;  %2784 = vmatpush1.bf16.msra.mxu1 %v4261_v40  ;;  %v157_v37 = vld [vmem:[#allocation5 + $0x1d8] sm:$0xff]  ;;  %v3929_v40 = vcombine.low %v149_v27, %v153_v28 }
 0x121   :  { %2651 = vmatprep.mubr.bf16.mxu0 %v4708_v43  ;;  %2815 = vmatprep.mubr.bf16.mxu1 %v4708_v43  ;;  %v209_v27 = vld [vmem:[#allocation5 + $0x378] sm:$0xff] }
 0x122   :  { %2824 = vmatprep.subr.bf16.mxu0 %v3880_v41  ;;  %2988 = vmatprep.subr.bf16.mxu1 %v3882_v42  ;;  %v3936_v41 = vcombine.high %v156_v35, %v160_v36  ;;  %v3938_v42 = vcombine.high %v157_v37, %v161_v38  ;;  %v216_v35 = vld [vmem:[#allocation5 + $0x3b0] sm:$0xff]  ;;  %v213_v36 = vld [vmem:[#allocation5 + $0x398] sm:$0xff] }
 0x12b   :  { %4267 = vmatmul.mubr.msk.bf16.vlgmr.msra.gmra.mrb[0].mxu0 %vm2492_vm0, %v4826_v47  ;;  %4268 = vmatmul.mubr.msk.bf16.vlgmr.msra.gmra.mrb[0].mxu1 %vm2492_vm0, %v4826_v47 }
 0x12c   :  { %2825 = vmatpush1.bf16.msra.mxu0 %v3879_v50  ;;  %2989 = vmatpush1.bf16.msra.mxu1 %v3881_v51  ;;  %v3937_v50 = vcombine.low %v157_v37, %v161_v38  ;;  %v3944_v51 = vcombine.high %v164_v44, %v168_v45  ;;  %v217_v37 = vld [vmem:[#allocation5 + $0x3b8] sm:$0xff]  ;;  %v224_v44 = vld [vmem:[#allocation5 + $0x3f0] sm:$0xff] }
 0x12d   :  { %2826 = vmatprep.subr.bf16.mxu0 %v3888_v52  ;;  %2990 = vmatprep.subr.bf16.mxu1 %v3890_v53  ;;  %v3946_v52 = vcombine.high %v165_v46, %v169_v48  ;;  %v172_v53 = vld [vmem:[#allocation5 + $0x250] sm:$0xff]  ;;  %v221_v45 = vld [vmem:[#allocation5 + $0x3d8] sm:$0xff] }
 0x12e   :  { %2856 = vmatprep.mubr.bf16.mxu0 %v4800_v57  ;;  %3020 = vmatprep.mubr.bf16.mxu1 %v4800_v57  ;;  %v3914_v57 = vcombine.high %v133_v9, %v137_v10  ;;  %v3951_v2 = vcombine.low %v172_v53, %v176_v54  ;;  %v193_v9 = vld [vmem:[#allocation5 + $0x2f8] sm:$0xff] }
 0x130   :  { %2827 = vmatpush1.bf16.msra.mxu0 %v3887_v59  ;;  %2991 = vmatpush1.bf16.msra.mxu1 %v3889_v60  ;;  %v3945_v59 = vcombine.low %v165_v46, %v169_v48  ;;  %v3952_v60 = vcombine.high %v172_v53, %v176_v54  ;;  %v225_v46 = vld [vmem:[#allocation5 + $0x3f8] sm:$0xff]  ;;  %v232_v53 = vld [vmem:[#allocation5 + $0x430] sm:$0xff] }
 0x131   :  { %2828 = vmatprep.subr.bf16.mxu0 %v3896_v61  ;;  %2992 = vmatprep.subr.bf16.mxu1 %v3898_v62  ;;  %v3954_v61 = vcombine.high %v173_v55, %v177_v56  ;;  %v180_v62 = vld [vmem:[#allocation5 + $0x290] sm:$0xff]  ;;  %v229_v54 = vld [vmem:[#allocation5 + $0x418] sm:$0xff] }
 0x132   :  { %v3959_v10 = vcombine.low %v180_v62, %v184_v63 }
 0x134   :  { %2829 = vmatpush1.bf16.msra.mxu0 %v3895_v3  ;;  %2993 = vmatpush1.bf16.msra.mxu1 %v3897_v4  ;;  %v3953_v3 = vcombine.low %v173_v55, %v177_v56  ;;  %v3960_v4 = vcombine.high %v180_v62, %v184_v63  ;;  %v233_v55 = vld [vmem:[#allocation5 + $0x438] sm:$0xff]  ;;  %v240_v62 = vld [vmem:[#allocation5 + $0x470] sm:$0xff] }
 0x135   :  { %2830 = vmatprep.subr.bf16.mxu0 %v3904_v5  ;;  %2994 = vmatprep.subr.bf16.mxu1 %v3906_v6  ;;  %v3962_v5 = vcombine.high %v181_v0, %v185_v1  ;;  %v188_v6 = vld [vmem:[#allocation5 + $0x2d0] sm:$0xff]  ;;  %v237_v63 = vld [vmem:[#allocation5 + $0x458] sm:$0xff] }
 0x136   :  { %v3967_v18 = vcombine.low %v188_v6, %v192_v7 }
 0x138   :  { %2831 = vmatpush1.bf16.msra.mxu0 %v3903_v11  ;;  %2995 = vmatpush1.bf16.msra.mxu1 %v3905_v13  ;;  %v3961_v11 = vcombine.low %v181_v0, %v185_v1  ;;  %v3968_v13 = vcombine.high %v188_v6, %v192_v7  ;;  %v241_v0 = vld [vmem:[#allocation5 + $0x478] sm:$0xff]  ;;  %v248_v6 = vld [vmem:[#allocation5 + $0x4b0] sm:$0xff] }
 0x139   :  { %2832 = vmatprep.subr.bf16.mxu0 %v3912_v14  ;;  %2996 = vmatprep.subr.bf16.mxu1 %v3914_v57  ;;  %v3970_v14 = vcombine.high %v189_v8, %v193_v9  ;;  %v196_v57 = vld [vmem:[#allocation5 + $0x310] sm:$0xff]  ;;  %v245_v7 = vld [vmem:[#allocation5 + $0x498] sm:$0xff] }
 0x13a   :  { %v3975_v28 = vcombine.low %v196_v57, %v200_v15 }
 0x13c   :  { %2833 = vmatpush1.bf16.msra.mxu0 %v3911_v19  ;;  %2997 = vmatpush1.bf16.msra.mxu1 %v3913_v20  ;;  %v3969_v19 = vcombine.low %v189_v8, %v193_v9  ;;  %v3976_v20 = vcombine.high %v196_v57, %v200_v15  ;;  %v249_v8 = vld [vmem:[#allocation5 + $0x4b8] sm:$0xff]  ;;  %v256_v57 = vld [vmem:[#allocation5 + $0x4f0] sm:$0xff] }
 0x13d   :  { %2834 = vmatprep.subr.bf16.mxu0 %v3920_v21  ;;  %2998 = vmatprep.subr.bf16.mxu1 %v3922_v23  ;;  %v3978_v21 = vcombine.high %v197_v16, %v201_v17  ;;  %v204_v23 = vld [vmem:[#allocation5 + $0x350] sm:$0xff]  ;;  %v253_v15 = vld [vmem:[#allocation5 + $0x4d8] sm:$0xff] }
 0x13e   :  { %v3983_v38 = vcombine.low %v204_v23, %v208_v24 }
 0x140   :  { %2835 = vmatpush1.bf16.msra.mxu0 %v3919_v29  ;;  %2999 = vmatpush1.bf16.msra.mxu1 %v3921_v30  ;;  %v3977_v29 = vcombine.low %v197_v16, %v201_v17  ;;  %v3984_v30 = vcombine.high %v204_v23, %v208_v24  ;;  %v257_v16 = vld [vmem:[#allocation5 + $0x4f8] sm:$0xff] }
 0x141   :  { %2836 = vmatprep.subr.bf16.mxu0 %v3928_v31  ;;  %3000 = vmatprep.subr.bf16.mxu1 %v3930_v33  ;;  %v3986_v31 = vcombine.high %v205_v26, %v209_v27  ;;  %v212_v33 = vld [vmem:[#allocation5 + $0x390] sm:$0xff]  ;;  %v261_v23 = vld [vmem:[#allocation5 + $0x518] sm:$0xff] }
 0x142   :  { %v3991_v48 = vcombine.low %v212_v33, %v216_v35  ;;  %v265_v24 = vld [vmem:[#allocation5 + $0x538] sm:$0xff] }
 0x144   :  { %2837 = vmatpush1.bf16.msra.mxu0 %v3927_v39  ;;  %3001 = vmatpush1.bf16.msra.mxu1 %v3929_v40  ;;  %v3985_v39 = vcombine.low %v205_v26, %v209_v27  ;;  %v3992_v40 = vcombine.high %v212_v33, %v216_v35  ;;  %v4033_v27 = vcombine.low %v253_v15, %v257_v16  ;;  %v273_v33 = vld [vmem:[#allocation5 + $0x578] sm:$0xff] }
 0x145   :  { %2838 = vmatprep.subr.bf16.mxu0 %v3936_v41  ;;  %3002 = vmatprep.subr.bf16.mxu1 %v3938_v42  ;;  %v3994_v41 = vcombine.high %v213_v36, %v217_v37  ;;  %v220_v42 = vld [vmem:[#allocation5 + $0x3d0] sm:$0xff] }
 0x146   :  { %v3999_v56 = vcombine.low %v220_v42, %v224_v44 }
 0x148   :  { %2839 = vmatpush1.bf16.msra.mxu0 %v3935_v49  ;;  %3003 = vmatpush1.bf16.msra.mxu1 %v3937_v50  ;;  %v3993_v49 = vcombine.low %v213_v36, %v217_v37  ;;  %v4000_v50 = vcombine.high %v220_v42, %v224_v44  ;;  %v4041_v36 = vcombine.low %v261_v23, %v265_v24  ;;  %v281_v42 = vld [vmem:[#allocation5 + $0x5b8] sm:$0xff] }
 0x149   :  { %2840 = vmatprep.subr.bf16.mxu0 %v3944_v51  ;;  %3004 = vmatprep.subr.bf16.mxu1 %v3946_v52  ;;  %v4002_v51 = vcombine.high %v221_v45, %v225_v46  ;;  %v228_v52 = vld [vmem:[#allocation5 + $0x410] sm:$0xff] }
 0x14a   :  { %v4007_v1 = vcombine.low %v228_v52, %v232_v53 }
 0x14c   :  { %2841 = vmatpush1.bf16.msra.mxu0 %v3943_v58  ;;  %3005 = vmatpush1.bf16.msra.mxu1 %v3945_v59  ;;  %v4001_v58 = vcombine.low %v221_v45, %v225_v46  ;;  %v4008_v59 = vcombine.high %v228_v52, %v232_v53  ;;  %v289_v52 = vld [vmem:[#allocation5 + $0x5f8] sm:$0xff] }
 0x14d   :  { %2842 = vmatprep.subr.bf16.mxu0 %v3952_v60  ;;  %3006 = vmatprep.subr.bf16.mxu1 %v3954_v61  ;;  %v4010_v60 = vcombine.high %v229_v54, %v233_v55  ;;  %v236_v61 = vld [vmem:[#allocation5 + $0x450] sm:$0xff] }
 0x14e   :  { %v4015_v9 = vcombine.low %v236_v61, %v240_v62 }
 0x150   :  { %2843 = vmatpush1.bf16.msra.mxu0 %v3951_v2  ;;  %3007 = vmatpush1.bf16.msra.mxu1 %v3953_v3  ;;  %v4009_v2 = vcombine.low %v229_v54, %v233_v55  ;;  %v4016_v3 = vcombine.high %v236_v61, %v240_v62  ;;  %v297_v61 = vld [vmem:[#allocation5 + $0x638] sm:$0xff] }
 0x151   :  { %2844 = vmatprep.subr.bf16.mxu0 %v3960_v4  ;;  %3008 = vmatprep.subr.bf16.mxu1 %v3962_v5  ;;  %v4018_v4 = vcombine.high %v237_v63, %v241_v0  ;;  %v244_v5 = vld [vmem:[#allocation5 + $0x490] sm:$0xff] }
 0x152   :  { %v4023_v17 = vcombine.low %v244_v5, %v248_v6 }
 0x154   :  { %2845 = vmatpush1.bf16.msra.mxu0 %v3959_v10  ;;  %3009 = vmatpush1.bf16.msra.mxu1 %v3961_v11  ;;  %v4017_v10 = vcombine.low %v237_v63, %v241_v0  ;;  %v4024_v11 = vcombine.high %v244_v5, %v248_v6  ;;  %v305_v5 = vld [vmem:[#allocation5 + $0x678] sm:$0xff] }
 0x155   :  { %2846 = vmatprep.subr.bf16.mxu0 %v3968_v13  ;;  %3010 = vmatprep.subr.bf16.mxu1 %v3970_v14  ;;  %v4026_v13 = vcombine.high %v245_v7, %v249_v8  ;;  %v252_v14 = vld [vmem:[#allocation5 + $0x4d0] sm:$0xff] }
 0x156   :  { %v4031_v26 = vcombine.low %v252_v14, %v256_v57 }
 0x158   :  { %2847 = vmatpush1.bf16.msra.mxu0 %v3967_v18  ;;  %3011 = vmatpush1.bf16.msra.mxu1 %v3969_v19  ;;  %v4032_v18 = vcombine.high %v252_v14, %v256_v57  ;;  %v4034_v19 = vcombine.high %v253_v15, %v257_v16  ;;  %v313_v14 = vld [vmem:[#allocation5 + $0x6b8] sm:$0xff] }
 0x159   :  { %2848 = vmatprep.subr.bf16.mxu0 %v3976_v20  ;;  %3012 = vmatprep.subr.bf16.mxu1 %v3978_v21  ;;  %v260_v20 = vld [vmem:[#allocation5 + $0x510] sm:$0xff] }
 0x15a   :  { %v264_v21 = vld [vmem:[#allocation5 + $0x530] sm:$0xff] }
 0x15b   :  { %v4039_v35 = vcombine.low %v260_v20, %v264_v21 }
 0x15c   :  { %2849 = vmatpush1.bf16.msra.mxu0 %v3975_v28  ;;  %3013 = vmatpush1.bf16.msra.mxu1 %v3977_v29  ;;  %v4040_v28 = vcombine.high %v260_v20, %v264_v21  ;;  %v268_v29 = vld [vmem:[#allocation5 + $0x550] sm:$0xff]  ;;  %v321_v20 = vld [vmem:[#allocation5 + $0x6f8] sm:$0xff] }
 0x15d   :  { %2850 = vmatprep.subr.bf16.mxu0 %v3984_v30  ;;  %3014 = vmatprep.subr.bf16.mxu1 %v3986_v31  ;;  %v272_v30 = vld [vmem:[#allocation5 + $0x570] sm:$0xff]  ;;  %v269_v31 = vld [vmem:[#allocation5 + $0x558] sm:$0xff] }
 0x15e   :  { %v4048_v37 = vcombine.high %v268_v29, %v272_v30  ;;  %v4047_v44 = vcombine.low %v268_v29, %v272_v30  ;;  %v4049_v45 = vcombine.low %v269_v31, %v273_v33  ;;  %v329_v29 = vld [vmem:[#allocation5 + $0x738] sm:$0xff] }
 0x160   :  { %2851 = vmatpush1.bf16.msra.mxu0 %v3983_v38  ;;  %3015 = vmatpush1.bf16.msra.mxu1 %v3985_v39  ;;  %v4050_v38 = vcombine.high %v269_v31, %v273_v33  ;;  %v276_v39 = vld [vmem:[#allocation5 + $0x590] sm:$0xff] }
 0x161   :  { %2852 = vmatprep.subr.bf16.mxu0 %v3992_v40  ;;  %3016 = vmatprep.subr.bf16.mxu1 %v3994_v41  ;;  %v280_v40 = vld [vmem:[#allocation5 + $0x5b0] sm:$0xff]  ;;  %v277_v41 = vld [vmem:[#allocation5 + $0x598] sm:$0xff] }
 0x162   :  { %v4056_v46 = vcombine.high %v276_v39, %v280_v40  ;;  %v4055_v53 = vcombine.low %v276_v39, %v280_v40  ;;  %v4057_v54 = vcombine.low %v277_v41, %v281_v42  ;;  %v337_v39 = vld [vmem:[#allocation5 + $0x778] sm:$0xff] }
 0x164   :  { %2853 = vmatpush1.bf16.msra.mxu0 %v3991_v48  ;;  %3017 = vmatpush1.bf16.msra.mxu1 %v3993_v49  ;;  %v4058_v48 = vcombine.high %v277_v41, %v281_v42  ;;  %v284_v49 = vld [vmem:[#allocation5 + $0x5d0] sm:$0xff] }
 0x165   :  { %2854 = vmatprep.subr.bf16.mxu0 %v4000_v50  ;;  %3018 = vmatprep.subr.bf16.mxu1 %v4002_v51  ;;  %v288_v50 = vld [vmem:[#allocation5 + $0x5f0] sm:$0xff]  ;;  %v285_v51 = vld [vmem:[#allocation5 + $0x5d8] sm:$0xff] }
 0x166   :  { %v4064_v55 = vcombine.high %v284_v49, %v288_v50  ;;  %v4063_v62 = vcombine.low %v284_v49, %v288_v50  ;;  %v4065_v63 = vcombine.low %v285_v51, %v289_v52  ;;  %v345_v49 = vld [vmem:[#allocation5 + $0x7b8] sm:$0xff] }
 0x168   :  { %2855 = vmatpush1.bf16.msra.mxu0 %v3999_v56  ;;  %3019 = vmatpush1.bf16.msra.mxu1 %v4001_v58  ;;  %v4066_v56 = vcombine.high %v285_v51, %v289_v52  ;;  %v292_v58 = vld [vmem:[#allocation5 + $0x610] sm:$0xff] }
 0x169   :  { %2865 = vmatprep.subr.bf16.mxu0 %v4008_v59  ;;  %3029 = vmatprep.subr.bf16.mxu1 %v4010_v60  ;;  %v296_v59 = vld [vmem:[#allocation5 + $0x630] sm:$0xff]  ;;  %v293_v60 = vld [vmem:[#allocation5 + $0x618] sm:$0xff] }
 0x16a   :  { %v4072_v0 = vcombine.high %v292_v58, %v296_v59  ;;  %v4071_v6 = vcombine.low %v292_v58, %v296_v59  ;;  %v353_v58 = vld [vmem:[#allocation5 + $0x7f8] sm:$0xff] }
 0x16b   :  { %2857 = vmatmul.mubr.bf16.vlgmr.msra.gmra.mrb[4].mxu0 %v4804_v12  ;;  %3021 = vmatmul.mubr.bf16.vlgmr.msra.gmra.mrb[4].mxu1 %v4804_v12  ;;  %v4025_v12 = vcombine.low %v245_v7, %v249_v8  ;;  %v4073_v7 = vcombine.low %v293_v60, %v297_v61 }
 0x16c   :  { %2866 = vmatpush1.bf16.msra.mxu0 %v4007_v1  ;;  %3030 = vmatpush1.bf16.msra.mxu1 %v4009_v2  ;;  %v4074_v1 = vcombine.high %v293_v60, %v297_v61  ;;  %v300_v2 = vld [vmem:[#allocation5 + $0x650] sm:$0xff] }
 0x16d   :  { %2867 = vmatprep.subr.bf16.mxu0 %v4016_v3  ;;  %3031 = vmatprep.subr.bf16.mxu1 %v4018_v4  ;;  %v304_v3 = vld [vmem:[#allocation5 + $0x670] sm:$0xff]  ;;  %v301_v4 = vld [vmem:[#allocation5 + $0x658] sm:$0xff] }
 0x16e   :  { %2897 = vmatprep.mubr.bf16.mxu0 %v4806_v22  ;;  %3061 = vmatprep.mubr.bf16.mxu1 %v4806_v22  ;;  %v4042_v22 = vcombine.high %v261_v23, %v265_v24  ;;  %v4080_v8 = vcombine.high %v300_v2, %v304_v3  ;;  %v4079_v57 = vcombine.low %v300_v2, %v304_v3  ;;  %v361_v2 = vld [vmem:[#allocation5 + $0x838] sm:$0xff] }
 0x16f   :  { %v4081_v15 = vcombine.low %v301_v4, %v305_v5 }
 0x170   :  { %2868 = vmatpush1.bf16.msra.mxu0 %v4015_v9  ;;  %3032 = vmatpush1.bf16.msra.mxu1 %v4017_v10  ;;  %v4082_v9 = vcombine.high %v301_v4, %v305_v5  ;;  %v308_v10 = vld [vmem:[#allocation5 + $0x690] sm:$0xff] }
 0x171   :  { %2869 = vmatprep.subr.bf16.mxu0 %v4024_v11  ;;  %3033 = vmatprep.subr.bf16.mxu1 %v4026_v13  ;;  %v312_v11 = vld [vmem:[#allocation5 + $0x6b0] sm:$0xff]  ;;  %v309_v13 = vld [vmem:[#allocation5 + $0x698] sm:$0xff] }
 0x172   :  { %v4088_v16 = vcombine.high %v308_v10, %v312_v11  ;;  %v4087_v21 = vcombine.low %v308_v10, %v312_v11  ;;  %v4089_v23 = vcombine.low %v309_v13, %v313_v14  ;;  %v369_v10 = vld [vmem:[#allocation5 + $0x878] sm:$0xff] }
 0x174   :  { %2870 = vmatpush1.bf16.msra.mxu0 %v4023_v17  ;;  %3034 = vmatpush1.bf16.msra.mxu1 %v4025_v12  ;;  %v4090_v17 = vcombine.high %v309_v13, %v313_v14  ;;  %v316_v12 = vld [vmem:[#allocation5 + $0x6d0] sm:$0xff] }
 0x175   :  { %2871 = vmatprep.subr.bf16.mxu0 %v4032_v18  ;;  %3035 = vmatprep.subr.bf16.mxu1 %v4034_v19  ;;  %v320_v18 = vld [vmem:[#allocation5 + $0x6f0] sm:$0xff]  ;;  %v317_v19 = vld [vmem:[#allocation5 + $0x6d8] sm:$0xff] }
 0x176   :  { %v4096_v24 = vcombine.high %v316_v12, %v320_v18  ;;  %v4095_v30 = vcombine.low %v316_v12, %v320_v18  ;;  %v4097_v31 = vcombine.low %v317_v19, %v321_v20  ;;  %v377_v12 = vld [vmem:[#allocation5 + $0x8b8] sm:$0xff] }
 0x178   :  { %2872 = vmatpush1.bf16.msra.mxu0 %v4031_v26  ;;  %3036 = vmatpush1.bf16.msra.mxu1 %v4033_v27  ;;  %v4098_v26 = vcombine.high %v317_v19, %v321_v20  ;;  %v324_v27 = vld [vmem:[#allocation5 + $0x710] sm:$0xff] }
 0x179   :  { %2873 = vmatprep.subr.bf16.mxu0 %v4040_v28  ;;  %3037 = vmatprep.subr.bf16.mxu1 %v4042_v22  ;;  %v328_v28 = vld [vmem:[#allocation5 + $0x730] sm:$0xff]  ;;  %v325_v22 = vld [vmem:[#allocation5 + $0x718] sm:$0xff] }
 0x17a   :  { %v4104_v33 = vcombine.high %v324_v27, %v328_v28  ;;  %v4103_v40 = vcombine.low %v324_v27, %v328_v28  ;;  %v4105_v41 = vcombine.low %v325_v22, %v329_v29  ;;  %v385_v27 = vld [vmem:[#allocation5 + $0x8f8] sm:$0xff] }
 0x17c   :  { %2874 = vmatpush1.bf16.msra.mxu0 %v4039_v35  ;;  %3038 = vmatpush1.bf16.msra.mxu1 %v4041_v36  ;;  %v4106_v35 = vcombine.high %v325_v22, %v329_v29  ;;  %v332_v36 = vld [vmem:[#allocation5 + $0x750] sm:$0xff] }
 0x17d   :  { %2875 = vmatprep.subr.bf16.mxu0 %v4048_v37  ;;  %3039 = vmatprep.subr.bf16.mxu1 %v4050_v38  ;;  %v336_v37 = vld [vmem:[#allocation5 + $0x770] sm:$0xff]  ;;  %v333_v38 = vld [vmem:[#allocation5 + $0x758] sm:$0xff] }
 0x17e   :  { %v4112_v42 = vcombine.high %v332_v36, %v336_v37  ;;  %v4111_v50 = vcombine.low %v332_v36, %v336_v37  ;;  %v4113_v51 = vcombine.low %v333_v38, %v337_v39 }
 0x180   :  { %2876 = vmatpush1.bf16.msra.mxu0 %v4047_v44  ;;  %3040 = vmatpush1.bf16.msra.mxu1 %v4049_v45  ;;  %v4114_v44 = vcombine.high %v333_v38, %v337_v39  ;;  %v340_v45 = vld [vmem:[#allocation5 + $0x790] sm:$0xff] }
 0x181   :  { %2877 = vmatprep.subr.bf16.mxu0 %v4056_v46  ;;  %3041 = vmatprep.subr.bf16.mxu1 %v4058_v48  ;;  %v344_v46 = vld [vmem:[#allocation5 + $0x7b0] sm:$0xff]  ;;  %v341_v48 = vld [vmem:[#allocation5 + $0x798] sm:$0xff] }
 0x182   :  { %v4120_v52 = vcombine.high %v340_v45, %v344_v46  ;;  %v4119_v59 = vcombine.low %v340_v45, %v344_v46  ;;  %v4121_v60 = vcombine.low %v341_v48, %v345_v49  ;;  %v396_v39 = vld [vmem:[#allocation5 + $0x950] sm:$0xff] }
 0x184   :  { %2878 = vmatpush1.bf16.msra.mxu0 %v4055_v53  ;;  %3042 = vmatpush1.bf16.msra.mxu1 %v4057_v54  ;;  %v4122_v53 = vcombine.high %v341_v48, %v345_v49  ;;  %v348_v54 = vld [vmem:[#allocation5 + $0x7d0] sm:$0xff] }
 0x185   :  { %2879 = vmatprep.subr.bf16.mxu0 %v4064_v55  ;;  %3043 = vmatprep.subr.bf16.mxu1 %v4066_v56  ;;  %v352_v55 = vld [vmem:[#allocation5 + $0x7f0] sm:$0xff]  ;;  %v349_v56 = vld [vmem:[#allocation5 + $0x7d8] sm:$0xff] }
 0x186   :  { %v4128_v61 = vcombine.high %v348_v54, %v352_v55  ;;  %v4127_v3 = vcombine.low %v348_v54, %v352_v55  ;;  %v4129_v4 = vcombine.low %v349_v56, %v353_v58  ;;  %v404_v49 = vld [vmem:[#allocation5 + $0x990] sm:$0xff] }
 0x188   :  { %2880 = vmatpush1.bf16.msra.mxu0 %v4063_v62  ;;  %3044 = vmatpush1.bf16.msra.mxu1 %v4065_v63  ;;  %v4130_v62 = vcombine.high %v349_v56, %v353_v58  ;;  %v356_v63 = vld [vmem:[#allocation5 + $0x810] sm:$0xff] }
 0x189   :  { %2881 = vmatprep.subr.bf16.mxu0 %v4072_v0  ;;  %3045 = vmatprep.subr.bf16.mxu1 %v4074_v1  ;;  %v360_v0 = vld [vmem:[#allocation5 + $0x830] sm:$0xff]  ;;  %v357_v1 = vld [vmem:[#allocation5 + $0x818] sm:$0xff] }
 0x18a   :  { %v4136_v5 = vcombine.high %v356_v63, %v360_v0  ;;  %v4135_v11 = vcombine.low %v356_v63, %v360_v0  ;;  %v4137_v13 = vcombine.low %v357_v1, %v361_v2  ;;  %v412_v58 = vld [vmem:[#allocation5 + $0x9d0] sm:$0xff] }
 0x18c   :  { %2882 = vmatpush1.bf16.msra.mxu0 %v4071_v6  ;;  %3046 = vmatpush1.bf16.msra.mxu1 %v4073_v7  ;;  %v4138_v6 = vcombine.high %v357_v1, %v361_v2  ;;  %v364_v7 = vld [vmem:[#allocation5 + $0x850] sm:$0xff] }
 0x18d   :  { %2883 = vmatprep.subr.bf16.mxu0 %v4080_v8  ;;  %3047 = vmatprep.subr.bf16.mxu1 %v4082_v9  ;;  %v368_v8 = vld [vmem:[#allocation5 + $0x870] sm:$0xff]  ;;  %v365_v9 = vld [vmem:[#allocation5 + $0x858] sm:$0xff] }
 0x18e   :  { %v4144_v14 = vcombine.high %v364_v7, %v368_v8  ;;  %v4143_v18 = vcombine.low %v364_v7, %v368_v8  ;;  %v4145_v19 = vcombine.low %v365_v9, %v369_v10  ;;  %v420_v2 = vld [vmem:[#allocation5 + $0xa10] sm:$0xff] }
 0x190   :  { %2884 = vmatpush1.bf16.msra.mxu0 %v4079_v57  ;;  %3048 = vmatpush1.bf16.msra.mxu1 %v4081_v15  ;;  %v4146_v57 = vcombine.high %v365_v9, %v369_v10  ;;  %v372_v15 = vld [vmem:[#allocation5 + $0x890] sm:$0xff] }
 0x191   :  { %2885 = vmatprep.subr.bf16.mxu0 %v4088_v16  ;;  %3049 = vmatprep.subr.bf16.mxu1 %v4090_v17  ;;  %v376_v16 = vld [vmem:[#allocation5 + $0x8b0] sm:$0xff]  ;;  %v373_v17 = vld [vmem:[#allocation5 + $0x898] sm:$0xff] }
 0x192   :  { %v4152_v20 = vcombine.high %v372_v15, %v376_v16  ;;  %v4151_v28 = vcombine.low %v372_v15, %v376_v16  ;;  %v428_v10 = vld [vmem:[#allocation5 + $0xa50] sm:$0xff] }
 0x194   :  { %2886 = vmatpush1.bf16.msra.mxu0 %v4087_v21  ;;  %3050 = vmatpush1.bf16.msra.mxu1 %v4089_v23  ;;  %v4154_v21 = vcombine.high %v373_v17, %v377_v12  ;;  %v380_v23 = vld [vmem:[#allocation5 + $0x8d0] sm:$0xff] }
 0x195   :  { %2887 = vmatprep.subr.bf16.mxu0 %v4096_v24  ;;  %3051 = vmatprep.subr.bf16.mxu1 %v4098_v26  ;;  %v384_v24 = vld [vmem:[#allocation5 + $0x8f0] sm:$0xff]  ;;  %v381_v26 = vld [vmem:[#allocation5 + $0x8d8] sm:$0xff] }
 0x196   :  { %v4160_v22 = vcombine.high %v380_v23, %v384_v24  ;;  %v4162_v29 = vcombine.high %v381_v26, %v385_v27  ;;  %v4159_v36 = vcombine.low %v380_v23, %v384_v24  ;;  %v4161_v37 = vcombine.low %v381_v26, %v385_v27  ;;  %v444_v27 = vld [vmem:[#allocation5 + $0xad0] sm:$0xff] }
 0x198   :  { %2888 = vmatpush1.bf16.msra.mxu0 %v4095_v30  ;;  %3052 = vmatpush1.bf16.msra.mxu1 %v4097_v31  ;;  %v388_v30 = vld [vmem:[#allocation5 + $0x910] sm:$0xff] }
 0x199   :  { %2889 = vmatprep.subr.bf16.mxu0 %v4104_v33  ;;  %3053 = vmatprep.subr.bf16.mxu1 %v4106_v35  ;;  %v392_v31 = vld [vmem:[#allocation5 + $0x930] sm:$0xff]  ;;  %v389_v33 = vld [vmem:[#allocation5 + $0x918] sm:$0xff] }
 0x19a   :  { %v393_v35 = vld [vmem:[#allocation5 + $0x938] sm:$0xff]  ;;  %v4168_v38 = vcombine.high %v388_v30, %v392_v31 }
 0x19b   :  { %v4169_v45 = vcombine.low %v389_v33, %v393_v35 }
 0x19c   :  { %2890 = vmatpush1.bf16.msra.mxu0 %v4103_v40  ;;  %3054 = vmatpush1.bf16.msra.mxu1 %v4105_v41  ;;  %v400_v40 = vld [vmem:[#allocation5 + $0x970] sm:$0xff]  ;;  %v397_v41 = vld [vmem:[#allocation5 + $0x958] sm:$0xff] }
 0x19d   :  { %2891 = vmatprep.subr.bf16.mxu0 %v4112_v42  ;;  %3055 = vmatprep.subr.bf16.mxu1 %v4114_v44  ;;  %v401_v42 = vld [vmem:[#allocation5 + $0x978] sm:$0xff]  ;;  %v4167_v44 = vcombine.low %v388_v30, %v392_v31  ;;  %v4176_v46 = vcombine.high %v396_v39, %v400_v40 }
 0x19e   :  { %v4178_v48 = vcombine.high %v397_v41, %v401_v42  ;;  %v4177_v54 = vcombine.low %v397_v41, %v401_v42  ;;  %v460_v42 = vld [vmem:[#allocation5 + $0xb50] sm:$0xff] }
 0x1a0   :  { %2892 = vmatpush1.bf16.msra.mxu0 %v4111_v50  ;;  %3056 = vmatpush1.bf16.msra.mxu1 %v4113_v51  ;;  %v408_v50 = vld [vmem:[#allocation5 + $0x9b0] sm:$0xff]  ;;  %v405_v51 = vld [vmem:[#allocation5 + $0x998] sm:$0xff] }
 0x1a1   :  { %2893 = vmatprep.subr.bf16.mxu0 %v4120_v52  ;;  %3057 = vmatprep.subr.bf16.mxu1 %v4122_v53  ;;  %v409_v52 = vld [vmem:[#allocation5 + $0x9b8] sm:$0xff]  ;;  %v4175_v53 = vcombine.low %v396_v39, %v400_v40  ;;  %v4184_v55 = vcombine.high %v404_v49, %v408_v50 }
 0x1a2   :  { %v4186_v56 = vcombine.high %v405_v51, %v409_v52  ;;  %v4185_v63 = vcombine.low %v405_v51, %v409_v52  ;;  %v468_v52 = vld [vmem:[#allocation5 + $0xb90] sm:$0xff] }
 0x1a4   :  { %2894 = vmatpush1.bf16.msra.mxu0 %v4119_v59  ;;  %3058 = vmatpush1.bf16.msra.mxu1 %v4121_v60  ;;  %v416_v59 = vld [vmem:[#allocation5 + $0x9f0] sm:$0xff]  ;;  %v413_v60 = vld [vmem:[#allocation5 + $0x9d8] sm:$0xff] }
 0x1a5   :  { %2895 = vmatprep.subr.bf16.mxu0 %v4128_v61  ;;  %3059 = vmatprep.subr.bf16.mxu1 %v4130_v62  ;;  %v417_v61 = vld [vmem:[#allocation5 + $0x9f8] sm:$0xff]  ;;  %v4183_v62 = vcombine.low %v404_v49, %v408_v50  ;;  %v4192_v0 = vcombine.high %v412_v58, %v416_v59 }
 0x1a6   :  { %v4194_v1 = vcombine.high %v413_v60, %v417_v61  ;;  %v4193_v7 = vcombine.low %v413_v60, %v417_v61  ;;  %v476_v61 = vld [vmem:[#allocation5 + $0xbd0] sm:$0xff] }
 0x1a8   :  { %2896 = vmatpush1.bf16.msra.mxu0 %v4127_v3  ;;  %3060 = vmatpush1.bf16.msra.mxu1 %v4129_v4  ;;  %v424_v3 = vld [vmem:[#allocation5 + $0xa30] sm:$0xff]  ;;  %v421_v4 = vld [vmem:[#allocation5 + $0xa18] sm:$0xff] }
 0x1a9   :  { %2906 = vmatprep.subr.bf16.mxu0 %v4136_v5  ;;  %3070 = vmatprep.subr.bf16.mxu1 %v4138_v6  ;;  %v425_v5 = vld [vmem:[#allocation5 + $0xa38] sm:$0xff]  ;;  %v4191_v6 = vcombine.low %v412_v58, %v416_v59  ;;  %v4200_v8 = vcombine.high %v420_v2, %v424_v3 }
 0x1aa   :  { %v4202_v9 = vcombine.high %v421_v4, %v425_v5  ;;  %v4201_v15 = vcombine.low %v421_v4, %v425_v5  ;;  %v484_v5 = vld [vmem:[#allocation5 + $0xc10] sm:$0xff] }
 0x1ab   :  { %2898 = vmatmul.mubr.bf16.vlgmr.msra.gmra.mrb[4].mxu0 %v4812_v25  ;;  %3062 = vmatmul.mubr.bf16.vlgmr.msra.gmra.mrb[4].mxu1 %v4812_v25  ;;  %v4153_v25 = vcombine.low %v373_v17, %v377_v12  ;;  %v436_v12 = vld [vmem:[#allocation5 + $0xa90] sm:$0xff] }
 0x1ac   :  { %2907 = vmatpush1.bf16.msra.mxu0 %v4135_v11  ;;  %3071 = vmatpush1.bf16.msra.mxu1 %v4137_v13  ;;  %v432_v11 = vld [vmem:[#allocation5 + $0xa70] sm:$0xff]  ;;  %v429_v13 = vld [vmem:[#allocation5 + $0xa58] sm:$0xff] }
 0x1ad   :  { %2908 = vmatprep.subr.bf16.mxu0 %v4144_v14  ;;  %3072 = vmatprep.subr.bf16.mxu1 %v4146_v57  ;;  %v433_v14 = vld [vmem:[#allocation5 + $0xa78] sm:$0xff]  ;;  %v4199_v57 = vcombine.low %v420_v2, %v424_v3  ;;  %v4208_v16 = vcombine.high %v428_v10, %v432_v11 }
 0x1ae   :  { %2938 = vmatprep.mubr.bf16.mxu0 %v4814_v32  ;;  %3102 = vmatprep.mubr.bf16.mxu1 %v4814_v32  ;;  %v4170_v32 = vcombine.high %v389_v33, %v393_v35  ;;  %v4210_v17 = vcombine.high %v429_v13, %v433_v14  ;;  %v4209_v23 = vcombine.low %v429_v13, %v433_v14  ;;  %v452_v35 = vld [vmem:[#allocation5 + $0xb10] sm:$0xff] }
 0x1b0   :  { %2909 = vmatpush1.bf16.msra.mxu0 %v4143_v18  ;;  %3073 = vmatpush1.bf16.msra.mxu1 %v4145_v19  ;;  %v440_v18 = vld [vmem:[#allocation5 + $0xab0] sm:$0xff]  ;;  %v437_v19 = vld [vmem:[#allocation5 + $0xa98] sm:$0xff] }
 0x1b1   :  { %2910 = vmatprep.subr.bf16.mxu0 %v4152_v20  ;;  %3074 = vmatprep.subr.bf16.mxu1 %v4154_v21  ;;  %v441_v20 = vld [vmem:[#allocation5 + $0xab8] sm:$0xff]  ;;  %v4207_v21 = vcombine.low %v428_v10, %v432_v11  ;;  %v4216_v24 = vcombine.high %v436_v12, %v440_v18 }
 0x1b2   :  { %v4218_v26 = vcombine.high %v437_v19, %v441_v20  ;;  %v4217_v30 = vcombine.low %v437_v19, %v441_v20  ;;  %v4494_v19 = vld [vmem:[#allocation8 + $0x80] sm:$0xff]   ;;  %v4495_v20 = vld [vmem:[#allocation8 + $0x48] sm:$0xff]  }
 0x1b4   :  { %2911 = vmatpush1.bf16.msra.mxu0 %v4151_v28  ;;  %3075 = vmatpush1.bf16.msra.mxu1 %v4153_v25  ;;  %v448_v28 = vld [vmem:[#allocation5 + $0xaf0] sm:$0xff]  ;;  %v445_v25 = vld [vmem:[#allocation5 + $0xad8] sm:$0xff] }
 0x1b5   :  { %2912 = vmatprep.subr.bf16.mxu0 %v4160_v22  ;;  %3076 = vmatprep.subr.bf16.mxu1 %v4162_v29  ;;  %v449_v22 = vld [vmem:[#allocation5 + $0xaf8] sm:$0xff]  ;;  %v4215_v29 = vcombine.low %v436_v12, %v440_v18  ;;  %v4224_v31 = vcombine.high %v444_v27, %v448_v28  ;;  %v4493_v12 = vld [vmem:[#allocation8] sm:$0xff]  }
 0x1b6   :  { %v4226_v33 = vcombine.high %v445_v25, %v449_v22  ;;  %v4225_v39 = vcombine.low %v445_v25, %v449_v22  ;;  %v4501_v25 = vld [vmem:[#allocation8 + $0x10] sm:$0xff]  }
 0x1b8   :  { %2913 = vmatpush1.bf16.msra.mxu0 %v4159_v36  ;;  %3077 = vmatpush1.bf16.msra.mxu1 %v4161_v37  ;;  %v456_v36 = vld [vmem:[#allocation5 + $0xb30] sm:$0xff]  ;;  %v453_v37 = vld [vmem:[#allocation5 + $0xb18] sm:$0xff] }
 0x1b9   :  { %2914 = vmatprep.subr.bf16.mxu0 %v4168_v38  ;;  %3078 = vmatprep.subr.bf16.mxu1 %v4170_v32  ;;  %v457_v38 = vld [vmem:[#allocation5 + $0xb38] sm:$0xff]  ;;  %v4223_v32 = vcombine.low %v444_v27, %v448_v28  ;;  %v4232_v40 = vcombine.high %v452_v35, %v456_v36 }
 0x1ba   :  { %v4234_v41 = vcombine.high %v453_v37, %v457_v38  ;;  %v4233_v49 = vcombine.low %v453_v37, %v457_v38  ;;  %v4500_v28 = vld [vmem:[#allocation8 + $0xd0] sm:$0xff]  }
 0x1bc   :  { %2915 = vmatpush1.bf16.msra.mxu0 %v4167_v44  ;;  %3079 = vmatpush1.bf16.msra.mxu1 %v4169_v45  ;;  %v464_v44 = vld [vmem:[#allocation5 + $0xb70] sm:$0xff]  ;;  %v461_v45 = vld [vmem:[#allocation5 + $0xb58] sm:$0xff] }
 0x1bd   :  { %2916 = vmatprep.subr.bf16.mxu0 %v4176_v46  ;;  %3080 = vmatprep.subr.bf16.mxu1 %v4178_v48  ;;  %v465_v46 = vld [vmem:[#allocation5 + $0xb78] sm:$0xff]  ;;  %v4231_v48 = vcombine.low %v452_v35, %v456_v36  ;;  %v4240_v50 = vcombine.high %v460_v42, %v464_v44 }
 0x1be   :  { %v4242_v51 = vcombine.high %v461_v45, %v465_v46  ;;  %v4241_v58 = vcombine.low %v461_v45, %v465_v46  ;;  %v4507_v45 = vld [vmem:[#allocation8 + $0x60] sm:$0xff]  }
 0x1c0   :  { %2917 = vmatpush1.bf16.msra.mxu0 %v4175_v53  ;;  %3081 = vmatpush1.bf16.msra.mxu1 %v4177_v54  ;;  %v472_v53 = vld [vmem:[#allocation5 + $0xbb0] sm:$0xff]  ;;  %v469_v54 = vld [vmem:[#allocation5 + $0xb98] sm:$0xff] }
 0x1c1   :  { %2918 = vmatprep.subr.bf16.mxu0 %v4184_v55  ;;  %3082 = vmatprep.subr.bf16.mxu1 %v4186_v56  ;;  %v473_v55 = vld [vmem:[#allocation5 + $0xbb8] sm:$0xff]  ;;  %v4239_v56 = vcombine.low %v460_v42, %v464_v44  ;;  %v4248_v59 = vcombine.high %v468_v52, %v472_v53  ;;  %v4506_v44 = vld [vmem:[#allocation8 + $0x98] sm:$0xff]  }
 0x1c2   :  { %v4250_v60 = vcombine.high %v469_v54, %v473_v55  ;;  %v4249_v2 = vcombine.low %v469_v54, %v473_v55  ;;  %v4510_v55 = vld [vmem:[#allocation8 + $0xa0] sm:$0xff]  }
 0x1c4   :  { %2919 = vmatpush1.bf16.msra.mxu0 %v4183_v62  ;;  %3083 = vmatpush1.bf16.msra.mxu1 %v4185_v63  ;;  %v480_v62 = vld [vmem:[#allocation5 + $0xbf0] sm:$0xff]  ;;  %v477_v63 = vld [vmem:[#allocation5 + $0xbd8] sm:$0xff] }
 0x1c5   :  { %2920 = vmatprep.subr.bf16.mxu0 %v4192_v0  ;;  %3084 = vmatprep.subr.bf16.mxu1 %v4194_v1  ;;  %v481_v0 = vld [vmem:[#allocation5 + $0xbf8] sm:$0xff]  ;;  %v4247_v1 = vcombine.low %v468_v52, %v472_v53  ;;  %v4256_v3 = vcombine.high %v476_v61, %v480_v62  ;;  %v4509_v52 = vld [vmem:[#allocation8 + $0x20] sm:$0xff]  }
 0x1c6   :  { %v4258_v4 = vcombine.high %v477_v63, %v481_v0  ;;  %v4257_v10 = vcombine.low %v477_v63, %v481_v0  ;;  %v4515_v63 = vld [vmem:[#allocation8 + $0x70] sm:$0xff]  }
 0x1c8   :  { %2921 = vmatpush1.bf16.msra.mxu0 %v4191_v6  ;;  %3085 = vmatpush1.bf16.msra.mxu1 %v4193_v7  ;;  %v488_v6 = vld [vmem:[#allocation5 + $0xc30] sm:$0xff]  ;;  %v485_v7 = vld [vmem:[#allocation5 + $0xc18] sm:$0xff] }
 0x1c9   :  { %2922 = vmatprep.subr.bf16.mxu0 %v4200_v8  ;;  %3086 = vmatprep.subr.bf16.mxu1 %v4202_v9  ;;  %v489_v8 = vld [vmem:[#allocation5 + $0xc38] sm:$0xff]  ;;  %v4255_v9 = vcombine.low %v476_v61, %v480_v62  ;;  %v4264_v11 = vcombine.high %v484_v5, %v488_v6  ;;  %v4263_v14 = vcombine.low %v484_v5, %v488_v6  ;;  %v4514_v62 = vld [vmem:[#allocation8 + $0xa8] sm:$0xff]   ;;  %v4519_v5 = vld [vmem:[#allocation8 + $0x78] sm:$0xff]  }
 0x1ca   :  { %v4266_v13 = vcombine.high %v485_v7, %v489_v8 }
 0x1cc   :  { %2923 = vmatpush1.bf16.msra.mxu0 %v4199_v57  ;;  %3087 = vmatpush1.bf16.msra.mxu1 %v4201_v15  ;;  %v4265_v57 = vcombine.low %v485_v7, %v489_v8  ;;  %v4491_v15 = vld [vmem:[#allocation8 + $0x40] sm:$0xff]   ;;  %v4520_v7 = vld [vmem:[#allocation8 + $0xf8] sm:$0xff]  }
 0x1cd   :  { %2924 = vmatprep.subr.bf16.mxu0 %v4208_v16  ;;  %3088 = vmatprep.subr.bf16.mxu1 %v4210_v17  ;;  %v4492_v16 = vld [vmem:[#allocation8 + $0xc0] sm:$0xff]   ;;  %v492_v17 = vlaneseq  ;;  %v4521_v8 = vld [vmem:[#allocation8 + $0x38] sm:$0xff]  }
 0x1cf   :  { %v4846_v18 = vshrl.u32 %v492_v17, 7  ;;  %v4527_v17 = vld [vmem:[#allocation8 + $0x148] sm:$0xff]  }
 0x1d0   :  { %2925 = vmatpush1.bf16.msra.mxu0 %v4207_v21  ;;  %3089 = vmatpush1.bf16.msra.mxu1 %v4209_v23  ;;  %v4496_v21 = vld [vmem:[#allocation8 + $0xc8] sm:$0xff]  }
 0x1d1   :  { %2926 = vmatprep.subr.bf16.mxu0 %v4216_v24  ;;  %3090 = vmatprep.subr.bf16.mxu1 %v4218_v26  ;;  %v498_v23 = vsub.s32 1, %v4846_v18  ;;  %v4499_v24 = vld [vmem:[#allocation8 + $0x50] sm:$0xff]   ;;  %v4853_v26 = vld [vmem:[#allocation7] sm:$0xff]  ;;  %v506_v27 = vsub.s32 3, %v4846_v18  ;;  %v494_v53 = vsub.s32 0, %v4846_v18 }
 0x1d3   :  { %v499_v22 = vrot.slane %v4853_v26, %v498_v23  ;;  %v495_v61 = vrot.slane %v4853_v26, %v494_v53  ;;  %v4532_v23 = vld [vmem:[#allocation8 + $0x1d0] sm:$0xff]  }
 0x1d4   :  { %2927 = vmatpush1.bf16.msra.mxu0 %v4215_v29  ;;  %3091 = vmatpush1.bf16.msra.mxu1 %v4217_v30  ;;  %v507_v29 = vrot.slane %v4853_v26, %v506_v27  ;;  %v4503_v30 = vld [vmem:[#allocation8 + $0x58] sm:$0xff]  }
 0x1d5   :  { %2928 = vmatprep.subr.bf16.mxu0 %v4224_v31  ;;  %3092 = vmatprep.subr.bf16.mxu1 %v4226_v33  ;;  %v4504_v33 = vld [vmem:[#allocation8 + $0xd8] sm:$0xff]  }
 0x1d6   :  { %v4535_v27 = vld [vmem:[#allocation8 + $0x158] sm:$0xff]  }
 0x1d8   :  { %2929 = vmatpush1.bf16.msra.mxu0 %v4223_v32  ;;  %3093 = vmatpush1.bf16.msra.mxu1 %v4225_v39  ;;  %v4505_v39 = vld [vmem:[#allocation8 + $0x18] sm:$0xff]  }
 0x1d9   :  { %2930 = vmatprep.subr.bf16.mxu0 %v4232_v40  ;;  %3094 = vmatprep.subr.bf16.mxu1 %v4234_v41 }
 0x1dc   :  { %2931 = vmatpush1.bf16.msra.mxu0 %v4231_v48  ;;  %3095 = vmatpush1.bf16.msra.mxu1 %v4233_v49  ;;  %v4508_v49 = vld [vmem:[#allocation8 + $0xe0] sm:$0xff]  }
 0x1dd   :  { %2932 = vmatprep.subr.bf16.mxu0 %v4240_v50  ;;  %3096 = vmatprep.subr.bf16.mxu1 %v4242_v51 }
 0x1e0   :  { %2933 = vmatpush1.bf16.msra.mxu0 %v4239_v56  ;;  %3097 = vmatpush1.bf16.msra.mxu1 %v4241_v58  ;;  %v4511_v56 = vld [vmem:[#allocation8 + $0x68] sm:$0xff]   ;;  %v502_v58 = vsub.s32 2, %v4846_v18 }
 0x1e1   :  { %2934 = vmatprep.subr.bf16.mxu0 %v4248_v59  ;;  %3098 = vmatprep.subr.bf16.mxu1 %v4250_v60  ;;  %v4512_v59 = vld [vmem:[#allocation8 + $0xe8] sm:$0xff]  }
 0x1e2   :  { %v4513_v60 = vld [vmem:[#allocation8 + $0x28] sm:$0xff]   ;;  %v503_v0 = vrot.slane %v4853_v26, %v502_v58 }
 0x1e4   :  { %2935 = vmatpush1.bf16.msra.mxu0 %v4247_v1  ;;  %3099 = vmatpush1.bf16.msra.mxu1 %v4249_v2  ;;  %v4516_v1 = vld [vmem:[#allocation8 + $0xf0] sm:$0xff]  }
 0x1e5   :  { %2936 = vmatprep.subr.bf16.mxu0 %v4256_v3  ;;  %3100 = vmatprep.subr.bf16.mxu1 %v4258_v4  ;;  %v4517_v2 = vld [vmem:[#allocation8 + $0x30] sm:$0xff]  }
 0x1e6   :  { %v4518_v4 = vld [vmem:[#allocation8 + $0xb0] sm:$0xff]  }
 0x1e8   :  { %2937 = vmatpush1.bf16.msra.mxu0 %v4255_v9  ;;  %3101 = vmatpush1.bf16.msra.mxu1 %v4257_v10  ;;  %v4522_v10 = vld [vmem:[#allocation8 + $0xb8] sm:$0xff]  }
 0x1e9   :  { %2947 = vmatprep.subr.bf16.mxu0 %v4264_v11  ;;  %3111 = vmatprep.subr.bf16.mxu1 %v4266_v13  ;;  %v4523_v11 = vld [vmem:[#allocation8 + $0x140] sm:$0xff]  }
 0x1eb   :  { %2939 = vmatmul.mubr.bf16.vlgmr.msra.gmra.mrb[4].mxu0 %v4820_v34  ;;  %3103 = vmatmul.mubr.bf16.vlgmr.msra.gmra.mrb[4].mxu1 %v4820_v34  ;;  %v4497_v34 = vld [vmem:[#allocation8 + $0x8] sm:$0xff]  }
 0x1ec   :  { %2948 = vmatpush1.bf16.msra.mxu0 %v4263_v14  ;;  %3112 = vmatpush1.bf16.msra.mxu1 %v4265_v57  ;;  %v4524_v14 = vld [vmem:[#allocation8 + $0x1c0] sm:$0xff]  }
 0x1ed   :  { %2979 = vmatprep.mubr.bf16.mxu0 %v4708_v43  ;;  %3143 = vmatprep.mubr.bf16.mxu1 %v4708_v43  ;;  %v4498_v43 = vld [vmem:[#allocation8 + $0x88] sm:$0xff]   ;;  %v4525_v57 = vld [vmem:[#allocation8 + $0x100] sm:$0xff]  }
 0x1ee   :  { %4336 = vmatprep.subr.bf16.mxu0 %v4491_v15  ;;  %4358 = vmatprep.subr.bf16.mxu1 %v4492_v16  ;;  %v4526_v16 = vld [vmem:[#allocation8 + $0x180] sm:$0xff]  }
 0x1f7   :  { %4269 = vmatmul.mubr.msk.bf16.vlgmr.msra.gmra.mrb[4].mxu0 %vm2492_vm0, %v4826_v47  ;;  %4270 = vmatmul.mubr.msk.bf16.vlgmr.msra.gmra.mrb[4].mxu1 %vm2492_vm0, %v4826_v47  ;;  %v4502_v47 = vld [vmem:[#allocation8 + $0x90] sm:$0xff]  }
 0x1f8   :  { %4337 = vmatpush3.bf16.msra.mxu0 %v4493_v12  ;;  %4359 = vmatpush3.bf16.msra.mxu1 %v4494_v19  ;;  %v4528_v19 = vld [vmem:[#allocation8 + $0x1c8] sm:$0xff]  }
 0x1f9   :  { %4338 = vmatprep.subr.bf16.mxu0 %v4495_v20  ;;  %4360 = vmatprep.subr.bf16.mxu1 %v4496_v21  ;;  %v4529_v20 = vld [vmem:[#allocation8 + $0x108] sm:$0xff]  }
 0x1fa   :  { %v4530_v21 = vld [vmem:[#allocation8 + $0x188] sm:$0xff]  }
 0x1fc   :  { %4339 = vmatpush3.bf16.msra.mxu0 %v4497_v34  ;;  %4361 = vmatpush3.bf16.msra.mxu1 %v4498_v43  ;;  %v4531_v34 = vld [vmem:[#allocation8 + $0x150] sm:$0xff]  }
 0x1fd   :  { %4340 = vmatprep.subr.bf16.mxu0 %v4499_v24  ;;  %4362 = vmatprep.subr.bf16.mxu1 %v4500_v28  ;;  %v4533_v43 = vld [vmem:[#allocation8 + $0x110] sm:$0xff]   ;;  %v4536_v28 = vld [vmem:[#allocation8 + $0x1d8] sm:$0xff]  }
 0x1fe   :  { %v2653_v31 = vpop.f32.mrb[0].mxu0  ;;  %v2817_v35 = vpop.f32.mrb[0].mxu1  ;;  %v4534_v24 = vld [vmem:[#allocation8 + $0x190] sm:$0xff]  }
 0x1ff   :  { %v2655_v36 = vpop.f32.mrb[1].mxu0  ;;  %v2819_v38 = vpop.f32.mrb[1].mxu1  ;;  %v4424_v3 = vadd.f32 %v2653_v31, %v495_v61  ;;  %v4426_v6 = vadd.f32 %v2817_v35, %v503_v0  ;;  %v4542_v31 = vld [vmem:[#allocation8 + $0x1a0] sm:$0xff]   ;;  %v4544_v35 = vld [vmem:[#allocation8 + $0x1e8] sm:$0xff]  }
 0x200   :  { %4341 = vmatpush3.bf16.msra.mxu0 %v4501_v25  ;;  %v4425_v37 = vadd.f32 %v2655_v36, %v499_v22  ;;  %v2657_v32 = vpop.f32.mrb[2].mxu0  ;;  %4363 = vmatpush3.bf16.msra.mxu1 %v4502_v47  ;;  %v4427_v40 = vadd.f32 %v2819_v38, %v507_v29  ;;  %v2821_v41 = vpop.f32.mrb[2].mxu1  ;;  %v4537_v25 = vld [vmem:[#allocation8 + $0x118] sm:$0xff]   ;;  %v4539_v47 = vld [vmem:[#allocation8 + $0x160] sm:$0xff]   ;;  %v4545_v36 = vld [vmem:[#allocation8 + $0x128] sm:$0xff]  }
 0x201   :  { %v2658_v42 = vpop.f32.mrb[3].mxu0  ;;  %4342 = vmatprep.subr.bf16.mxu0 %v4503_v30  ;;  %v2822_v48 = vpop.f32.mrb[3].mxu1  ;;  %4364 = vmatprep.subr.bf16.mxu1 %v4504_v33  ;;  %v3152_v9 = vmax.f32 %v4424_v3, 0.0  ;;  %v3154_v13 = vmax.f32 %v4426_v6, 0.0  ;;  %v4538_v22 = vld [vmem:[#allocation8 + $0x198] sm:$0xff]   ;;  %v4540_v29 = vld [vmem:[#allocation8 + $0x1e0] sm:$0xff]  }
 0x202   :  { %v3153_v46 = vmax.f32 %v4425_v37, 0.0  ;;  %v3155_v50 = vmax.f32 %v4427_v40, 0.0  ;;  %v4541_v30 = vld [vmem:[#allocation8 + $0x120] sm:$0xff]   ;;  %v4543_v33 = vld [vmem:[#allocation8 + $0x168] sm:$0xff]   ;;  %v4547_v38 = vld [vmem:[#allocation8 + $0x170] sm:$0xff]   ;;  %v518_v48 = vsub.s32 6, %v4846_v18 }
 0x203   :  { %v3160_v15 = vpack.c.bf16 %v3152_v9, %v3152_v9  ;;  %v3162_v12 = vpack.c.bf16 %v3154_v13, %v3154_v13  ;;  %v4546_v37 = vld [vmem:[#allocation8 + $0x1a8] sm:$0xff]   ;;  %v4548_v32 = vld [vmem:[#allocation8 + $0x1f0] sm:$0xff]   ;;  %v4551_v41 = vld [vmem:[#allocation8 + $0x178] sm:$0xff]  }
 0x204   :  { %v3161_v51 = vpack.c.bf16 %v3153_v46, %v3153_v46  ;;  %4343 = vmatpush3.bf16.msra.mxu0 %v4505_v39  ;;  %v3163_v54 = vpack.c.bf16 %v3155_v50, %v3155_v50  ;;  %4365 = vmatpush3.bf16.msra.mxu1 %v4506_v44  ;;  %v4549_v39 = vld [vmem:[#allocation8 + $0x130] sm:$0xff]   ;;  %v4552_v42 = vld [vmem:[#allocation8 + $0x1f8] sm:$0xff]   ;;  %v510_v46 = vsub.s32 4, %v4846_v18  ;;  %v522_v50 = vsub.s32 7, %v4846_v18  ;;  %v4271_v13 = vld [vmem:[#allocation10] ss:$0 sm:$0xff] }
 0x205   :  { %4344 = vmatprep.subr.bf16.mxu0 %v4507_v45  ;;  %4366 = vmatprep.subr.bf16.mxu1 %v4508_v49  ;;  %v4550_v40 = vld [vmem:[#allocation8 + $0x1b0] sm:$0xff]   ;;  %v4553_v44 = vld [vmem:[#allocation8 + $0x138] sm:$0xff]   ;;  %v514_v49 = vsub.s32 5, %v4846_v18 }
 0x206   :  { %3719 = vmatprep.mubr.bf16.mxu0 %v3161_v51  ;;  %3759 = vmatprep.mubr.bf16.mxu1 %v3163_v54  ;;  %v4554_v45 = vld [vmem:[#allocation8 + $0x1b8] sm:$0xff]   ;;  %v511_v51 = vrot.slane %v4853_v26, %v510_v46  ;;  %v523_v54 = vrot.slane %v4853_v26, %v522_v50 }
 0x207   :  { %v515_v53 = vrot.slane %v4853_v26, %v514_v49 }
 0x208   :  { %4345 = vmatpush3.bf16.msra.mxu0 %v4509_v52  ;;  %4367 = vmatpush3.bf16.msra.mxu1 %v4510_v55  ;;  %v519_v52 = vrot.slane %v4853_v26, %v518_v48 }
 0x209   :  { %4346 = vmatprep.subr.bf16.mxu0 %v4511_v56  ;;  %4368 = vmatprep.subr.bf16.mxu1 %v4512_v59 }
 0x20c   :  { %4347 = vmatpush3.bf16.msra.mxu0 %v4513_v60  ;;  %4369 = vmatpush3.bf16.msra.mxu1 %v4514_v62 }
 0x20d   :  { %4348 = vmatprep.subr.bf16.mxu0 %v4515_v63  ;;  %4370 = vmatprep.subr.bf16.mxu1 %v4516_v1 }
 0x210   :  { %4349 = vmatpush3.bf16.msra.mxu0 %v4517_v2  ;;  %4371 = vmatpush3.bf16.msra.mxu1 %v4518_v4 }
 0x211   :  { %4350 = vmatprep.subr.bf16.mxu0 %v4519_v5  ;;  %4372 = vmatprep.subr.bf16.mxu1 %v4520_v7 }
 0x214   :  { %4351 = vmatpush3.bf16.msra.mxu0 %v4521_v8  ;;  %4373 = vmatpush3.bf16.msra.mxu1 %v4522_v10 }
 0x215   :  { %4380 = vmatprep.subr.bf16.mxu0 %v4523_v11  ;;  %4402 = vmatprep.subr.bf16.mxu1 %v4524_v14 }
 0x217   :  { %3720 = vmatmul.mubr.bf16.vlgmr.msra.gmra.mrb[8].mxu0 %v3160_v15  ;;  %3760 = vmatmul.mubr.bf16.vlgmr.msra.gmra.mrb[8].mxu1 %v3162_v12 }
 0x218   :  { %4381 = vmatpush3.bf16.msra.mxu0 %v4525_v57  ;;  %4403 = vmatpush3.bf16.msra.mxu1 %v4526_v16 }
 0x219   :  { %4382 = vmatprep.subr.bf16.mxu0 %v4527_v17  ;;  %4404 = vmatprep.subr.bf16.mxu1 %v4528_v19 }
 0x21c   :  { %4383 = vmatpush3.bf16.msra.mxu0 %v4529_v20  ;;  %4405 = vmatpush3.bf16.msra.mxu1 %v4530_v21 }
 0x21d   :  { %4384 = vmatprep.subr.bf16.mxu0 %v4531_v34  ;;  %4406 = vmatprep.subr.bf16.mxu1 %v4532_v23 }
 0x220   :  { %4385 = vmatpush3.bf16.msra.mxu0 %v4533_v43  ;;  %4407 = vmatpush3.bf16.msra.mxu1 %v4534_v24 }
 0x221   :  { %4386 = vmatprep.subr.bf16.mxu0 %v4535_v27  ;;  %4408 = vmatprep.subr.bf16.mxu1 %v4536_v28 }
 0x224   :  { %4387 = vmatpush3.bf16.msra.mxu0 %v4537_v25  ;;  %4409 = vmatpush3.bf16.msra.mxu1 %v4538_v22 }
 0x225   :  { %4388 = vmatprep.subr.bf16.mxu0 %v4539_v47  ;;  %4410 = vmatprep.subr.bf16.mxu1 %v4540_v29 }
 0x228   :  { %4389 = vmatpush3.bf16.msra.mxu0 %v4541_v30  ;;  %4411 = vmatpush3.bf16.msra.mxu1 %v4542_v31 }
 0x229   :  { %4390 = vmatprep.subr.bf16.mxu0 %v4543_v33  ;;  %4412 = vmatprep.subr.bf16.mxu1 %v4544_v35 }
 0x22c   :  { %4391 = vmatpush3.bf16.msra.mxu0 %v4545_v36  ;;  %4413 = vmatpush3.bf16.msra.mxu1 %v4546_v37 }
 0x22d   :  { %4392 = vmatprep.subr.bf16.mxu0 %v4547_v38  ;;  %4414 = vmatprep.subr.bf16.mxu1 %v4548_v32 }
 0x230   :  { %4393 = vmatpush3.bf16.msra.mxu0 %v4549_v39  ;;  %4415 = vmatpush3.bf16.msra.mxu1 %v4550_v40 }
 0x231   :  { %4394 = vmatprep.subr.bf16.mxu0 %v4551_v41  ;;  %4416 = vmatprep.subr.bf16.mxu1 %v4552_v42 }
 0x234   :  { %4395 = vmatpush3.bf16.msra.mxu0 %v4553_v44  ;;  %4417 = vmatpush3.bf16.msra.mxu1 %v4554_v45 }
 0x2ca   :  { %v2981_v55 = vpop.f32.mrb[4].mxu0  ;;  %v3145_v58 = vpop.f32.mrb[4].mxu1 }
 0x2cb   :  { %v4428_v56 = vadd.f32 %v2981_v55, %v511_v51  ;;  %v2983_v59 = vpop.f32.mrb[5].mxu0  ;;  %v4430_v60 = vadd.f32 %v3145_v58, %v519_v52  ;;  %v3147_v62 = vpop.f32.mrb[5].mxu1 }
 0x2cc   :  { %v4429_v61 = vadd.f32 %v2983_v59, %v515_v53  ;;  %v2985_v63 = vpop.f32.mrb[6].mxu0  ;;  %v4431_v1 = vadd.f32 %v3147_v62, %v523_v54  ;;  %v3149_v2 = vpop.f32.mrb[6].mxu1 }
 0x2cd   :  { %v3156_v0 = vmax.f32 %v4428_v56, 0.0  ;;  %v2986_v18 = vpop.f32.mrb[7].mxu0  ;;  %v3158_v3 = vmax.f32 %v4430_v60, 0.0  ;;  %v3150_v5 = vpop.f32.mrb[7].mxu1 }
 0x2ce   :  { %v3157_v4 = vmax.f32 %v4429_v61, 0.0  ;;  %v3159_v6 = vmax.f32 %v4431_v1, 0.0 }
 0x2cf   :  { %v3164_v8 = vpack.c.bf16 %v3156_v0, %v3156_v0  ;;  %v3166_v26 = vpack.c.bf16 %v3158_v3, %v3158_v3 }
 0x2d0   :  { %v3165_v7 = vpack.c.bf16 %v3157_v4, %v3157_v4  ;;  %v3167_v9 = vpack.c.bf16 %v3159_v6, %v3159_v6 }
 0x2d2   :  { %3799 = vmatprep.mubr.bf16.mxu0 %v3165_v7  ;;  %3839 = vmatprep.mubr.bf16.mxu1 %v3167_v9 }
 0x2d3   :  { %3800 = vmatmul.mubr.bf16.vlgmr.msra.gmra.mrb[12].mxu0 %v3164_v8  ;;  %3840 = vmatmul.mubr.bf16.vlgmr.msra.gmra.mrb[12].mxu1 %v3166_v26 }
 0x2ea   :  { %v4352_v10 = vpop.f32.mrb[8].mxu0  ;;  %v4374_v11 = vpop.f32.mrb[8].mxu1 }
 0x2eb   :  { %v4353_v14 = vpop.f32.mrb[9].mxu0  ;;  %v4375_v15 = vpop.f32.mrb[9].mxu1 }
 0x2ec   :  { %v4354_v57 = vadd.f32 %v4353_v14, %v4352_v10  ;;  %v4355_v16 = vpop.f32.mrb[10].mxu0  ;;  %v4376_v17 = vadd.f32 %v4375_v15, %v4374_v11  ;;  %v4377_v12 = vpop.f32.mrb[10].mxu1 }
 0x2ed   :  { %v4356_v19 = vpop.f32.mrb[11].mxu0  ;;  %v4378_v21 = vpop.f32.mrb[11].mxu1 }
 0x2ee   :  { %v3722_v20 = vadd.f32 %v4354_v57, %v4271_v13 }
 0x2f0   :  { %v3762_v34 = vadd.f32 %v4376_v17, %v3722_v20 }
 0x3a6   :  { %v4396_v23 = vpop.f32.mrb[12].mxu0  ;;  %v4418_v43 = vpop.f32.mrb[12].mxu1 }
 0x3a7   :  { %v4397_v24 = vpop.f32.mrb[13].mxu0  ;;  %v4419_v28 = vpop.f32.mrb[13].mxu1 }
 0x3a8   :  { %v4398_v27 = vadd.f32 %v4397_v24, %v4396_v23  ;;  %v4399_v25 = vpop.f32.mrb[14].mxu0  ;;  %v4420_v22 = vadd.f32 %v4419_v28, %v4418_v43  ;;  %v4421_v47 = vpop.f32.mrb[14].mxu1 }
 0x3a9   :  { %v4400_v29 = vpop.f32.mrb[15].mxu0  ;;  %v4422_v31 = vpop.f32.mrb[15].mxu1 }
 0x3aa   :  { %v3802_v30 = vadd.f32 %v4398_v27, %v3762_v34 }
 0x3ac   :  { %v3842_v33 = vadd.f32 %v4420_v22, %v3802_v30 }
 0x3ae   :  { %3847 = vmax.xlane.f32.xlu0 %v3842_v33 }
 0x43b   :  { %v3848_v35 = vpop.xlane.xlu0 %3847 }
 0x43c   :  { %v3849_v36 = vsub.f32 %v3842_v33, %v3848_v35 }
 0x43e   :  { %v3850_v37 = vmul.f32 1.442695, %v3849_v36 }
 0x440   :  { %4555 = vpow2.f32 %v3850_v37 }
 0x44a   :  { %v4556_v38 = vpop.eup %4555 }
 0x44b   :  { %3852 = vadd.xlane.f32.xlu0 %v4556_v38 }
 0x4d8   :  { %v3853_v32 = vpop.xlane.xlu0 %3852 }
 0x4d9   :  { %4557 = vlog2.f32 %v3853_v32 }
 0x4e3   :  { %v4558_v39 = vpop.eup %4557 }
 0x4e4   :  { %v3855_v40 = vmul.f32 0.6931472, %v4558_v39 }
 0x4e6   :  { %v3856_v41 = vsub.f32 %v3849_v36, %v3855_v40 }
 0x4e8   :  { %3857 = vst [vmem:[#allocation11] sm:$0xff] %v3856_v41 }
 0x4e9   :  { %4680 = shalt.err (!%p4677_p2)
}
 0x4ea   :  { %s4681_s6 = scalar_lea.hbm %s4887_s5, 128 }
 0x4eb   :  { %p4682_p3 = scmp.ne.s32.totalorder %s4887_s5, %s4681_s6  ;;  %p4685_p4 = scmp.lt.u32.totalorder %s4681_s6, %s4887_s5 }
 0x4ed   :  { %p4687_p5 = pnand %p4685_p4, %p4682_p3 }
 0x4ef   :  { %4690 = shalt.err (!%p4687_p5)
}
 0x4f0   :  { %3867 = dma.vmem_to_hbm [thread:$0]  %s3865_s28, 128, %s4887_s5, [#allocation4]  }
 0x4f1   :  { %4697 = dma.done.wait [#allocation4], 128  }
 0x4f2   :  { %4698 = vsyncadd [#allocation4], 4294967168 }
 0x4f3   :  { %3871 = vsyncpa [#allocation3], 1 }
 0x4f4   :  { %3872 = vsyncpa [#allocation6], 1 }
 0x4f5   :  { %3873 = vsyncpa [#allocation9], 1 }
 0x4f6   :  { %3874 = vsyncpa [#allocation4], 1 }

</bundles_post_ra>
